<compile_context>
chip_gen: v7x
topology: tpu7x:2x2x1
jax: 0.10.0
libtpu: 0.0.40
codegen_flags: <defaults>
</compile_context>

<pallas_src>
import jax
import jax.numpy as jnp
from jax.experimental import pallas as pl
from jax.experimental.pallas import tpu as pltpu


def _tree_lstm_cell_kernel(x_ref, ch_ref, cc_ref, wx_ref, uiou_ref, uf_ref,
                           b_ref, hc_ref):
    """One node-tile of the Child-Sum TreeLSTM update.

    x_ref    : (bN, Din)      bf16  node inputs
    ch_ref   : (K, bN, M)     bf16  child hidden states (child-major, zero-padded)
    cc_ref   : (K, bN, M)     bf16  child cell states   (child-major, zero-padded)
    wx_ref   : (Din, 4M)      bf16  packed [W_i | W_o | W_u | W_f]
    uiou_ref : (M, 3M)        bf16  packed [U_i | U_o | U_u]
    uf_ref   : (M, M)         bf16  U_f
    b_ref    : (1, 4M)        f32   packed [b_i | b_o | b_u | b_f]
    hc_ref   : (bN, 2M)       f32   lane-dense output slab [h | c]
    """
    num_children = ch_ref.shape[0]
    block_n = ch_ref.shape[1]
    mem_dim = uf_ref.shape[0]

    x = x_ref[...]                                   # (bN, Din) bf16

    # Child-sum of hidden states.  K is small & static -> unrolled vector adds
    # in bf16 (feeds the MXU directly); no reshapes / cross-lane reductions.
    h_sum = ch_ref[0]
    for k in range(1, num_children):
        h_sum = h_sum + ch_ref[k]

    # Gate pre-activations.  Two bf16 MXU dots with f32 accumulation:
    #   z       = x @ [W_i|W_o|W_u|W_f] + b          (bN, 4M)
    #   z_iou   = z[:, :3M] + h_sum @ [U_i|U_o|U_u]   (bN, 3M)
    # columns [3M, 4M) of z hold W_f x + b_f (shared across children).
    z = jnp.dot(x, wx_ref[...], preferred_element_type=jnp.float32) + b_ref[...]
    z_iou = z[:, 0:3 * mem_dim] + jnp.dot(
        h_sum, uiou_ref[...], preferred_element_type=jnp.float32)

    i_gate = jax.nn.sigmoid(z_iou[:, 0 * mem_dim:1 * mem_dim])
    o_gate = jax.nn.sigmoid(z_iou[:, 1 * mem_dim:2 * mem_dim])
    u_gate = jnp.tanh(z_iou[:, 2 * mem_dim:3 * mem_dim])
    f_x = z[:, 3 * mem_dim:4 * mem_dim]              # (bN, M) f32

    # Per-child forget gates: ONE batched MXU dot over all K children.
    # (K, bN, M) -> (K*bN, M) is a layout-preserving leading-dim merge.
    ch_flat = ch_ref[...].reshape(num_children * block_n, mem_dim)
    fh = jnp.dot(ch_flat, uf_ref[...], preferred_element_type=jnp.float32)

    # Padded children have h_j = c_j = 0 (and finite), so they contribute
    # sigmoid(f_x) * 0 = 0 -> no mask tensor needed.
    fc_sum = jnp.zeros_like(i_gate)
    for k in range(num_children):
        fh_k = fh[k * block_n:(k + 1) * block_n, :]          # sublane-aligned
        f_k = jax.nn.sigmoid(fh_k + f_x)
        fc_sum = fc_sum + f_k * cc_ref[k].astype(jnp.float32)

    c_new = i_gate * u_gate + fc_sum
    h_new = o_gate * jnp.tanh(c_new)

    # Lane-dense output slab [h | c]; 128-aligned unmasked stores (M % 128 == 0).
    hc_ref[:, 0:mem_dim] = h_new.astype(hc_ref.dtype)
    hc_ref[:, mem_dim:2 * mem_dim] = c_new.astype(hc_ref.dtype)


def tree_lstm_cell(x, child_h_km, child_c_km, Wx, U_iou, U_f, b, *,
                   block_n=512):
    """Batched Child-Sum TreeLSTM node update via a tiled Pallas TPU kernel.

    Contract (to avoid extra HBM passes in a memory-bound kernel):
      x          : (N, in_dim)           ideally bf16
      child_h_km : (K, N, mem_dim)       CHILD-MAJOR, padded slots == 0 (finite!), bf16
      child_c_km : (K, N, mem_dim)       CHILD-MAJOR, padded slots == 0 (finite!), bf16
      Wx         : (in_dim, 4*mem_dim)   packed [W_i | W_o | W_u | W_f]
      U_iou      : (mem_dim, 3*mem_dim)  packed [U_i | U_o | U_u]
      U_f        : (mem_dim, mem_dim)
      b          : (1, 4*mem_dim)        packed [b_i | b_o | b_u | b_f] (kept f32)
      returns    : h (N, mem_dim) f32, c (N, mem_dim) f32
    """
    n, in_dim = x.shape
    k_children, _, mem_dim = child_h_km.shape
    act_dtype = jnp.bfloat16
    out_dtype = jnp.float32

    # Casts are no-ops when callers already provide bf16 (the intended path).
    def _cast(a):
        return a if a.dtype == act_dtype else a.astype(act_dtype)

    x = _cast(x)
    ch = _cast(child_h_km)
    cc = _cast(child_c_km)
    wx = _cast(Wx)
    u_iou = _cast(U_iou)
    u_f = _cast(U_f)
    b = b.astype(jnp.float32)

    # --- node-axis tiling ---------------------------------------------------
    block_n = int(max(8, min(block_n, n)))
    if n >= 16:
        # Keep the grid length >= 2 so v7x's two TensorCores both get work
        # (dimension_semantics=("parallel",)); harmless on v5e/v6e.
        half = -(-n // 2)                 # ceil(n / 2)
        half = -(-half // 8) * 8          # round up to a multiple of 8
        block_n = min(block_n, half)
    block_n = max(8, block_n - (block_n % 8))

    n_pad = int(pl.cdiv(n, block_n)) * block_n
    if n_pad != n:
        pad = n_pad - n
        x = jnp.pad(x, ((0, pad), (0, 0)))
        ch = jnp.pad(ch, ((0, 0), (0, pad), (0, 0)))
        cc = jnp.pad(cc, ((0, 0), (0, pad), (0, 0)))

    grid = (n_pad // block_n,)

    # VMEM budget: double-buffered activation tiles + single-buffered resident
    # weights + headroom; stays well under 64 MiB/TC (v7x) / 128 MiB (v5e/v6e).
    act_bytes = 2 * block_n * (in_dim + 2 * k_children * mem_dim)   # bf16 in
    out_bytes = 4 * block_n * 2 * mem_dim                           # f32 out
    weight_bytes = (2 * (in_dim * 4 * mem_dim
                         + mem_dim * 3 * mem_dim
                         + mem_dim * mem_dim)
                    + 4 * 4 * mem_dim)
    vmem_limit = int(min(48 * 1024 * 1024,
                         2 * (act_bytes + out_bytes) + weight_bytes
                         + 16 * 1024 * 1024))

    hc = pl.pallas_call(
        _tree_lstm_cell_kernel,
        out_shape=jax.ShapeDtypeStruct((n_pad, 2 * mem_dim), out_dtype),
        grid=grid,
        in_specs=[
            pl.BlockSpec((block_n, in_dim), lambda i: (i, 0)),
            pl.BlockSpec((k_children, block_n, mem_dim), lambda i: (0, i, 0)),
            pl.BlockSpec((k_children, block_n, mem_dim), lambda i: (0, i, 0)),
            pl.BlockSpec((in_dim, 4 * mem_dim), lambda i: (0, 0)),
            pl.BlockSpec((mem_dim, 3 * mem_dim), lambda i: (0, 0)),
            pl.BlockSpec((mem_dim, mem_dim), lambda i: (0, 0)),
            pl.BlockSpec((1, 4 * mem_dim), lambda i: (0, 0)),
        ],
        out_specs=pl.BlockSpec((block_n, 2 * mem_dim), lambda i: (i, 0)),
        compiler_params=pltpu.CompilerParams(
            dimension_semantics=("parallel",),
            vmem_limit_bytes=vmem_limit,
        ),
    )(x, ch, cc, wx, u_iou, u_f, b)

    h = hc[:n, :mem_dim]
    c = hc[:n, mem_dim:]
    return h, c


def _reference(x, child_h, child_c, Wx, U_iou, U_f, b):
    """Pure-JAX f32 reference (node-major, pre-masked children)."""
    M = child_h.shape[-1]
    h_sum = jnp.sum(child_h, axis=1)
    xw = x @ Wx
    hu = h_sum @ U_iou
    i = jax.nn.sigmoid(xw[:, :M] + hu[:, :M] + b[:, :M])
    o = jax.nn.sigmoid(xw[:, M:2 * M] + hu[:, M:2 * M] + b[:, M:2 * M])
    u = jnp.tanh(xw[:, 2 * M:3 * M] + hu[:, 2 * M:3 * M] + b[:, 2 * M:3 * M])
    fh = jnp.einsum('nkd,dm->nkm', child_h, U_f)
    f = jax.nn.sigmoid(fh + xw[:, 3 * M:][:, None, :] + b[:, 3 * M:][:, None, :])
    fc = jnp.sum(f * child_c, axis=1)
    c = i * u + fc
    h = o * jnp.tanh(c)
    return h, c


if __name__ == "__main__":
    in_dim = 128    # TreeLSTM.in_dim  (multiple of 128 -> lane-dense)
    mem_dim = 128   # TreeLSTM.mem_dim (multiple of 128 -> aligned gate slices)
    N = 512         # batch of tree nodes  -> grid of 2 node-tiles of 256 rows
    K = 4           # max children per node (padded, zeroed)

    key = jax.random.PRNGKey(0)
    ks = jax.random.split(key, 7)

    x_f32 = jax.random.normal(ks[0], (N, in_dim), dtype=jnp.float32)
    child_h = jax.random.normal(ks[1], (N, K, mem_dim), dtype=jnp.float32)
    child_c = jax.random.normal(ks[2], (N, K, mem_dim), dtype=jnp.float32)
    # deterministic child mask: node n has (n % K) + 1 valid children
    n_children = (jnp.arange(N) % K) + 1
    child_mask = (jnp.arange(K)[None, :] < n_children[:, None]
                  ).astype(jnp.float32)[..., None]

    scale_in = 1.0 / jnp.sqrt(jnp.float32(in_dim))
    scale_mem = 1.0 / jnp.sqrt(jnp.float32(mem_dim))
    Wx = jax.random.normal(ks[3], (in_dim, 4 * mem_dim), jnp.float32) * scale_in
    U_iou = jax.random.normal(ks[4], (mem_dim, 3 * mem_dim), jnp.float32) * scale_mem
    U_f = jax.random.normal(ks[5], (mem_dim, mem_dim), jnp.float32) * scale_mem
    b = jax.random.normal(ks[6], (1, 4 * mem_dim), jnp.float32) * 0.1

    # Kernel contract prepared ONCE in setup (not per call): mask applied,
    # cast to bf16, child-major (K, N, M) layout.  Padded slots are zero and
    # finite, as the no-mask kernel contract requires.
    x_bf = x_f32.astype(jnp.bfloat16)
    ch_nm = (child_h * child_mask).astype(jnp.bfloat16)     # (N, K, M)
    cc_nm = (child_c * child_mask).astype(jnp.bfloat16)
    ch_km = jnp.transpose(ch_nm, (1, 0, 2))                 # (K, N, M)
    cc_km = jnp.transpose(cc_nm, (1, 0, 2))
    Wx_bf = Wx.astype(jnp.bfloat16)
    U_iou_bf = U_iou.astype(jnp.bfloat16)
    U_f_bf = U_f.astype(jnp.bfloat16)

    h, c = jax.jit(tree_lstm_cell)(x_bf, ch_km, cc_km, Wx_bf, U_iou_bf,
                                   U_f_bf, b)
    jax.block_until_ready((h, c))

    # Reference in f32 on the SAME bf16-rounded values (so the comparison
    # measures kernel structure, not input quantization).
    h_ref, c_ref = _reference(
        x_bf.astype(jnp.float32),
        ch_nm.astype(jnp.float32),
        cc_nm.astype(jnp.float32),
        Wx_bf.astype(jnp.float32),
        U_iou_bf.astype(jnp.float32),
        U_f_bf.astype(jnp.float32),
        b,
    )

    assert jnp.allclose(h, h_ref, atol=5e-2, rtol=5e-2), "h mismatch"
    assert jnp.allclose(c, c_ref, atol=5e-2, rtol=5e-2), "c mismatch"

    print("KERNEL_OK")
</pallas_src>

<mosaic_0001>
module attributes {stable_mosaic.version = 11 : i64} {
  func.func @_tree_lstm_cell_kernel(%arg0: i32, %arg1: memref<256x128xbf16, #tpu.memory_space<vmem>>, %arg2: memref<4x256x128xbf16, #tpu.memory_space<vmem>>, %arg3: memref<4x256x128xbf16, #tpu.memory_space<vmem>>, %arg4: memref<128x512xbf16, #tpu.memory_space<vmem>>, %arg5: memref<128x384xbf16, #tpu.memory_space<vmem>>, %arg6: memref<128x128xbf16, #tpu.memory_space<vmem>>, %arg7: memref<1x512xf32, #tpu.memory_space<vmem>>, %arg8: memref<256x256xf32, #tpu.memory_space<vmem>>) attributes {dimension_semantics = [#tpu.dimension_semantics<parallel>], iteration_bounds = array<i64: 2>, scalar_prefetch = 0 : i64, scratch_operands = 0 : i64, tpu.core_type = #tpu.core_type<tc>, window_params = [{transform_indices = @transform_0, window_bounds = array<i64: 256, 128>}, {transform_indices = @transform_1, window_bounds = array<i64: 4, 256, 128>}, {transform_indices = @transform_2, window_bounds = array<i64: 4, 256, 128>}, {pipeline_mode = #tpu.pipeline_mode<synchronous>, transform_indices = @transform_3, window_bounds = array<i64: 128, 512>}, {pipeline_mode = #tpu.pipeline_mode<synchronous>, transform_indices = @transform_4, window_bounds = array<i64: 128, 384>}, {pipeline_mode = #tpu.pipeline_mode<synchronous>, transform_indices = @transform_5, window_bounds = array<i64: 128, 128>}, {pipeline_mode = #tpu.pipeline_mode<synchronous>, transform_indices = @transform_6, window_bounds = array<i64: 1, 512>}, {transform_indices = @transform_7, window_bounds = array<i64: 256, 256>}]} {
    %c0 = arith.constant 0 : index
    %c0_0 = arith.constant 0 : index
    %0 = vector.load %arg1[%c0, %c0_0] : memref<256x128xbf16, #tpu.memory_space<vmem>>, vector<256x128xbf16>
    %c0_1 = arith.constant 0 : index
    %c0_2 = arith.constant 0 : index
    %c0_3 = arith.constant 0 : index
    %1 = vector.load %arg2[%c0_1, %c0_2, %c0_3] : memref<4x256x128xbf16, #tpu.memory_space<vmem>>, vector<1x256x128xbf16>
    %2 = vector.shape_cast %1 : vector<1x256x128xbf16> to vector<256x128xbf16>
    %c1 = arith.constant 1 : index
    %c0_4 = arith.constant 0 : index
    %c0_5 = arith.constant 0 : index
    %3 = vector.load %arg2[%c1, %c0_4, %c0_5] : memref<4x256x128xbf16, #tpu.memory_space<vmem>>, vector<1x256x128xbf16>
    %4 = vector.shape_cast %3 : vector<1x256x128xbf16> to vector<256x128xbf16>
    %5 = arith.addf %2, %4 : vector<256x128xbf16>
    %c2 = arith.constant 2 : index
    %c0_6 = arith.constant 0 : index
    %c0_7 = arith.constant 0 : index
    %6 = vector.load %arg2[%c2, %c0_6, %c0_7] : memref<4x256x128xbf16, #tpu.memory_space<vmem>>, vector<1x256x128xbf16>
    %7 = vector.shape_cast %6 : vector<1x256x128xbf16> to vector<256x128xbf16>
    %8 = arith.addf %5, %7 : vector<256x128xbf16>
    %c3 = arith.constant 3 : index
    %c0_8 = arith.constant 0 : index
    %c0_9 = arith.constant 0 : index
    %9 = vector.load %arg2[%c3, %c0_8, %c0_9] : memref<4x256x128xbf16, #tpu.memory_space<vmem>>, vector<1x256x128xbf16>
    %10 = vector.shape_cast %9 : vector<1x256x128xbf16> to vector<256x128xbf16>
    %11 = arith.addf %8, %10 : vector<256x128xbf16>
    %c0_10 = arith.constant 0 : index
    %c0_11 = arith.constant 0 : index
    %12 = vector.load %arg4[%c0_10, %c0_11] : memref<128x512xbf16, #tpu.memory_space<vmem>>, vector<128x512xbf16>
    %cst = arith.constant dense<0.000000e+00> : vector<256x512xf32>
    %13 = tpu.matmul %0, %12, %cst {dimension_numbers = #tpu.dot_dimension_numbers<[1], [0], [0], [1], [0, 0, 1, 1], [], []>} : vector<256x128xbf16>, vector<128x512xbf16>, vector<256x512xf32> -> vector<256x512xf32>
    %c0_12 = arith.constant 0 : index
    %c0_13 = arith.constant 0 : index
    %14 = vector.load %arg7[%c0_12, %c0_13] : memref<1x512xf32, #tpu.memory_space<vmem>>, vector<1x512xf32>
    %15 = vector.broadcast %14 : vector<1x512xf32> to vector<256x512xf32>
    %16 = arith.addf %13, %15 : vector<256x512xf32>
    %17 = vector.extract_strided_slice %16 {offsets = [0, 0], sizes = [256, 384], strides = [1, 1]} : vector<256x512xf32> to vector<256x384xf32>
    %c0_14 = arith.constant 0 : index
    %c0_15 = arith.constant 0 : index
    %18 = vector.load %arg5[%c0_14, %c0_15] : memref<128x384xbf16, #tpu.memory_space<vmem>>, vector<128x384xbf16>
    %cst_16 = arith.constant dense<0.000000e+00> : vector<256x384xf32>
    %19 = tpu.matmul %11, %18, %cst_16 {dimension_numbers = #tpu.dot_dimension_numbers<[1], [0], [0], [1], [0, 0, 1, 1], [], []>} : vector<256x128xbf16>, vector<128x384xbf16>, vector<256x384xf32> -> vector<256x384xf32>
    %20 = arith.addf %17, %19 : vector<256x384xf32>
    %21 = vector.extract_strided_slice %20 {offsets = [0, 0], sizes = [256, 128], strides = [1, 1]} : vector<256x384xf32> to vector<256x128xf32>
    %22 = arith.negf %21 : vector<256x128xf32>
    %23 = math.exp %22 : vector<256x128xf32>
    %cst_17 = arith.constant 1.000000e+00 : f32
    %24 = vector.broadcast %cst_17 : f32 to vector<256x128xf32>
    %25 = arith.addf %24, %23 : vector<256x128xf32>
    %26 = arith.divf %24, %25 : vector<256x128xf32>
    %27 = vector.extract_strided_slice %20 {offsets = [0, 128], sizes = [256, 128], strides = [1, 1]} : vector<256x384xf32> to vector<256x128xf32>
    %28 = arith.negf %27 : vector<256x128xf32>
    %29 = math.exp %28 : vector<256x128xf32>
    %cst_18 = arith.constant 1.000000e+00 : f32
    %30 = vector.broadcast %cst_18 : f32 to vector<256x128xf32>
    %31 = arith.addf %30, %29 : vector<256x128xf32>
    %32 = arith.divf %30, %31 : vector<256x128xf32>
    %33 = vector.extract_strided_slice %20 {offsets = [0, 256], sizes = [256, 128], strides = [1, 1]} : vector<256x384xf32> to vector<256x128xf32>
    %34 = math.tanh %33 : vector<256x128xf32>
    %35 = vector.extract_strided_slice %16 {offsets = [0, 384], sizes = [256, 128], strides = [1, 1]} : vector<256x512xf32> to vector<256x128xf32>
    %c0_19 = arith.constant 0 : index
    %c0_20 = arith.constant 0 : index
    %c0_21 = arith.constant 0 : index
    %36 = vector.load %arg2[%c0_19, %c0_20, %c0_21] : memref<4x256x128xbf16, #tpu.memory_space<vmem>>, vector<4x256x128xbf16>
    %37 = vector.shape_cast %36 : vector<4x256x128xbf16> to vector<1024x128xbf16>
    %c0_22 = arith.constant 0 : index
    %c0_23 = arith.constant 0 : index
    %38 = vector.load %arg6[%c0_22, %c0_23] : memref<128x128xbf16, #tpu.memory_space<vmem>>, vector<128x128xbf16>
    %cst_24 = arith.constant dense<0.000000e+00> : vector<1024x128xf32>
    %39 = tpu.matmul %37, %38, %cst_24 {dimension_numbers = #tpu.dot_dimension_numbers<[1], [0], [0], [1], [0, 0, 1, 1], [], []>} : vector<1024x128xbf16>, vector<128x128xbf16>, vector<1024x128xf32> -> vector<1024x128xf32>
    %cst_25 = arith.constant 0.000000e+00 : f32
    %40 = vector.broadcast %cst_25 : f32 to vector<256x128xf32>
    %41 = vector.extract_strided_slice %39 {offsets = [0, 0], sizes = [256, 128], strides = [1, 1]} : vector<1024x128xf32> to vector<256x128xf32>
    %42 = arith.addf %41, %35 : vector<256x128xf32>
    %43 = arith.negf %42 : vector<256x128xf32>
    %44 = math.exp %43 : vector<256x128xf32>
    %cst_26 = arith.constant 1.000000e+00 : f32
    %45 = vector.broadcast %cst_26 : f32 to vector<256x128xf32>
    %46 = arith.addf %45, %44 : vector<256x128xf32>
    %47 = arith.divf %45, %46 : vector<256x128xf32>
    %c0_27 = arith.constant 0 : index
    %c0_28 = arith.constant 0 : index
    %c0_29 = arith.constant 0 : index
    %48 = vector.load %arg3[%c0_27, %c0_28, %c0_29] : memref<4x256x128xbf16, #tpu.memory_space<vmem>>, vector<1x256x128xbf16>
    %49 = vector.shape_cast %48 : vector<1x256x128xbf16> to vector<256x128xbf16>
    %50 = arith.extf %49 : vector<256x128xbf16> to vector<256x128xf32>
    %51 = arith.mulf %47, %50 : vector<256x128xf32>
    %52 = arith.addf %40, %51 : vector<256x128xf32>
    %53 = vector.extract_strided_slice %39 {offsets = [256, 0], sizes = [256, 128], strides = [1, 1]} : vector<1024x128xf32> to vector<256x128xf32>
    %54 = arith.addf %53, %35 : vector<256x128xf32>
    %55 = arith.negf %54 : vector<256x128xf32>
    %56 = math.exp %55 : vector<256x128xf32>
    %cst_30 = arith.constant 1.000000e+00 : f32
    %57 = vector.broadcast %cst_30 : f32 to vector<256x128xf32>
    %58 = arith.addf %57, %56 : vector<256x128xf32>
    %59 = arith.divf %57, %58 : vector<256x128xf32>
    %c1_31 = arith.constant 1 : index
    %c0_32 = arith.constant 0 : index
    %c0_33 = arith.constant 0 : index
    %60 = vector.load %arg3[%c1_31, %c0_32, %c0_33] : memref<4x256x128xbf16, #tpu.memory_space<vmem>>, vector<1x256x128xbf16>
    %61 = vector.shape_cast %60 : vector<1x256x128xbf16> to vector<256x128xbf16>
    %62 = arith.extf %61 : vector<256x128xbf16> to vector<256x128xf32>
    %63 = arith.mulf %59, %62 : vector<256x128xf32>
    %64 = arith.addf %52, %63 : vector<256x128xf32>
    %65 = vector.extract_strided_slice %39 {offsets = [512, 0], sizes = [256, 128], strides = [1, 1]} : vector<1024x128xf32> to vector<256x128xf32>
    %66 = arith.addf %65, %35 : vector<256x128xf32>
    %67 = arith.negf %66 : vector<256x128xf32>
    %68 = math.exp %67 : vector<256x128xf32>
    %cst_34 = arith.constant 1.000000e+00 : f32
    %69 = vector.broadcast %cst_34 : f32 to vector<256x128xf32>
    %70 = arith.addf %69, %68 : vector<256x128xf32>
    %71 = arith.divf %69, %70 : vector<256x128xf32>
    %c2_35 = arith.constant 2 : index
    %c0_36 = arith.constant 0 : index
    %c0_37 = arith.constant 0 : index
    %72 = vector.load %arg3[%c2_35, %c0_36, %c0_37] : memref<4x256x128xbf16, #tpu.memory_space<vmem>>, vector<1x256x128xbf16>
    %73 = vector.shape_cast %72 : vector<1x256x128xbf16> to vector<256x128xbf16>
    %74 = arith.extf %73 : vector<256x128xbf16> to vector<256x128xf32>
    %75 = arith.mulf %71, %74 : vector<256x128xf32>
    %76 = arith.addf %64, %75 : vector<256x128xf32>
    %77 = vector.extract_strided_slice %39 {offsets = [768, 0], sizes = [256, 128], strides = [1, 1]} : vector<1024x128xf32> to vector<256x128xf32>
    %78 = arith.addf %77, %35 : vector<256x128xf32>
    %79 = arith.negf %78 : vector<256x128xf32>
    %80 = math.exp %79 : vector<256x128xf32>
    %cst_38 = arith.constant 1.000000e+00 : f32
    %81 = vector.broadcast %cst_38 : f32 to vector<256x128xf32>
    %82 = arith.addf %81, %80 : vector<256x128xf32>
    %83 = arith.divf %81, %82 : vector<256x128xf32>
    %c3_39 = arith.constant 3 : index
    %c0_40 = arith.constant 0 : index
    %c0_41 = arith.constant 0 : index
    %84 = vector.load %arg3[%c3_39, %c0_40, %c0_41] : memref<4x256x128xbf16, #tpu.memory_space<vmem>>, vector<1x256x128xbf16>
    %85 = vector.shape_cast %84 : vector<1x256x128xbf16> to vector<256x128xbf16>
    %86 = arith.extf %85 : vector<256x128xbf16> to vector<256x128xf32>
    %87 = arith.mulf %83, %86 : vector<256x128xf32>
    %88 = arith.addf %76, %87 : vector<256x128xf32>
    %89 = arith.mulf %26, %34 : vector<256x128xf32>
    %90 = arith.addf %89, %88 : vector<256x128xf32>
    %91 = math.tanh %90 : vector<256x128xf32>
    %92 = arith.mulf %32, %91 : vector<256x128xf32>
    %c0_42 = arith.constant 0 : index
    %c0_43 = arith.constant 0 : index
    %93 = vector.load %arg8[%c0_42, %c0_43] : memref<256x256xf32, #tpu.memory_space<vmem>>, vector<256x128xf32>
    tpu.vector_store %arg8[%c0_42, %c0_43], %92 {strides = array<i32>} : memref<256x256xf32, #tpu.memory_space<vmem>>, vector<256x128xf32>,
    %c0_44 = arith.constant 0 : index
    %c128 = arith.constant 128 : index
    %94 = vector.load %arg8[%c0_44, %c128] : memref<256x256xf32, #tpu.memory_space<vmem>>, vector<256x128xf32>
    tpu.vector_store %arg8[%c0_44, %c128], %90 {strides = array<i32>} : memref<256x256xf32, #tpu.memory_space<vmem>>, vector<256x128xf32>,
    return
  }
  func.func @transform_0(%arg0: i32) -> (i32, i32) {
    %c0_i32 = arith.constant 0 : i32
    %c0_i32_0 = arith.constant 0 : i32
    return %arg0, %c0_i32 : i32, i32
  }
  func.func @transform_1(%arg0: i32) -> (i32, i32, i32) {
    %c0_i32 = arith.constant 0 : i32
    %c0_i32_0 = arith.constant 0 : i32
    %c0_i32_1 = arith.constant 0 : i32
    return %c0_i32, %arg0, %c0_i32_0 : i32, i32, i32
  }
  func.func @transform_2(%arg0: i32) -> (i32, i32, i32) {
    %c0_i32 = arith.constant 0 : i32
    %c0_i32_0 = arith.constant 0 : i32
    %c0_i32_1 = arith.constant 0 : i32
    return %c0_i32, %arg0, %c0_i32_0 : i32, i32, i32
  }
  func.func @transform_3(%arg0: i32) -> (i32, i32) {
    %c0_i32 = arith.constant 0 : i32
    %c0_i32_0 = arith.constant 0 : i32
    %c0_i32_1 = arith.constant 0 : i32
    return %c0_i32, %c0_i32_0 : i32, i32
  }
  func.func @transform_4(%arg0: i32) -> (i32, i32) {
    %c0_i32 = arith.constant 0 : i32
    %c0_i32_0 = arith.constant 0 : i32
    %c0_i32_1 = arith.constant 0 : i32
    return %c0_i32, %c0_i32_0 : i32, i32
  }
  func.func @transform_5(%arg0: i32) -> (i32, i32) {
    %c0_i32 = arith.constant 0 : i32
    %c0_i32_0 = arith.constant 0 : i32
    %c0_i32_1 = arith.constant 0 : i32
    return %c0_i32, %c0_i32_0 : i32, i32
  }
  func.func @transform_6(%arg0: i32) -> (i32, i32) {
    %c0_i32 = arith.constant 0 : i32
    %c0_i32_0 = arith.constant 0 : i32
    %c0_i32_1 = arith.constant 0 : i32
    return %c0_i32, %c0_i32_0 : i32, i32
  }
  func.func @transform_7(%arg0: i32) -> (i32, i32) {
    %c0_i32 = arith.constant 0 : i32
    %c0_i32_0 = arith.constant 0 : i32
    return %arg0, %c0_i32 : i32, i32
  }
}

</mosaic_0001>

<bundles_post_ra>
// kernel: tree_lstm_cell.1
= control target key start
LH: loop header
LB: loop body
LE: loop exit
PB: predicated region body
PF: predicated region fallthrough
CT: control target
= control target key end

     0   :  { %s11129_s0 = inlined_call_operand.hbm [shape: bf16[512,128], index: 0, kind: input, shape index: {}]   ;;  %s11130_s1 = inlined_call_operand.hbm [shape: bf16[4,512,128], index: 1, kind: input, shape index: {}]   ;;  %s11131_s2 = inlined_call_operand.hbm [shape: bf16[4,512,128], index: 2, kind: input, shape index: {}]   ;;  %s11132_s3 = inlined_call_operand.hbm [shape: bf16[128,512], index: 3, kind: input, shape index: {}]   ;;  %s11133_s4 = inlined_call_operand.hbm [shape: bf16[128,384], index: 4, kind: input, shape index: {}]   ;;  %s11134_s5 = inlined_call_operand.hbm [shape: bf16[128,128], index: 5, kind: input, shape index: {}]   ;;  %s11135_s6 = inlined_call_operand.vmem [shape: f32[1,512], index: 6, kind: input, shape index: {}]   ;;  %s11136_s7 = inlined_call_operand.vmem [shape: f32[512,256], index: 7, kind: output, shape index: {}]  }
   0x1   :  { %11200 = sst [smem:[#allocation156_spill]] %s11132_s3 }
   0x2   :  { %12 = vsyncpa [#allocation3], 0 }
   0x3   :  { %14 = vsyncpa [#allocation3 + $0x1], 0 }
   0x4   :  { %15 = vsyncpa [#allocation5], 0 }
   0x5   :  { %17 = vsyncpa [#allocation5 + $0x1], 0 }
   0x6   :  { %18 = vsyncpa [#allocation8], 0 }
   0x7   :  { %19 = vsyncpa [#allocation11], 0  ;;  %s8148_s24 = smov 0   ;;  %s8150_s25 = smov 0  }
   0x8   :  { %s8152_s26 = smov 0   ;;  %s8154_s27 = smov 0  }
   0x9 LB: > { %s8167_s28 = sadd.s32 4294967295, %s8081_s27   ;;  %s8170_s29 = sadd.s32 1, %s8081_s27   ;;  %s8081_s27 = sphi %s8154_s27, %s11775_s27   ;;  %s8077_s26 = sphi %s8152_s26, %s11774_s26   ;;  %s8073_s25 = sphi %s8150_s25, %s11773_s25   ;;  %s8069_s24 = sphi %s8148_s24, %s11772_s24  }
   0xa   : > { %s29_s30 = ssub.s32 %s8081_s27, %s8170_s29  ;;  %s32_s8 = sadd.s32 1, %s8077_s26 }
   0xb   : > { %p30_p0 = scmp.eq.s32.totalorder %s29_s30, 0  ;;  %p39_p1 = scmp.ne.s32.totalorder %s8077_s26, %s8073_s25 }
   0xc   : > { %p40_p2 = scmp.eq.s32.totalorder %s8081_s27, 0  ;;  %p45_p3 = scmp.ne.s32.totalorder %s8073_s25, %s8069_s24 }
   0xd   : > { %s8180_s9 = scalar_select %p30_p0, %s8077_s26, %s32_s8  }
   0xe   : > { %p8182_p4 = por %p40_p2, %p39_p1  ;;  %p11137_p5 = scmp.eq.s32.totalorder %s8167_s28, 0 }
   0xf   : > { %11201 = sst [smem:[#allocation22_spill]] %s8180_s9  ;;  %p5421_p6 = scmp.ge.s32.totalorder %s8081_s27, 1 }
  0x10   : > { %s11202_s10 = scalar_select %p8182_p4, 1, 0 }
  0x11   : > { %p218_p7 = scmp.lt.s32.totalorder %s8081_s27, 3  ;;  %p8191_p8 = por %p11137_p5, %p45_p3 }
  0x12   : > { %s8083_s13 = smov [#allocation7]   ;;  %s8084_s16 = smov [#allocation9]  }
  0x13   : > { %s11203_s11 = scalar_select %p8191_p8, 1, 0 }
  0x14   : > { %p8195_p9 = pnand %p5421_p6, %p218_p7  ;;  %s230_s14 = sshll.u32 %s8083_s13, 4  ;;  %s231_s14 = int_to_ptr.vmem [resolvable:$true] %s230_s14 }
  0x15   : > { %s243_s17 = sshll.u32 %s8084_s16, 4  ;;  %s11206_s3 = sld [smem:[#allocation156_spill]]  ;;  %s8207_s17 = int_to_ptr.vmem [resolvable:$true] %s243_s17 }
  0x16   : > { %s11204_s12 = scalar_select %p8195_p9, 1, 0 }
  0x17   : > { %p6782_p10 = pneg %p8195_p9 }
  0x19   : > { %p8203_p11 = pnand %p6782_p10, %p11137_p5 }
  0x1b   : > { %s7923_s20 = scalar_lea.hbm %s11206_s3, 4096  ;;  %p8217_p13 = pneg %p8203_p11 }
  0x1c   : > { %p7924_p12 = scmp.ne.s32.totalorder %s11206_s3, %s7923_s20  ;;  %p7930_p2 = scmp.lt.u32.totalorder %s7923_s20, %s11206_s3 }
  0x1e   : > { %p7926_p0 = pnand %p8217_p13, %p7924_p12 }
  0x20   : > { %p7927_p1 = pneg %p7926_p0 }
  0x22   : > { %p7932_p3 = pnand %p7930_p2, %p7927_p1 }
  0x24   : > { %7935 = shalt.err (!%p7932_p3)
}
  0x25   : > { %s7936_s8 = scalar_lea.vmem %s231_s14, 4096  ;;  %p7944_p5 = scmp.lt.s32.totalorder %s231_s14, %s231_s14 }
  0x26   : > { %p7937_p6 = scmp.ne.s32.totalorder %s231_s14, %s7936_s8  ;;  %p7945_p8 = scmp.lt.s32.totalorder %s7936_s8, %s7936_s8 }
  0x28   : > { %p7939_p7 = pnand %p7937_p6, %p8217_p13  ;;  %p7946_p9 = por %p7945_p8, %p7944_p5 }
  0x2a   : > { %p7940_p10 = pneg %p7939_p7 }
  0x2c   : > { %p7947_p4 = pnand %p7946_p9, %p7940_p10 }
  0x2e   : > { %7950 = shalt.err (!%p7947_p4)
}
  0x2f   : > { %s8085_s13 = smov 256   ;;  %s8086_s16 = smov 16  }
  0x30   : > { %6785 = dma.hbm_to_vmem [thread:$0]  (!%p8203_p11), %s11206_s3, 4096, %s231_s14, [#allocation8], %s8085_s13, %s8085_s13, %s8086_s16  }
  0x31   : > { %s7951_s22 = scalar_lea.hbm %s11133_s4, 3072 }
  0x32   : > { %p7952_p12 = scmp.ne.s32.totalorder %s11133_s4, %s7951_s22  ;;  %p7958_p8 = scmp.lt.u32.totalorder %s7951_s22, %s11133_s4 }
  0x34   : > { %p7954_p5 = pnand %p7952_p12, %p8217_p13 }
  0x36   : > { %p7955_p4 = pneg %p7954_p5 }
  0x38   : > { %p7960_p9 = pnand %p7958_p8, %p7955_p4 }
  0x3a   : > { %7963 = shalt.err (!%p7960_p9)
}
  0x3b   : > { %s7964_s14 = scalar_lea.vmem %s8207_s17, 3072  ;;  %p7972_p3 = scmp.lt.s32.totalorder %s8207_s17, %s8207_s17 }
  0x3c   : > { %p7965_p0 = scmp.ne.s32.totalorder %s8207_s17, %s7964_s14  ;;  %p7973_p6 = scmp.lt.s32.totalorder %s7964_s14, %s7964_s14 }
  0x3e   : > { %p7967_p1 = pnand %p7965_p0, %p8217_p13  ;;  %p7974_p7 = por %p7973_p6, %p7972_p3 }
  0x40   : > { %p7968_p2 = pneg %p7967_p1 }
  0x42   : > { %p7975_p10 = pnand %p7974_p7, %p7968_p2 }
  0x44   : > { %7978 = shalt.err (!%p7975_p10)
}
  0x45   : > { %s8087_s13 = smov 192   ;;  %s8088_s9 = smov 12  }
  0x46   : > { %6788 = dma.hbm_to_vmem [thread:$0]  (!%p8203_p11), %s11133_s4, 3072, %s8207_s17, [#allocation8], %s8087_s13, %s8087_s13, %s8088_s9  }
  0x47   : > { %s8089_s19 = smov [#allocation10]   ;;  %s7979_s24 = scalar_lea.hbm %s11134_s5, 1024 }
  0x48   : > { %s256_s20 = sshll.u32 %s8089_s19, 4  ;;  %p7980_p12 = scmp.ne.s32.totalorder %s11134_s5, %s7979_s24  ;;  %s257_s20 = int_to_ptr.vmem [resolvable:$true] %s256_s20 }
  0x49   : > { %p7986_p8 = scmp.lt.u32.totalorder %s7979_s24, %s11134_s5 }
  0x4a   : > { %p7982_p5 = pnand %p7980_p12, %p8217_p13 }
  0x4c   : > { %p7983_p4 = pneg %p7982_p5 }
  0x4e   : > { %p7988_p9 = pnand %p7986_p8, %p7983_p4 }
  0x50   : > { %7991 = shalt.err (!%p7988_p9)
}
  0x51   : > { %s7992_s17 = scalar_lea.vmem %s257_s20, 1024  ;;  %p8000_p3 = scmp.lt.s32.totalorder %s257_s20, %s257_s20 }
  0x52   : > { %p7993_p0 = scmp.ne.s32.totalorder %s257_s20, %s7992_s17  ;;  %p8001_p6 = scmp.lt.s32.totalorder %s7992_s17, %s7992_s17 }
  0x54   : > { %p7995_p1 = pnand %p7993_p0, %p8217_p13  ;;  %p8002_p7 = por %p8001_p6, %p8000_p3 }
  0x56   : > { %p7996_p2 = pneg %p7995_p1 }
  0x58   : > { %p8003_p10 = pnand %p8002_p7, %p7996_p2 }
  0x5a   : > { %8006 = shalt.err (!%p8003_p10)
}
  0x5b   : > { %s8090_s13 = smov 64   ;;  %s8091_s9 = smov 4  }
  0x5c   : > { %6791 = dma.hbm_to_vmem [thread:$0]  (!%p8203_p11), %s11134_s5, 1024, %s257_s20, [#allocation11], %s8090_s13, %s8090_s13, %s8091_s9  }
  0x5d   : > { %p5425_p12 = scmp.ge.s32.totalorder %s8081_s27, 2 }
  0x5e   : > { %s8276_s23 = sand.u32 (!%p5425_p12), 1, %s8077_s26   ;;  %s8279_s18 = sshll.u32 (!%p5425_p12), %s8081_s27, 11 }
  0x5f   : > { %269 = sbr.rel (%p5425_p12) target bundleno = 146 (0x92), region = 32  ;;  %s5426_s19 = sshll.u32 (!%p5425_p12), %s8276_s23, 7 }
  0x60   : > { %s8286_s22 = scalar_lea.hbm (!%p5425_p12), %s11129_s0, %s8279_s18  ;;  %s277_s20 = scalar_lea.vmem (!%p5425_p12), [#allocation2], %s5426_s19 }
  0x61   : > { %s284_s24 = sshll.u32 (!%p5425_p12), %s277_s20, 4  ;;  %s274_s30 = scalar_lea.sflag (!%p5425_p12), [#allocation3], %s8276_s23  ;;  %s8288_s24 = int_to_ptr.vmem [resolvable:$true] %s284_s24 }
  0x62   : > { %s8007_s8 = scalar_lea.hbm (!%p5425_p12), %s8286_s22, 2048  ;;  %p11208_p13 = scmp.ne.s32.totalorder (!%p5425_p12), %s11202_s10, 0 }
  0x63   : > { %p8008_p11 = scmp.ne.s32.totalorder (!%p5425_p12), %s8286_s22, %s8007_s8  ;;  %s8011_s13 = scalar_lea.hbm (!%p5425_p12), %s11129_s0, 4096 }
  0x64   : > { %p8012_p8 = scmp.lt.u32.totalorder (!%p5425_p12), %s8286_s22, %s11129_s0  ;;  %p8013_p9 = scmp.lt.u32.totalorder (!%p5425_p12), %s8011_s13, %s8007_s8 }
  0x65   : > { %p8009_p5 = pnand (!%p5425_p12), %p8008_p11, %p11208_p13  ;;  %p8015_p1 = scmp.lt.u32.totalorder (!%p5425_p12), %s8007_s8, %s8286_s22 }
  0x66   : > { %p8014_p0 = por %p8013_p9, %p8012_p8 }
  0x67   : > { %p8010_p4 = pneg %p8009_p5 }
  0x68   : > { %p8016_p2 = por %p8015_p1, %p8014_p0 }
  0x6a   : > { %p8017_p3 = pnand %p8016_p2, %p8010_p4 }
  0x6c   : > { %8020 = shalt.err (!%p8017_p3)
}
  0x6d   : > { %s8021_s3 = scalar_lea.vmem %s8288_s24, 2048  ;;  %s8092_s19 = smov [#allocation2]  }
  0x6e   : > { %p8022_p6 = scmp.ne.s32.totalorder %s8288_s24, %s8021_s3  ;;  %s8025_s21 = sshll.u32 %s8092_s19, 4  ;;  %s8026_s21 = int_to_ptr.vmem [resolvable:$false] %s8025_s21 }
  0x6f   : > { %s8027_s15 = scalar_lea.vmem %s8026_s21, 4096  ;;  %p8028_p12 = scmp.lt.s32.totalorder %s8288_s24, %s8026_s21 }
  0x70   : > { %p8023_p7 = pnand %p8022_p6, %p11208_p13  ;;  %p8029_p11 = scmp.lt.s32.totalorder %s8027_s15, %s8021_s3 }
  0x72   : > { %p8024_p10 = pneg %p8023_p7  ;;  %p8030_p5 = por %p8029_p11, %p8028_p12 }
  0x74   : > { %p8031_p8 = pnand %p8030_p5, %p8024_p10 }
  0x76   : > { %8034 = shalt.err (!%p8031_p8)
}
  0x77   : > { %s8093_s20 = smov 64   ;;  %s8094_s8 = smov 4  }
  0x78   : > { %6756 = dma.hbm_to_vmem [thread:$0]  (%p11208_p13), %s8286_s22, 2048, %s8288_s24, %s274_s30, %s8093_s20, %s8093_s20, %s8094_s8  }
  0x79   : > { %s294_s14 = sand.u32 1, %s8081_s27   ;;  %s5429_s17 = sshll.u32 %s8276_s23, 9 }
  0x7a   : > { %s304_s16 = scalar_lea.hbm %s11130_s1, %s8279_s18  ;;  %s298_s19 = scalar_lea.vmem [#allocation4], %s5429_s17 }
  0x7b   : > { %s6757_s3 = scalar_select %p11208_p13, [#allocation0], [#allocation16] }
  0x7c   : > { %s317_s22 = sshll.u32 %s298_s19, 4  ;;  %s8095_s30 = smov 4096   ;;  %s318_s22 = int_to_ptr.vmem [resolvable:$true] %s317_s22 }
  0x7d   : > { %s309_s24 = sld [smem:[%s6757_s3]]   ;;  %s8096_s21 = smov 2048  }
  0x7e   : > { %6758 = sst [smem:[#allocation13]] (%p11208_p13), %s8095_s30  ;;  %s8097_s27 = smov 32  }
  0x7f   : > { %6759 = sst [smem:[#allocation13 + $0x1]] (%p11208_p13), %s8096_s21  ;;  %s8098_s23 = smov 64  }
  0x80   : > { %6760 = sst [smem:[#allocation13 + $0x2]] (%p11208_p13), %s8097_s27  ;;  %s8099_s20 = smov 4  }
  0x81   : > { %6761 = sst [smem:[#allocation13 + $0x3]] (%p11208_p13), %s8098_s23  ;;  %s295_s13 = scalar_lea.sflag [#allocation5], %s294_s14 }
  0x82   : > { %6762 = sst [smem:[#allocation13 + $0x4]] (%p11208_p13), %s8098_s23  ;;  %s8100_s9 = smov [#allocation12]  }
  0x83   : > { %s5432_s15 = sshll.u32 %s309_s24, 26  ;;  %6763 = sst [smem:[#allocation13 + $0x5]] (%p11208_p13), %s8099_s20 }
  0x84   : > { %s5433_s8 = sadd.s32 134217728, %s5432_s15 }
  0x85   : > { %6764 = dma.general (%p11208_p13), %s304_s16, 8192, %s318_s22, %s295_s13, %s8100_s9, [#allocation13], %s5433_s8, 0  }
  0x86   : > { %s350_s30 = scalar_lea.hbm %s11131_s2, %s8279_s18  ;;  %s344_s21 = scalar_lea.vmem [#allocation6], %s5429_s17 }
  0x87   : > { %s6765_s24 = scalar_select %p11208_p13, [#allocation0], [#allocation17] }
  0x88   : > { %s363_s27 = sshll.u32 %s344_s21, 4  ;;  %s8101_s16 = smov 4096   ;;  %s364_s27 = int_to_ptr.vmem [resolvable:$true] %s363_s27 }
  0x89   : > { %s355_s14 = sld [smem:[%s6765_s24]]   ;;  %s8102_s22 = smov 2048  }
  0x8a   : > { %6766 = sst [smem:[#allocation15]] (%p11208_p13), %s8101_s16  ;;  %s8103_s23 = smov 32  }
  0x8b   : > { %6767 = sst [smem:[#allocation15 + $0x1]] (%p11208_p13), %s8102_s22  ;;  %s8104_s15 = smov 64  }
  0x8c   : > { %6768 = sst [smem:[#allocation15 + $0x2]] (%p11208_p13), %s8103_s23  ;;  %s8105_s17 = smov 4  }
  0x8d   : > { %6769 = sst [smem:[#allocation15 + $0x3]] (%p11208_p13), %s8104_s15  ;;  %s8106_s8 = smov [#allocation14]  }
  0x8e   : > { %6770 = sst [smem:[#allocation15 + $0x4]] (%p11208_p13), %s8104_s15 }
  0x8f   : > { %s5437_s18 = sshll.u32 %s355_s14, 26  ;;  %6771 = sst [smem:[#allocation15 + $0x5]] (%p11208_p13), %s8105_s17 }
  0x90   : > { %s5438_s20 = sadd.s32 134217728, %s5437_s18 }
  0x91   : > { %6772 = dma.general (%p11208_p13), %s350_s30, 8192, %s364_s27, %s295_s13, %s8106_s8, [#allocation15], %s5438_s20, 0  }
  0x92 PF: > { %p11209_p4 = scmp.ne.s32.totalorder %s11204_s12, 0 }
  0x94   : > { %388 = sbr.rel (%p11209_p4) target bundleno = 1034 (0x40a), region = 48 }
  0x9b   : > { %s390_s9 = sand.u32 1, %s8073_s25   ;;  %p11210_p9 = scmp.ne.s32.totalorder %s11203_s11, 0 }
  0x9c   : > { %s5440_s3 = sshll.u32 %s390_s9, 7  ;;  %s391_s19 = scalar_lea.sflag [#allocation3], %s390_s9 }
  0x9d   : > { %s8359_s24 = scalar_lea.vmem [#allocation2], %s5440_s3 }
  0x9e   : > { %8052 = dma.done.wait (%p11210_p9), %s391_s19, 2048  }
  0x9f   : > { %8054 = vsyncadd (%p11210_p9), %s391_s19, 4294965248  ;;  %s399_s10 = sand.u32 1, %s8167_s28   ;;  %s5441_s13 = sshll.u32 %s390_s9, 9 }
  0xa0   : > { %s400_s30 = scalar_lea.sflag [#allocation5], %s399_s10  ;;  %s8366_s21 = scalar_lea.vmem [#allocation4], %s5441_s13 }
  0xa1   : > { %8056 = dma.done.wait (%p11210_p9), %s400_s30, 16384  }
  0xa2   : > { %8058 = vsyncadd (%p11210_p9), %s400_s30, 4294950912  ;;  %s8372_s12 = scalar_lea.vmem [#allocation6], %s5441_s13  ;;  %p11211_p13 = scmp.eq.s32.totalorder %s8167_s28, 0 }
  0xa4   : > { %8060 = dma.done.wait (%p11211_p13), [#allocation8], 7168   ;;  %p11212_p0 = pmov %p11211_p13 }
  0xa6   : > { %8062 = vsyncadd (%p11212_p0), [#allocation8], 4294960128  ;;  %p11213_p1 = pmov %p11212_p0 }
  0xa7   : > { %p11214_p2 = pmov %p11212_p0 }
  0xa8   : > { %8064 = dma.done.wait (%p11213_p1), [#allocation11], 1024  }
  0xa9   : > { %8066 = vsyncadd (%p11214_p2), [#allocation11], 4294966272  ;;  %v8107_v0 = vmov 0   ;;  %v6854_v1 = vld [vmem:[#allocation7 + $0x4] ss:$16 sps:$4 sm:$0xff]   ;;  %v6906_v38 = vld [vmem:[%s8359_s24 + $0x8] sm:$0xff]  }
  0xaa   : > { %1078 = vmatprep.mubr.bf16.mxu0 %v8107_v0  ;;  %1391 = vmatprep.mubr.bf16.mxu1 %v8107_v0  ;;  %v8384_v2 = vld [vmem:[#allocation7 + $0xc] ss:$16 sps:$4 sm:$0xff]   ;;  %v6858_v3 = vld [vmem:[#allocation7] ss:$16 sps:$4 sm:$0xff]   ;;  %v8386_v4 = vld [vmem:[#allocation7 + $0x8] ss:$16 sps:$4 sm:$0xff]  }
  0xab   : > { %1046 = vmatprep.subr.bf16.mxu0 %v6854_v1  ;;  %6606 = vmatprep.subr.bf16.mxu1 %v8384_v2  ;;  %v6860_v5 = vld [vmem:[#allocation7 + $0x24] ss:$16 sps:$4 sm:$0xff]   ;;  %v8390_v6 = vld [vmem:[#allocation7 + $0x2c] ss:$16 sps:$4 sm:$0xff]   ;;  %v6864_v7 = vld [vmem:[#allocation7 + $0x20] ss:$16 sps:$4 sm:$0xff]  }
  0xac   : > { %1047 = vmatpush1.bf16.msra.mxu0 %v6858_v3  ;;  %6614 = vmatpush1.bf16.msra.mxu1 %v8386_v4  ;;  %v8392_v8 = vld [vmem:[#allocation7 + $0x28] ss:$16 sps:$4 sm:$0xff]   ;;  %v6866_v9 = vld [vmem:[#allocation7 + $0x44] ss:$16 sps:$4 sm:$0xff]   ;;  %v8395_v10 = vld [vmem:[#allocation7 + $0x4c] ss:$16 sps:$4 sm:$0xff]  }
  0xad   : > { %1048 = vmatprep.subr.bf16.mxu0 %v6860_v5  ;;  %6607 = vmatprep.subr.bf16.mxu1 %v8390_v6  ;;  %v6870_v11 = vld [vmem:[#allocation7 + $0x40] ss:$16 sps:$4 sm:$0xff]   ;;  %v8397_v12 = vld [vmem:[#allocation7 + $0x48] ss:$16 sps:$4 sm:$0xff]   ;;  %v6872_v13 = vld [vmem:[#allocation7 + $0x64] ss:$16 sps:$4 sm:$0xff]  }
  0xae   : > { %v8401_v14 = vld [vmem:[#allocation7 + $0x6c] ss:$16 sps:$4 sm:$0xff]   ;;  %v6876_v15 = vld [vmem:[#allocation7 + $0x60] ss:$16 sps:$4 sm:$0xff]   ;;  %v8404_v16 = vld [vmem:[#allocation7 + $0x68] ss:$16 sps:$4 sm:$0xff]  }
  0xaf   : > { %v6878_v17 = vld [vmem:[#allocation7 + $0x84] ss:$16 sps:$4 sm:$0xff]   ;;  %v8407_v18 = vld [vmem:[#allocation7 + $0x8c] ss:$16 sps:$4 sm:$0xff]   ;;  %v6882_v19 = vld [vmem:[#allocation7 + $0x80] ss:$16 sps:$4 sm:$0xff]  }
  0xb0   : > { %1049 = vmatpush1.bf16.msra.mxu0 %v6864_v7  ;;  %6615 = vmatpush1.bf16.msra.mxu1 %v8392_v8  ;;  %v8409_v20 = vld [vmem:[#allocation7 + $0x88] ss:$16 sps:$4 sm:$0xff]   ;;  %v6884_v21 = vld [vmem:[#allocation7 + $0xa4] ss:$16 sps:$4 sm:$0xff]   ;;  %v8413_v22 = vld [vmem:[#allocation7 + $0xac] ss:$16 sps:$4 sm:$0xff]  }
  0xb1   : > { %1050 = vmatprep.subr.bf16.mxu0 %v6866_v9  ;;  %6608 = vmatprep.subr.bf16.mxu1 %v8395_v10  ;;  %v6888_v23 = vld [vmem:[#allocation7 + $0xa0] ss:$16 sps:$4 sm:$0xff]   ;;  %v8416_v24 = vld [vmem:[#allocation7 + $0xa8] ss:$16 sps:$4 sm:$0xff]   ;;  %v6890_v25 = vld [vmem:[#allocation7 + $0xc4] ss:$16 sps:$4 sm:$0xff]  }
  0xb2   : > { %v8419_v26 = vld [vmem:[#allocation7 + $0xcc] ss:$16 sps:$4 sm:$0xff]   ;;  %v6894_v27 = vld [vmem:[#allocation7 + $0xc0] ss:$16 sps:$4 sm:$0xff]   ;;  %v8421_v28 = vld [vmem:[#allocation7 + $0xc8] ss:$16 sps:$4 sm:$0xff]  }
  0xb3   : > { %v6896_v29 = vld [vmem:[#allocation7 + $0xe4] ss:$16 sps:$4 sm:$0xff]   ;;  %v8425_v30 = vld [vmem:[#allocation7 + $0xec] ss:$16 sps:$4 sm:$0xff]   ;;  %v6900_v31 = vld [vmem:[#allocation7 + $0xe0] ss:$16 sps:$4 sm:$0xff]  }
  0xb4   : > { %1051 = vmatpush1.bf16.msra.mxu0 %v6870_v11  ;;  %6616 = vmatpush1.bf16.msra.mxu1 %v8397_v12  ;;  %v8428_v32 = vld [vmem:[#allocation7 + $0xe8] ss:$16 sps:$4 sm:$0xff]   ;;  %v6902_v34 = vld [vmem:[%s8359_s24] sm:$0xff]   ;;  %v6909_v40 = vld [vmem:[#allocation9 + $0x50] ss:$12 sps:$4 sm:$0xff]   ;;  %s5446_s22 = sshll.u32 %s8167_s28, 5 }
  0xb5   : > { %1052 = vmatprep.subr.bf16.mxu0 %v6872_v13  ;;  %6609 = vmatprep.subr.bf16.mxu1 %v8401_v14  ;;  %v6904_v33 = vld [vmem:[#allocation9 + $0x8] ss:$12 sps:$4 sm:$0xff]   ;;  %v8433_v35 = vld [vmem:[%s8359_s24 + $0x60] sm:$0xff]   ;;  %v512_v56 = vld [vmem:[%s8366_s21 + $0xc] sm:$0xf]  ;;  %p10713_p3 = scmp.lt.s32.totalorder %s5446_s22, 63 }
  0xb6   : > { %v6905_v36 = vld [vmem:[#allocation9 + $0x20] ss:$12 sps:$4 sm:$0xff]   ;;  %v6908_v37 = vld [vmem:[#allocation9 + $0x38] ss:$12 sps:$4 sm:$0xff]   ;;  %v6910_v46 = vld [vmem:[%s8359_s24 + $0x10] sm:$0xff]  }
  0xb7   : > { %v8444_v39 = vld [vmem:[%s8359_s24 + $0x68] sm:$0xff]   ;;  %v509_v41 = vld [vmem:[%s8366_s21] sm:$0xf]  ;;  %v510_v43 = vld [vmem:[%s8366_s21 + $0x4] sm:$0xf]  ;;  %s11777_s22 = smov (!%p10713_p3, %s5446_s22), 63 }
  0xb8   : > { %1053 = vmatpush1.bf16.msra.mxu0 %v6876_v15  ;;  %6617 = vmatpush1.bf16.msra.mxu1 %v8404_v16  ;;  %v5449_v42 = vld [vmem:[%s8366_s21 + $0x80] sm:$0xf]  ;;  %v5450_v44 = vld [vmem:[%s8366_s21 + $0x84] sm:$0xf]  ;;  %v6912_v47 = vld [vmem:[#allocation9 + $0x68] ss:$12 sps:$4 sm:$0xff]  }
  0xb9   : > { %1054 = vmatprep.subr.bf16.mxu0 %v6878_v17  ;;  %6610 = vmatprep.subr.bf16.mxu1 %v8407_v18  ;;  %v574_v45 = vadd.bf16 %v5449_v42, %v509_v41  ;;  %v575_v48 = vadd.bf16 %v5450_v44, %v510_v43  ;;  %v5481_v49 = vld [vmem:[%s8366_s21 + $0x100] sm:$0xf]  ;;  %v8458_v50 = vld [vmem:[%s8359_s24 + $0x70] sm:$0xff]   ;;  %v5482_v51 = vld [vmem:[%s8366_s21 + $0x104] sm:$0xf]  ;;  %s5998_s28 = sshll.u32 %s11777_s22, 4 }
  0xba   : > { %v511_v52 = vld [vmem:[%s8366_s21 + $0x8] sm:$0xf]  ;;  %v6913_v54 = vld [vmem:[#allocation9 + $0x80] ss:$12 sps:$4 sm:$0xff]   ;;  %v5514_v60 = vld [vmem:[%s8366_s21 + $0x184] sm:$0xf]  ;;  %s10760_s17 = scalar_lea.vmem %s11136_s7, %s5998_s28 }
  0xbb   : > { %v5451_v53 = vld [vmem:[%s8366_s21 + $0x88] sm:$0xf]  ;;  %v639_v55 = vadd.bf16 %v5481_v49, %v574_v45  ;;  %v5452_v57 = vld [vmem:[%s8366_s21 + $0x8c] sm:$0xf]  ;;  %v640_v58 = vadd.bf16 %v5482_v51, %v575_v48  ;;  %v5513_v59 = vld [vmem:[%s8366_s21 + $0x180] sm:$0xf] }
  0xbc   : > { %1055 = vmatpush1.bf16.msra.mxu0 %v6882_v19  ;;  %6618 = vmatpush1.bf16.msra.mxu1 %v8409_v20  ;;  %v513_v61 = vld [vmem:[%s8366_s21 + $0x10] sm:$0xf]  ;;  %v576_v62 = vadd.bf16 %v5451_v53, %v511_v52  ;;  %v514_v63 = vld [vmem:[%s8366_s21 + $0x14] sm:$0xf]  ;;  %v577_v3 = vadd.bf16 %v5452_v57, %v512_v56  ;;  %v6914_v7 = vld [vmem:[%s8359_s24 + $0x18] sm:$0xff]  }
  0xbd   : > { %1056 = vmatprep.subr.bf16.mxu0 %v6884_v21  ;;  %6611 = vmatprep.subr.bf16.mxu1 %v8413_v22  ;;  %v5453_v1 = vld [vmem:[%s8366_s21 + $0x90] sm:$0xf]  ;;  %v704_v5 = vadd.bf16 %v5513_v59, %v639_v55  ;;  %v6916_v9 = vld [vmem:[#allocation9 + $0x98] ss:$12 sps:$4 sm:$0xff]   ;;  %v5515_v11 = vld [vmem:[%s8366_s21 + $0x188] sm:$0xf] }
  0xbe   : > { %v5486_v17 = vld [vmem:[%s8366_s21 + $0x114] sm:$0xf]  ;;  %v515_v19 = vld [vmem:[%s8366_s21 + $0x18] sm:$0xf]  ;;  %v6917_v21 = vld [vmem:[#allocation9 + $0xb0] ss:$12 sps:$4 sm:$0xff]  }
  0xbf   : > { %v5487_v44 = vld [vmem:[%s8366_s21 + $0x118] sm:$0xf]  ;;  %v5489_v48 = vld [vmem:[%s8366_s21 + $0x120] sm:$0xf]  ;;  %v5490_v55 = vld [vmem:[%s8366_s21 + $0x124] sm:$0xf] }
  0xc0   : > { %1057 = vmatpush1.bf16.msra.mxu0 %v6888_v23  ;;  %6619 = vmatpush1.bf16.msra.mxu1 %v8416_v24  ;;  %v8509_v49 = vld [vmem:[%s8359_s24 + $0x20] sm:$0xff]   ;;  %v5520_v57 = vld [vmem:[%s8366_s21 + $0x19c] sm:$0xf] }
  0xc1   : > { %1058 = vmatprep.subr.bf16.mxu0 %v6890_v25  ;;  %6612 = vmatprep.subr.bf16.mxu1 %v8419_v26  ;;  %v516_v25 = vld [vmem:[%s8366_s21 + $0x1c] sm:$0xf]  ;;  %v6919_v51 = vld [vmem:[#allocation10] sm:$0xff]  }
  0xc4   : > { %1059 = vmatpush1.bf16.msra.mxu0 %v6894_v27  ;;  %6620 = vmatpush1.bf16.msra.mxu1 %v8421_v28  ;;  %v5455_v27 = vld [vmem:[%s8366_s21 + $0x98] sm:$0xf] }
  0xc5   : > { %1060 = vmatprep.subr.bf16.mxu0 %v6896_v29  ;;  %6613 = vmatprep.subr.bf16.mxu1 %v8425_v30  ;;  %v5456_v29 = vld [vmem:[%s8366_s21 + $0x9c] sm:$0xf]  ;;  %v580_v42 = vadd.bf16 %v5455_v27, %v515_v19  ;;  %v5494_v27 = vld [vmem:[%s8366_s21 + $0x134] sm:$0xf] }
  0xc7   : > { %v645_v56 = vadd.bf16 %v5487_v44, %v580_v42  ;;  %v5464_v42 = vld [vmem:[%s8366_s21 + $0xbc] sm:$0xf] }
  0xc8   : > { %1061 = vmatpush1.bf16.msra.mxu0 %v6900_v31  ;;  %6621 = vmatpush1.bf16.msra.mxu1 %v8428_v32  ;;  %v517_v31 = vld [vmem:[%s8366_s21 + $0x20] sm:$0xf] }
  0xc9   : > { %6414 = vmatprep.subr.bf16.mxu1 %v6904_v33  ;;  %1239 = vmatprep.subr.bf16.mxu0 %v8384_v2  ;;  %v5454_v2 = vld [vmem:[%s8366_s21 + $0x94] sm:$0xf] }
  0xca   : > { %v579_v13 = vadd.bf16 %v5454_v2, %v514_v63  ;;  %v5522_v63 = vld [vmem:[%s8366_s21 + $0x1a4] sm:$0xf]  ;;  %v520_v2 = vld [vmem:[%s8366_s21 + $0x2c] sm:$0xf] }
  0xcb   : > { %1079 = vmatmul.mubr.bf16.vlgmr.msra.gmra.mrb[0].mxu0 %v6902_v34  ;;  %1392 = vmatmul.mubr.bf16.vlgmr.msra.gmra.mrb[0].mxu1 %v8433_v35 }
  0xcc   : > { %6415 = vmatpush3.bf16.msra.mxu1 %v6904_v33  ;;  %1240 = vmatpush1.bf16.msra.mxu0 %v8386_v4  ;;  %v5483_v4 = vld [vmem:[%s8366_s21 + $0x108] sm:$0xf]  ;;  %v5457_v33 = vld [vmem:[%s8366_s21 + $0xa0] sm:$0xf] }
  0xcd   : > { %6416 = vmatprep.subr.bf16.mxu1 %v6905_v36  ;;  %1088 = vmatprep.mubr.bf16.mxu0 %v8107_v0  ;;  %v641_v15 = vadd.bf16 %v5483_v4, %v576_v62  ;;  %v582_v45 = vadd.bf16 %v5457_v33, %v517_v31  ;;  %v5523_v31 = vld [vmem:[%s8366_s21 + $0x1a8] sm:$0xf]  ;;  %v5524_v33 = vld [vmem:[%s8366_s21 + $0x1ac] sm:$0xf] }
  0xce   : > { %1401 = vmatprep.mubr.bf16.mxu1 %v8107_v0  ;;  %1241 = vmatprep.subr.bf16.mxu0 %v8390_v6  ;;  %v5484_v6 = vld [vmem:[%s8366_s21 + $0x10c] sm:$0xf] }
  0xcf   : > { %v642_v23 = vadd.bf16 %v5484_v6, %v577_v3  ;;  %v706_v41 = vadd.bf16 %v5515_v11, %v641_v15  ;;  %v647_v62 = vadd.bf16 %v5489_v48, %v582_v45  ;;  %v5459_v3 = vld [vmem:[%s8366_s21 + $0xa8] sm:$0xf]  ;;  %v521_v6 = vld [vmem:[%s8366_s21 + $0x30] sm:$0xf]  ;;  %v525_v45 = vld [vmem:[%s8366_s21 + $0x40] sm:$0xf] }
  0xd0   : > { %6417 = vmatpush3.bf16.msra.mxu1 %v6905_v36  ;;  %1242 = vmatpush1.bf16.msra.mxu0 %v8392_v8  ;;  %v8481_v8 = vld [vmem:[%s8359_s24 + $0x78] sm:$0xff]   ;;  %v644_v36 = vadd.bf16 %v5486_v17, %v579_v13  ;;  %v5491_v15 = vld [vmem:[%s8366_s21 + $0x128] sm:$0xf]  ;;  %v5492_v17 = vld [vmem:[%s8366_s21 + $0x12c] sm:$0xf] }
  0xd1   : > { %6418 = vmatprep.subr.bf16.mxu1 %v6908_v37  ;;  %1243 = vmatprep.subr.bf16.mxu0 %v8395_v10  ;;  %v705_v10 = vadd.bf16 %v5514_v60, %v640_v58  ;;  %v5521_v58 = vld [vmem:[%s8366_s21 + $0x1a0] sm:$0xf] }
  0xd2   : > { %v712_v13 = vadd.bf16 %v5521_v58, %v647_v62  ;;  %v5496_v58 = vld [vmem:[%s8366_s21 + $0x13c] sm:$0xf]  ;;  %v8568_v62 = vld [vmem:[%s8359_s24 + $0x30] sm:$0xff]  }
  0xd3   : > { %1089 = vmatmul.mubr.bf16.gmra.mrb[4].mxu0 %v6906_v38  ;;  %1402 = vmatmul.mubr.bf16.gmra.mrb[4].mxu1 %v8444_v39  ;;  %v8496_v34 = vcombine.low %v704_v5, %v705_v10  ;;  %v518_v38 = vld [vmem:[%s8366_s21 + $0x24] sm:$0xf]  ;;  %v5460_v5 = vld [vmem:[%s8366_s21 + $0xac] sm:$0xf]  ;;  %v5462_v10 = vld [vmem:[%s8366_s21 + $0xb4] sm:$0xf] }
  0xd4   : > { %6419 = vmatpush3.bf16.msra.mxu1 %v6908_v37  ;;  %1098 = vmatprep.mubr.bf16.mxu0 %v8107_v0  ;;  %v5517_v37 = vld [vmem:[%s8366_s21 + $0x190] sm:$0xf] }
  0xd5   : > { %6420 = vmatprep.subr.bf16.mxu1 %v6909_v40  ;;  %1411 = vmatprep.mubr.bf16.mxu1 %v8107_v0 }
  0xd6   : > { %1244 = vmatpush1.bf16.msra.mxu0 %v8397_v12  ;;  %v578_v12 = vadd.bf16 %v5453_v1, %v513_v61  ;;  %v6921_v61 = vld [vmem:[#allocation10 + $0x8] sm:$0xff]  }
  0xd7   : > { %1245 = vmatprep.subr.bf16.mxu0 %v8401_v14  ;;  %v5485_v14 = vld [vmem:[%s8366_s21 + $0x110] sm:$0xf]  ;;  %v519_v1 = vld [vmem:[%s8366_s21 + $0x28] sm:$0xf] }
  0xd8   : > { %6421 = vmatpush3.bf16.msra.mxu1 %v6909_v40  ;;  %v5458_v40 = vld [vmem:[%s8366_s21 + $0xa4] sm:$0xf] }
  0xd9   : > { %6422 = vmatprep.subr.bf16.mxu1 %v6912_v47 }
  0xda   : > { %1246 = vmatpush1.bf16.msra.mxu0 %v8404_v16  ;;  %v5516_v16 = vld [vmem:[%s8366_s21 + $0x18c] sm:$0xf] }
  0xdb   : > { %1099 = vmatmul.mubr.bf16.gmra.mrb[8].mxu0 %v6910_v46  ;;  %1412 = vmatmul.mubr.bf16.gmra.mrb[8].mxu1 %v8458_v50  ;;  %v707_v43 = vadd.bf16 %v5516_v16, %v642_v23  ;;  %v5488_v46 = vld [vmem:[%s8366_s21 + $0x11c] sm:$0xf]  ;;  %v5493_v23 = vld [vmem:[%s8366_s21 + $0x130] sm:$0xf] }
  0xdc   : > { %6423 = vmatpush3.bf16.msra.mxu1 %v6912_v47  ;;  %1108 = vmatprep.mubr.bf16.mxu0 %v8107_v0  ;;  %v583_v47 = vadd.bf16 %v5458_v40, %v518_v38  ;;  %v5525_v38 = vld [vmem:[%s8366_s21 + $0x1b0] sm:$0xf]  ;;  %v5526_v40 = vld [vmem:[%s8366_s21 + $0x1b4] sm:$0xf] }
  0xdd   : > { %6424 = vmatprep.subr.bf16.mxu1 %v6913_v54  ;;  %1421 = vmatprep.mubr.bf16.mxu1 %v8107_v0  ;;  %v8516_v59 = vcombine.low %v706_v41, %v707_v43  ;;  %v524_v41 = vld [vmem:[%s8366_s21 + $0x3c] sm:$0xf] }
  0xde   : > { %1247 = vmatprep.subr.bf16.mxu0 %v8407_v18  ;;  %v643_v18 = vadd.bf16 %v5485_v14, %v578_v12  ;;  %v648_v4 = vadd.bf16 %v5490_v55, %v583_v47  ;;  %v584_v12 = vadd.bf16 %v5459_v3, %v519_v1  ;;  %v585_v14 = vadd.bf16 %v5460_v5, %v520_v2  ;;  %v5466_v47 = vld [vmem:[%s8366_s21 + $0xc4] sm:$0xf]  ;;  %v5528_v3 = vld [vmem:[%s8366_s21 + $0x1bc] sm:$0xf]  ;;  %v527_v5 = vld [vmem:[%s8366_s21 + $0x48] sm:$0xf] }
  0xdf   : > { %1248 = vmatpush1.bf16.msra.mxu0 %v8409_v20  ;;  %v5518_v20 = vld [vmem:[%s8366_s21 + $0x194] sm:$0xf]  ;;  %v5498_v1 = vld [vmem:[%s8366_s21 + $0x144] sm:$0xf] }
  0xe0   : > { %6425 = vmatpush3.bf16.msra.mxu1 %v6913_v54  ;;  %1249 = vmatprep.subr.bf16.mxu0 %v8413_v22  ;;  %v581_v22 = vadd.bf16 %v5456_v29, %v516_v25  ;;  %v708_v52 = vadd.bf16 %v5517_v37, %v643_v18  ;;  %v709_v53 = vadd.bf16 %v5518_v20, %v644_v36  ;;  %v5519_v54 = vld [vmem:[%s8366_s21 + $0x198] sm:$0xf]  ;;  %v8539_v25 = vld [vmem:[%s8359_s24 + $0x28] sm:$0xff]  }
  0xe1   : > { %6426 = vmatprep.subr.bf16.mxu1 %v6916_v9  ;;  %v710_v11 = vadd.bf16 %v5519_v54, %v645_v56  ;;  %v713_v16 = vadd.bf16 %v5522_v63, %v648_v4  ;;  %v649_v29 = vadd.bf16 %v5491_v15, %v584_v12  ;;  %v523_v18 = vld [vmem:[%s8366_s21 + $0x38] sm:$0xf]  ;;  %v650_v37 = vadd.bf16 %v5492_v17, %v585_v14  ;;  %v5529_v4 = vld [vmem:[%s8366_s21 + $0x1c0] sm:$0xf]  ;;  %v528_v12 = vld [vmem:[%s8366_s21 + $0x4c] sm:$0xf] }
  0xe2   : > { %v646_v60 = vadd.bf16 %v5488_v46, %v581_v22  ;;  %v5463_v20 = vld [vmem:[%s8366_s21 + $0xb8] sm:$0xf]  ;;  %v526_v46 = vld [vmem:[%s8366_s21 + $0x44] sm:$0xf]  ;;  %v530_v17 = vld [vmem:[%s8366_s21 + $0x54] sm:$0xf] }
  0xe3   : > { %1109 = vmatmul.mubr.bf16.gmra.mrb[12].mxu0 %v6914_v7  ;;  %1422 = vmatmul.mubr.bf16.gmra.mrb[12].mxu1 %v8481_v8  ;;  %v522_v7 = vld [vmem:[%s8366_s21 + $0x34] sm:$0xf]  ;;  %v8554_v43 = vcombine.low %v712_v13, %v713_v16  ;;  %v714_v48 = vadd.bf16 %v5523_v31, %v649_v29  ;;  %v5495_v54 = vld [vmem:[%s8366_s21 + $0x138] sm:$0xf]  ;;  %v5468_v13 = vld [vmem:[%s8366_s21 + $0xcc] sm:$0xf] }
  0xe4   : > { %6427 = vmatpush3.bf16.msra.mxu1 %v6916_v9  ;;  %1118 = vmatprep.mubr.bf16.mxu0 %v8107_v0  ;;  %v5461_v9 = vld [vmem:[%s8366_s21 + $0xb0] sm:$0xf]  ;;  %v5527_v63 = vld [vmem:[%s8366_s21 + $0x1b8] sm:$0xf] }
  0xe5   : > { %6428 = vmatprep.subr.bf16.mxu1 %v6917_v21  ;;  %6430 = vmatprep.mubr.bf16.mxu1 %v8496_v34  ;;  %v586_v19 = vadd.bf16 %v5461_v9, %v521_v6  ;;  %v6927_v6 = vld [vmem:[#allocation10 + $0x20] sm:$0xff]   ;;  %v529_v16 = vld [vmem:[%s8366_s21 + $0x50] sm:$0xf] }
  0xe6   : > { %1250 = vmatpush1.bf16.msra.mxu0 %v8416_v24  ;;  %v8526_v24 = vcombine.low %v708_v52, %v709_v53  ;;  %v6925_v52 = vld [vmem:[#allocation10 + $0x18] sm:$0xff]   ;;  %v589_v53 = vadd.bf16 %v5464_v42, %v524_v41  ;;  %v5531_v42 = vld [vmem:[%s8366_s21 + $0x1c8] sm:$0xf] }
  0xe7   : > { %1251 = vmatprep.subr.bf16.mxu0 %v8419_v26  ;;  %v711_v26 = vadd.bf16 %v5520_v57, %v646_v60  ;;  %v651_v22 = vadd.bf16 %v5493_v23, %v586_v19  ;;  %v591_v60 = vadd.bf16 %v5466_v47, %v526_v46  ;;  %v5470_v19 = vld [vmem:[%s8366_s21 + $0xd4] sm:$0xf]  ;;  %v5532_v46 = vld [vmem:[%s8366_s21 + $0x1cc] sm:$0xf]  ;;  %v532_v47 = vld [vmem:[%s8366_s21 + $0x5c] sm:$0xf] }
  0xe8   : > { %6429 = vmatpush3.bf16.msra.mxu1 %v6917_v21  ;;  %v587_v21 = vadd.bf16 %v5462_v10, %v522_v7  ;;  %v654_v9 = vadd.bf16 %v5496_v58, %v589_v53  ;;  %v595_v41 = vadd.bf16 %v5470_v19, %v530_v17  ;;  %v5472_v53 = vld [vmem:[%s8366_s21 + $0xdc] sm:$0xf]  ;;  %v5473_v58 = vld [vmem:[%s8366_s21 + $0xe0] sm:$0xf]  ;;  %v5506_v17 = vld [vmem:[%s8366_s21 + $0x164] sm:$0xf] }
  0xe9   : > { %6462 = vmatprep.subr.bf16.mxu1 %v6919_v51  ;;  %v8546_v36 = vcombine.low %v710_v11, %v711_v26  ;;  %v716_v56 = vadd.bf16 %v5525_v38, %v651_v22  ;;  %v5530_v11 = vld [vmem:[%s8366_s21 + $0x1c4] sm:$0xf]  ;;  %v5467_v26 = vld [vmem:[%s8366_s21 + $0xc8] sm:$0xf]  ;;  %v656_v15 = vadd.bf16 %v5498_v1, %v591_v60  ;;  %v5500_v38 = vld [vmem:[%s8366_s21 + $0x14c] sm:$0xf] }
  0xea   : > { %1252 = vmatpush1.bf16.msra.mxu0 %v8421_v28  ;;  %v6923_v28 = vld [vmem:[#allocation10 + $0x10] sm:$0xff]   ;;  %v652_v44 = vadd.bf16 %v5494_v27, %v587_v21  ;;  %v592_v23 = vadd.bf16 %v5467_v26, %v527_v5  ;;  %v6929_v27 = vld [vmem:[#allocation10 + $0x28] sm:$0xff]   ;;  %v719_v29 = vadd.bf16 %v5528_v3, %v654_v9  ;;  %v5474_v1 = vld [vmem:[%s8366_s21 + $0xe4] sm:$0xf]  ;;  %v597_v5 = vadd.bf16 %v5472_v53, %v532_v47 }
  0xeb   : > { %1119 = vmatmul.mubr.bf16.gmra.mrb[16].mxu0 %v8509_v49  ;;  %6431 = vmatmul.mubr.bf16.vlgmr.msra.gmra.mrb[16].mxu1 %v8516_v59  ;;  %v5501_v22 = vld [vmem:[%s8366_s21 + $0x150] sm:$0xf] }
  0xec   : > { %6463 = vmatpush3.bf16.msra.mxu1 %v6919_v51  ;;  %1128 = vmatprep.mubr.bf16.mxu0 %v8107_v0  ;;  %v588_v51 = vadd.bf16 %v5463_v20, %v523_v18  ;;  %v717_v57 = vadd.bf16 %v5526_v40, %v652_v44  ;;  %v5499_v18 = vld [vmem:[%s8366_s21 + $0x148] sm:$0xf]  ;;  %v8594_v20 = vld [vmem:[%s8359_s24 + $0x38] sm:$0xff]   ;;  %v5502_v44 = vld [vmem:[%s8366_s21 + $0x154] sm:$0xf] }
  0xed   : > { %6434 = vmatprep.mubr.bf16.mxu1 %v8526_v24  ;;  %6464 = vmatprep.subr.bf16.mxu1 %v6921_v61  ;;  %v6931_v60 = vld [vmem:[#allocation10 + $0x30] sm:$0xff]  }
  0xee   : > { %1253 = vmatprep.subr.bf16.mxu0 %v8425_v30  ;;  %v5465_v30 = vld [vmem:[%s8366_s21 + $0xc0] sm:$0xf]  ;;  %v653_v2 = vadd.bf16 %v5495_v54, %v588_v51  ;;  %v8581_v14 = vcombine.low %v716_v56, %v717_v57  ;;  %v660_v57 = vadd.bf16 %v5502_v44, %v595_v41  ;;  %v538_v41 = vld [vmem:[%s8366_s21 + $0x74] sm:$0xf] }
  0xef   : > { %1254 = vmatpush1.bf16.msra.mxu0 %v8428_v32  ;;  %v715_v32 = vadd.bf16 %v5524_v33, %v650_v37  ;;  %v590_v55 = vadd.bf16 %v5465_v30, %v525_v45  ;;  %v593_v33 = vadd.bf16 %v5468_v13, %v528_v12  ;;  %v721_v37 = vadd.bf16 %v5530_v11, %v656_v15  ;;  %v531_v30 = vld [vmem:[%s8366_s21 + $0x58] sm:$0xf]  ;;  %v533_v54 = vld [vmem:[%s8366_s21 + $0x60] sm:$0xf]  ;;  %v5504_v12 = vld [vmem:[%s8366_s21 + $0x15c] sm:$0xf] }
  0xf0   : > { %6465 = vmatpush3.bf16.msra.mxu1 %v6921_v61  ;;  %v5497_v61 = vld [vmem:[%s8366_s21 + $0x140] sm:$0xf]  ;;  %v718_v21 = vadd.bf16 %v5527_v63, %v653_v2  ;;  %v657_v45 = vadd.bf16 %v5499_v18, %v592_v23  ;;  %v534_v63 = vld [vmem:[%s8366_s21 + $0x64] sm:$0xf]  ;;  %v598_v9 = vadd.bf16 %v5473_v58, %v533_v54  ;;  %v662_v18 = vadd.bf16 %v5504_v12, %v597_v5  ;;  %v5508_v54 = vld [vmem:[%s8366_s21 + $0x16c] sm:$0xf] }
  0xf1   : > { %6466 = vmatprep.subr.bf16.mxu1 %v6923_v28  ;;  %v8575_v7 = vcombine.low %v714_v48, %v715_v32  ;;  %v655_v10 = vadd.bf16 %v5497_v61, %v590_v55  ;;  %v5471_v48 = vld [vmem:[%s8366_s21 + $0xd8] sm:$0xf]  ;;  %v5533_v32 = vld [vmem:[%s8366_s21 + $0x1d0] sm:$0xf]  ;;  %v5534_v61 = vld [vmem:[%s8366_s21 + $0x1d4] sm:$0xf]  ;;  %v599_v26 = vadd.bf16 %v5474_v1, %v534_v63 }
  0xf2   : > { %v8603_v51 = vcombine.low %v718_v21, %v719_v29  ;;  %v722_v2 = vadd.bf16 %v5531_v42, %v657_v45  ;;  %v596_v3 = vadd.bf16 %v5471_v48, %v531_v30  ;;  %v725_v11 = vadd.bf16 %v5534_v61, %v660_v57  ;;  %v5505_v13 = vld [vmem:[%s8366_s21 + $0x160] sm:$0xf]  ;;  %v5536_v21 = vld [vmem:[%s8366_s21 + $0x1dc] sm:$0xf]  ;;  %v5475_v29 = vld [vmem:[%s8366_s21 + $0xe8] sm:$0xf] }
  0xf3   : > { %1129 = vmatmul.mubr.bf16.gmra.mrb[20].mxu0 %v8539_v25  ;;  %6435 = vmatmul.mubr.bf16.gmra.mrb[20].mxu1 %v8546_v36  ;;  %v720_v31 = vadd.bf16 %v5529_v4, %v655_v10  ;;  %v8622_v15 = vld [vmem:[%s8359_s24 + $0x40] sm:$0xff]   ;;  %v6933_v42 = vld [vmem:[#allocation10 + $0x38] sm:$0xff]   ;;  %v664_v44 = vadd.bf16 %v5506_v17, %v599_v26  ;;  %v5477_v45 = vld [vmem:[%s8366_s21 + $0xf0] sm:$0xf] }
  0xf4   : > { %1138 = vmatprep.mubr.bf16.mxu0 %v8107_v0  ;;  %6438 = vmatprep.mubr.bf16.mxu1 %v8554_v43  ;;  %v5537_v23 = vld [vmem:[%s8366_s21 + $0x1e0] sm:$0xf]  ;;  %v5507_v48 = vld [vmem:[%s8366_s21 + $0x168] sm:$0xf]  ;;  %v5510_v1 = vld [vmem:[%s8366_s21 + $0x174] sm:$0xf] }
  0xf5   : > { %6467 = vmatpush3.bf16.msra.mxu1 %v6923_v28  ;;  %v5469_v28 = vld [vmem:[%s8366_s21 + $0xd0] sm:$0xf]  ;;  %v8608_v55 = vcombine.low %v720_v31, %v721_v37  ;;  %v5476_v31 = vld [vmem:[%s8366_s21 + $0xec] sm:$0xf]  ;;  %v663_v37 = vadd.bf16 %v5505_v13, %v598_v9  ;;  %v5539_v63 = vld [vmem:[%s8366_s21 + $0x1e8] sm:$0xf] }
  0xf6   : > { %6468 = vmatprep.subr.bf16.mxu1 %v6925_v52  ;;  %v594_v40 = vadd.bf16 %v5469_v28, %v529_v16  ;;  %v5535_v16 = vld [vmem:[%s8366_s21 + $0x1d8] sm:$0xf]  ;;  %v535_v28 = vld [vmem:[%s8366_s21 + $0x68] sm:$0xf]  ;;  %v540_v5 = vld [vmem:[%s8366_s21 + $0x7c] sm:$0xf] }
  0xf7   : > { %v600_v47 = vadd.bf16 %v5475_v29, %v535_v28  ;;  %v8649_v61 = vld [vmem:[%s8359_s24 + $0x48] sm:$0xff]   ;;  %v5542_v17 = vld [vmem:[%s8366_s21 + $0x1f4] sm:$0xf]  ;;  %v6946_v29 = vld [vmem:[#allocation9 + $0x4] ss:$12 sps:$4 sm:$0xff]  }
  0xf8   : > { %v659_v56 = vadd.bf16 %v5501_v22, %v594_v40  ;;  %v537_v40 = vld [vmem:[%s8366_s21 + $0x70] sm:$0xf]  ;;  %1688 = vmatprep.subr.bf16.mxu0 %v6946_v29  ;;  %v6982_v29 = vld [vmem:[#allocation9 + $0x94] ss:$12 sps:$4 sm:$0xff]  }
  0xf9   : > { %6469 = vmatpush3.bf16.msra.mxu1 %v6925_v52  ;;  %v658_v52 = vadd.bf16 %v5500_v38, %v593_v33  ;;  %v5538_v38 = vld [vmem:[%s8366_s21 + $0x1e4] sm:$0xf]  ;;  %v602_v57 = vadd.bf16 %v5477_v45, %v537_v40 }
  0xfa   : > { %6470 = vmatprep.subr.bf16.mxu1 %v6927_v6  ;;  %v724_v10 = vadd.bf16 %v5533_v32, %v659_v56  ;;  %v728_v32 = vadd.bf16 %v5537_v23, %v663_v37  ;;  %v729_v56 = vadd.bf16 %v5538_v38, %v664_v44  ;;  %v5512_v37 = vld [vmem:[%s8366_s21 + $0x17c] sm:$0xf]  ;;  %v8671_v38 = vld [vmem:[%s8359_s24 + $0x50] sm:$0xff]   ;;  %v5543_v44 = vld [vmem:[%s8366_s21 + $0x1f8] sm:$0xf] }
  0xfb   : > { %1139 = vmatmul.mubr.bf16.gmra.mrb[24].mxu0 %v8568_v62  ;;  %6439 = vmatmul.mubr.bf16.gmra.mrb[24].mxu1 %v8575_v7  ;;  %v723_v4 = vadd.bf16 %v5532_v46, %v658_v52  ;;  %v5478_v46 = vld [vmem:[%s8366_s21 + $0xf4] sm:$0xf]  ;;  %v727_v52 = vadd.bf16 %v5536_v21, %v662_v18 }
  0xfc   : > { %1148 = vmatprep.mubr.bf16.mxu0 %v8107_v0  ;;  %6442 = vmatprep.mubr.bf16.mxu1 %v8581_v14  ;;  %v8637_v22 = vcombine.low %v724_v10, %v725_v11  ;;  %v603_v58 = vadd.bf16 %v5478_v46, %v538_v41  ;;  %v5541_v10 = vld [vmem:[%s8366_s21 + $0x1f0] sm:$0xf]  ;;  %v5479_v11 = vld [vmem:[%s8366_s21 + $0xf8] sm:$0xf]  ;;  %v8660_v12 = vcombine.low %v728_v32, %v729_v56  ;;  %v5544_v46 = vld [vmem:[%s8366_s21 + $0x1fc] sm:$0xf] }
  0xfd   : > { %6471 = vmatpush3.bf16.msra.mxu1 %v6927_v6  ;;  %v5503_v6 = vld [vmem:[%s8366_s21 + $0x158] sm:$0xf]  ;;  %v8632_v33 = vcombine.low %v722_v2, %v723_v4  ;;  %v665_v2 = vadd.bf16 %v5507_v48, %v600_v47  ;;  %v6934_v32 = vld [vmem:[%s8366_s21] sm:$0xff]  }
  0xfe   : > { %6472 = vmatprep.subr.bf16.mxu1 %v6929_v27  ;;  %v661_v19 = vadd.bf16 %v5503_v6, %v596_v3  ;;  %v5540_v3 = vld [vmem:[%s8366_s21 + $0x1ec] sm:$0xf]  ;;  %v539_v4 = vld [vmem:[%s8366_s21 + $0x78] sm:$0xf]  ;;  %v668_v13 = vadd.bf16 %v5510_v1, %v603_v58 }
  0xff   : > { %v730_v28 = vadd.bf16 %v5539_v63, %v665_v2  ;;  %v604_v23 = vadd.bf16 %v5479_v11, %v539_v4  ;;  %v8684_v48 = vld [vmem:[%s8359_s24 + $0x58] sm:$0xff]   ;;  %v6939_v58 = vld [vmem:[%s8366_s21 + $0x28] sm:$0xff]   ;;  %v6942_v63 = vld [vmem:[%s8366_s21 + $0x40] sm:$0xff]  }
 0x100   : > { %v726_v30 = vadd.bf16 %v5535_v16, %v661_v19  ;;  %v5480_v16 = vld [vmem:[%s8366_s21 + $0xfc] sm:$0xf]  ;;  %v5511_v19 = vld [vmem:[%s8366_s21 + $0x178] sm:$0xf]  ;;  %v733_v18 = vadd.bf16 %v5542_v17, %v668_v13  ;;  %v6944_v1 = vld [vmem:[#allocation9] ss:$12 sps:$4 sm:$0xff]  }
 0x101   : > { %6473 = vmatpush3.bf16.msra.mxu1 %v6929_v27  ;;  %v536_v27 = vld [vmem:[%s8366_s21 + $0x6c] sm:$0xf]  ;;  %v669_v41 = vadd.bf16 %v5511_v19, %v604_v23  ;;  %v6937_v56 = vld [vmem:[%s8366_s21 + $0x18] sm:$0xff]   ;;  %v6947_v2 = vld [vmem:[%s8366_s21 + $0x50] sm:$0xff]  }
 0x102   : > { %6474 = vmatprep.subr.bf16.mxu1 %v6931_v60  ;;  %v601_v53 = vadd.bf16 %v5476_v31, %v536_v27  ;;  %v8656_v6 = vcombine.low %v726_v30, %v727_v52  ;;  %v605_v27 = vadd.bf16 %v5480_v16, %v540_v5  ;;  %v6949_v4 = vld [vmem:[#allocation9 + $0x18] ss:$12 sps:$4 sm:$0xff]   ;;  %v6961_v13 = vld [vmem:[#allocation9 + $0x48] ss:$12 sps:$4 sm:$0xff]   ;;  %v6968_v19 = vld [vmem:[#allocation9 + $0x60] ss:$12 sps:$4 sm:$0xff]  }
 0x103   : > { %1149 = vmatmul.mubr.bf16.gmra.mrb[28].mxu0 %v8594_v20  ;;  %6443 = vmatmul.mubr.bf16.gmra.mrb[28].mxu1 %v8603_v51  ;;  %v734_v30 = vadd.bf16 %v5543_v44, %v669_v41  ;;  %v6948_v5 = vld [vmem:[%s8366_s21 + $0x58] sm:$0xff]   ;;  %v6970_v16 = vld [vmem:[#allocation9 + $0x64] ss:$12 sps:$4 sm:$0xff]   ;;  %v6953_v17 = vld [vmem:[%s8366_s21 + $0x68] sm:$0xff]  }
 0x104   : > { %1158 = vmatprep.mubr.bf16.mxu0 %v8107_v0  ;;  %6446 = vmatprep.mubr.bf16.mxu1 %v8608_v55  ;;  %v666_v9 = vadd.bf16 %v5508_v54, %v601_v53  ;;  %v6935_v53 = vld [vmem:[%s8366_s21 + $0x8] sm:$0xff]   ;;  %v6936_v54 = vld [vmem:[%s8366_s21 + $0x10] sm:$0xff]  }
 0x105   : > { %6475 = vmatpush3.bf16.msra.mxu1 %v6931_v60  ;;  %v5509_v60 = vld [vmem:[%s8366_s21 + $0x170] sm:$0xf]  ;;  %v6963_v11 = vld [vmem:[#allocation9 + $0x4c] ss:$12 sps:$4 sm:$0xff]   ;;  %v6985_v44 = vld [vmem:[#allocation9 + $0xa8] ss:$12 sps:$4 sm:$0xff]  }
 0x106   : > { %6476 = vmatprep.subr.bf16.mxu1 %v6933_v42  ;;  %v667_v26 = vadd.bf16 %v5509_v60, %v602_v57  ;;  %v731_v21 = vadd.bf16 %v5540_v3, %v666_v9  ;;  %v6938_v57 = vld [vmem:[%s8366_s21 + $0x20] sm:$0xff]   ;;  %v6940_v60 = vld [vmem:[%s8366_s21 + $0x30] sm:$0xff]   ;;  %v6951_v3 = vld [vmem:[#allocation9 + $0x1c] ss:$12 sps:$4 sm:$0xff]  }
 0x107   : > { %v6952_v9 = vld [vmem:[%s8366_s21 + $0x60] sm:$0xff]   ;;  %v7920_v23 = vld [vmem:[%s8359_s24 + $0x10] sm:$0xff]   ;;  %v6987_v41 = vld [vmem:[#allocation9 + $0xac] ss:$12 sps:$4 sm:$0xff]  }
 0x108   : > { %v732_v31 = vadd.bf16 %v5541_v10, %v667_v26  ;;  %v8673_v40 = vcombine.low %v730_v28, %v731_v21  ;;  %v6956_v10 = vld [vmem:[#allocation9 + $0x30] ss:$12 sps:$4 sm:$0xff]   ;;  %v7919_v26 = vld [vmem:[%s8359_s24 + $0x8] sm:$0xff]  }
 0x109   : > { %6477 = vmatpush3.bf16.msra.mxu1 %v6933_v42  ;;  %v670_v42 = vadd.bf16 %v5512_v37, %v605_v27  ;;  %v6954_v28 = vld [vmem:[%s8366_s21 + $0x70] sm:$0xff]   ;;  %v6975_v21 = vld [vmem:[#allocation9 + $0x7c] ss:$12 sps:$4 sm:$0xff]   ;;  %v6973_v27 = vld [vmem:[#allocation9 + $0x78] ss:$12 sps:$4 sm:$0xff]  }
 0x10a   : > { %v8676_v45 = vcombine.low %v732_v31, %v733_v18  ;;  %v6955_v31 = vld [vmem:[%s8366_s21 + $0x78] sm:$0xff]   ;;  %v6959_v18 = vld [vmem:[%s8366_s21 + $0x80] sm:$0xff]  }
 0x10b   : > { %1159 = vmatmul.mubr.bf16.gmra.mrb[32].mxu0 %v8622_v15  ;;  %6447 = vmatmul.mubr.bf16.gmra.mrb[32].mxu1 %v8632_v33  ;;  %v735_v47 = vadd.bf16 %v5544_v46, %v670_v42  ;;  %v6980_v37 = vld [vmem:[#allocation9 + $0x90] ss:$12 sps:$4 sm:$0xff]   ;;  %v6960_v46 = vld [vmem:[%s8366_s21 + $0x88] sm:$0xff]  }
 0x10c   : > { %1168 = vmatprep.mubr.bf16.mxu0 %v8107_v0  ;;  %6450 = vmatprep.mubr.bf16.mxu1 %v8637_v22  ;;  %v7921_v42 = vld [vmem:[%s8359_s24 + $0x18] sm:$0xff]  }
 0x10d   : > { %v8686_v52 = vcombine.low %v734_v30, %v735_v47  ;;  %v6964_v30 = vld [vmem:[%s8366_s21 + $0x90] sm:$0xff]   ;;  %v6965_v47 = vld [vmem:[%s8366_s21 + $0x98] sm:$0xff]  }
 0x113   : > { %1169 = vmatmul.mubr.bf16.gmra.mrb[36].mxu0 %v8649_v61  ;;  %6451 = vmatmul.mubr.bf16.gmra.mrb[36].mxu1 %v8656_v6 }
 0x114   : > { %1178 = vmatprep.mubr.bf16.mxu0 %v8107_v0  ;;  %6454 = vmatprep.mubr.bf16.mxu1 %v8660_v12 }
 0x11b   : > { %1179 = vmatmul.mubr.bf16.gmra.mrb[40].mxu0 %v8671_v38  ;;  %6455 = vmatmul.mubr.bf16.gmra.mrb[40].mxu1 %v8673_v40 }
 0x11c   : > { %1188 = vmatprep.mubr.bf16.mxu0 %v8107_v0  ;;  %6458 = vmatprep.mubr.bf16.mxu1 %v8676_v45 }
 0x123   : > { %1189 = vmatmul.mubr.bf16.gmra.mrb[44].mxu0 %v8684_v48  ;;  %6459 = vmatmul.mubr.bf16.gmra.mrb[44].mxu1 %v8686_v52 }
 0x124   : > { %1198 = vmatprep.mubr.bf16.mxu0 %v8107_v0  ;;  %6478 = vmatprep.mubr.bf16.mxu1 %v6934_v32  ;;  %v6966_v32 = vld [vmem:[%s8366_s21 + $0xa0] sm:$0xff]  }
 0x12b   : > { %1199 = vmatmul.mubr.bf16.gmra.mrb[48].mxu0 %v8433_v35  ;;  %6479 = vmatmul.mubr.bf16.vlgmr.msra.gmra.mrb[48].mxu1 %v6935_v53  ;;  %v6941_v35 = vld [vmem:[%s8366_s21 + $0x38] sm:$0xff]   ;;  %v6967_v53 = vld [vmem:[%s8366_s21 + $0xa8] sm:$0xff]  }
 0x12c   : > { %1208 = vmatprep.mubr.bf16.mxu0 %v8107_v0  ;;  %6482 = vmatprep.mubr.bf16.mxu1 %v6936_v54  ;;  %v6971_v54 = vld [vmem:[%s8366_s21 + $0xb0] sm:$0xff]  }
 0x133   : > { %1209 = vmatmul.mubr.bf16.gmra.mrb[52].mxu0 %v8444_v39  ;;  %6483 = vmatmul.mubr.bf16.gmra.mrb[52].mxu1 %v6937_v56  ;;  %v6943_v39 = vld [vmem:[%s8366_s21 + $0x48] sm:$0xff]   ;;  %v6976_v56 = vld [vmem:[%s8366_s21 + $0xc0] sm:$0xff]  }
 0x134   : > { %1218 = vmatprep.mubr.bf16.mxu0 %v8107_v0  ;;  %6486 = vmatprep.mubr.bf16.mxu1 %v6938_v57  ;;  %v6978_v57 = vld [vmem:[%s8366_s21 + $0xd0] sm:$0xff]  }
 0x13b   : > { %1219 = vmatmul.mubr.bf16.gmra.mrb[56].mxu0 %v8458_v50  ;;  %6487 = vmatmul.mubr.bf16.gmra.mrb[56].mxu1 %v6939_v58  ;;  %v7918_v50 = vld [vmem:[%s8359_s24] sm:$0xff]  }
 0x13c   : > { %1228 = vmatprep.mubr.bf16.mxu0 %v8107_v0  ;;  %6490 = vmatprep.mubr.bf16.mxu1 %v6940_v60  ;;  %v6983_v58 = vld [vmem:[%s8366_s21 + $0xe0] sm:$0xff]   ;;  %v6988_v60 = vld [vmem:[%s8366_s21 + $0xf0] sm:$0xff]  }
 0x143   : > { %1229 = vmatmul.mubr.bf16.gmra.mrb[60].mxu0 %v8481_v8  ;;  %6491 = vmatmul.mubr.bf16.gmra.mrb[60].mxu1 %v6941_v35  ;;  %v6958_v8 = vld [vmem:[#allocation9 + $0x34] ss:$12 sps:$4 sm:$0xff]  }
 0x144   : > { %1271 = vmatprep.mubr.bf16.mxu0 %v8107_v0  ;;  %6494 = vmatprep.mubr.bf16.mxu1 %v6942_v63  ;;  %v6989_v63 = vld [vmem:[%s8366_s21 + $0xf8] sm:$0xff]  }
 0x14b   : > { %1272 = vmatmul.mubr.bf16.vlgmr.msra.gmra.mrb[64].mxu0 %v7918_v50  ;;  %6495 = vmatmul.mubr.bf16.gmra.mrb[64].mxu1 %v6943_v39  ;;  %v6990_v39 = vld [vmem:[%s8366_s21 + $0x100] sm:$0xff]  }
 0x14c   : > { %1689 = vmatpush1.bf16.msra.mxu0 %v6944_v1  ;;  %1281 = vmatprep.mubr.bf16.mxu0 %v8107_v0 }
 0x14d   : > { %6498 = vmatprep.mubr.bf16.mxu1 %v6947_v2  ;;  %1690 = vmatprep.subr.bf16.mxu0 %v6951_v3  ;;  %v6991_v3 = vld [vmem:[%s8366_s21 + $0x108] sm:$0xff]  }
 0x150   : > { %1691 = vmatpush1.bf16.msra.mxu0 %v6949_v4  ;;  %v6992_v4 = vld [vmem:[%s8366_s21 + $0x110] sm:$0xff]  }
 0x151   : > { %1692 = vmatprep.subr.bf16.mxu0 %v6958_v8 }
 0x153   : > { %1282 = vmatmul.mubr.bf16.gmra.mrb[68].mxu0 %v7919_v26  ;;  %6499 = vmatmul.mubr.bf16.gmra.mrb[68].mxu1 %v6948_v5 }
 0x154   : > { %1291 = vmatprep.mubr.bf16.mxu0 %v8107_v0  ;;  %6502 = vmatprep.mubr.bf16.mxu1 %v6952_v9  ;;  %v6993_v9 = vld [vmem:[%s8366_s21 + $0x118] sm:$0xff]  }
 0x155   : > { %1693 = vmatpush1.bf16.msra.mxu0 %v6956_v10 }
 0x156   : > { %1694 = vmatprep.subr.bf16.mxu0 %v6963_v11  ;;  %v6994_v11 = vld [vmem:[%s8366_s21 + $0x120] sm:$0xff]  }
 0x159   : > { %1695 = vmatpush1.bf16.msra.mxu0 %v6961_v13 }
 0x15a   : > { %1696 = vmatprep.subr.bf16.mxu0 %v6970_v16  ;;  %v6995_v16 = vld [vmem:[%s8366_s21 + $0x128] sm:$0xff]  }
 0x15b   : > { %1292 = vmatmul.mubr.bf16.gmra.mrb[72].mxu0 %v7920_v23  ;;  %6503 = vmatmul.mubr.bf16.gmra.mrb[72].mxu1 %v6953_v17  ;;  %v6997_v23 = vld [vmem:[%s8366_s21 + $0x138] sm:$0xff]  }
 0x15c   : > { %1301 = vmatprep.mubr.bf16.mxu0 %v8107_v0  ;;  %6506 = vmatprep.mubr.bf16.mxu1 %v6954_v28  ;;  %v6996_v28 = vld [vmem:[%s8366_s21 + $0x130] sm:$0xff]  }
 0x15d   : > { %1697 = vmatpush1.bf16.msra.mxu0 %v6968_v19 }
 0x15e   : > { %1698 = vmatprep.subr.bf16.mxu0 %v6975_v21 }
 0x161   : > { %1699 = vmatpush1.bf16.msra.mxu0 %v6973_v27 }
 0x162   : > { %1700 = vmatprep.subr.bf16.mxu0 %v6982_v29  ;;  %v6998_v29 = vld [vmem:[%s8366_s21 + $0x140] sm:$0xff]  }
 0x163   : > { %1302 = vmatmul.mubr.bf16.gmra.mrb[76].mxu0 %v7921_v42  ;;  %6507 = vmatmul.mubr.bf16.gmra.mrb[76].mxu1 %v6955_v31  ;;  %v7000_v42 = vld [vmem:[%s8366_s21 + $0x150] sm:$0xff]  }
 0x164   : > { %1311 = vmatprep.mubr.bf16.mxu0 %v8107_v0  ;;  %6510 = vmatprep.mubr.bf16.mxu1 %v6959_v18 }
 0x165   : > { %1701 = vmatpush1.bf16.msra.mxu0 %v6980_v37  ;;  %v6999_v37 = vld [vmem:[%s8366_s21 + $0x148] sm:$0xff]  }
 0x166   : > { %1702 = vmatprep.subr.bf16.mxu0 %v6987_v41 }
 0x169   : > { %1703 = vmatpush1.bf16.msra.mxu0 %v6985_v44 }
 0x16b   : > { %1312 = vmatmul.mubr.bf16.gmra.mrb[80].mxu0 %v8509_v49  ;;  %6511 = vmatmul.mubr.bf16.gmra.mrb[80].mxu1 %v6960_v46  ;;  %v6972_v49 = vld [vmem:[%s8366_s21 + $0xb8] sm:$0xff]  }
 0x16c   : > { %1321 = vmatprep.mubr.bf16.mxu0 %v8107_v0  ;;  %6514 = vmatprep.mubr.bf16.mxu1 %v6964_v30  ;;  %v7001_v30 = vld [vmem:[%s8366_s21 + $0x158] sm:$0xff]  }
 0x173   : > { %1322 = vmatmul.mubr.bf16.gmra.mrb[84].mxu0 %v8539_v25  ;;  %6515 = vmatmul.mubr.bf16.gmra.mrb[84].mxu1 %v6965_v47  ;;  %v6977_v25 = vld [vmem:[%s8366_s21 + $0xc8] sm:$0xff]  }
 0x174   : > { %1331 = vmatprep.mubr.bf16.mxu0 %v8107_v0  ;;  %6518 = vmatprep.mubr.bf16.mxu1 %v6966_v32  ;;  %v7002_v32 = vld [vmem:[%s8366_s21 + $0x160] sm:$0xff]  }
 0x17b   : > { %1332 = vmatmul.mubr.bf16.gmra.mrb[88].mxu0 %v8568_v62  ;;  %6519 = vmatmul.mubr.bf16.gmra.mrb[88].mxu1 %v6967_v53  ;;  %v6979_v62 = vld [vmem:[%s8366_s21 + $0xd8] sm:$0xff]  }
 0x17c   : > { %1341 = vmatprep.mubr.bf16.mxu0 %v8107_v0  ;;  %6522 = vmatprep.mubr.bf16.mxu1 %v6971_v54 }
 0x183   : > { %1342 = vmatmul.mubr.bf16.gmra.mrb[92].mxu0 %v8594_v20  ;;  %6523 = vmatmul.mubr.bf16.gmra.mrb[92].mxu1 %v6972_v49  ;;  %v6984_v20 = vld [vmem:[%s8366_s21 + $0xe8] sm:$0xff]  }
 0x184   : > { %1351 = vmatprep.mubr.bf16.mxu0 %v8107_v0  ;;  %6526 = vmatprep.mubr.bf16.mxu1 %v6976_v56  ;;  %v7003_v49 = vld [vmem:[%s8366_s21 + $0x168] sm:$0xff]  }
 0x18b   : > { %1352 = vmatmul.mubr.bf16.gmra.mrb[96].mxu0 %v8622_v15  ;;  %6527 = vmatmul.mubr.bf16.gmra.mrb[96].mxu1 %v6977_v25  ;;  %v7004_v25 = vld [vmem:[%s8366_s21 + $0x170] sm:$0xff]  }
 0x18c   : > { %1361 = vmatprep.mubr.bf16.mxu0 %v8107_v0  ;;  %6530 = vmatprep.mubr.bf16.mxu1 %v6978_v57 }
 0x193   : > { %1362 = vmatmul.mubr.bf16.gmra.mrb[100].mxu0 %v8649_v61  ;;  %6531 = vmatmul.mubr.bf16.gmra.mrb[100].mxu1 %v6979_v62 }
 0x194   : > { %1371 = vmatprep.mubr.bf16.mxu0 %v8107_v0  ;;  %6534 = vmatprep.mubr.bf16.mxu1 %v6983_v58 }
 0x19b   : > { %1372 = vmatmul.mubr.bf16.gmra.mrb[104].mxu0 %v8671_v38  ;;  %6535 = vmatmul.mubr.bf16.gmra.mrb[104].mxu1 %v6984_v20  ;;  %v7005_v20 = vld [vmem:[%s8366_s21 + $0x178] sm:$0xff]  }
 0x19c   : > { %1381 = vmatprep.mubr.bf16.mxu0 %v8107_v0  ;;  %6538 = vmatprep.mubr.bf16.mxu1 %v6988_v60 }
 0x19e   : > { %v8752_v15 = vpop.f32.mrb[0].mxu1 }
 0x19f   : > { %v8754_v35 = vpop.f32.mrb[1].mxu1 }
 0x1a0   : > { %v8757_v61 = vpop.f32.mrb[2].mxu1 }
 0x1a1   : > { %v8760_v1 = vpop.f32.mrb[3].mxu1 }
 0x1a3   : > { %1382 = vmatmul.mubr.bf16.gmra.mrb[108].mxu0 %v8684_v48  ;;  %6539 = vmatmul.mubr.bf16.gmra.mrb[108].mxu1 %v6989_v63  ;;  %v7006_v63 = vld [vmem:[%s8366_s21 + $0x180] sm:$0xff]  }
 0x1a4   : > { %1720 = vmatprep.mubr.bf16.mxu0 %v8107_v0  ;;  %6542 = vmatprep.mubr.bf16.mxu1 %v6990_v39 }
 0x1a6   : > { %v8764_v38 = vpop.f32.mrb[4].mxu1 }
 0x1a7   : > { %v8766_v2 = vpop.f32.mrb[5].mxu1 }
 0x1a8   : > { %v8769_v50 = vpop.f32.mrb[6].mxu1 }
 0x1a9   : > { %v8772_v8 = vpop.f32.mrb[7].mxu1 }
 0x1ab   : > { %1721 = vmatmul.mubr.bf16.vlgmr.msra.gmra.mrb[0].mxu0 %v8496_v34  ;;  %6543 = vmatmul.mubr.bf16.gmra.mrb[112].mxu1 %v6991_v3 }
 0x1ac   : > { %1730 = vmatprep.mubr.bf16.mxu0 %v8107_v0  ;;  %6546 = vmatprep.mubr.bf16.mxu1 %v6992_v4 }
 0x1ae   : > { %v8776_v48 = vpop.f32.mrb[8].mxu1 }
 0x1af   : > { %v8778_v5 = vpop.f32.mrb[9].mxu1 }
 0x1b0   : > { %v8781_v10 = vpop.f32.mrb[10].mxu1 }
 0x1b1   : > { %v8784_v26 = vpop.f32.mrb[11].mxu1 }
 0x1b3   : > { %1731 = vmatmul.mubr.bf16.gmra.mrb[4].mxu0 %v8516_v59  ;;  %6547 = vmatmul.mubr.bf16.gmra.mrb[116].mxu1 %v6993_v9  ;;  %v8868_v9 = vld [vmem:[%s11135_s6] sm:$0xf] }
 0x1b4   : > { %1740 = vmatprep.mubr.bf16.mxu0 %v8107_v0  ;;  %6550 = vmatprep.mubr.bf16.mxu1 %v6994_v11 }
 0x1b6   : > { %v8788_v34 = vpop.f32.mrb[12].mxu1 }
 0x1b7   : > { %v8790_v13 = vpop.f32.mrb[13].mxu1 }
 0x1b8   : > { %v8793_v17 = vpop.f32.mrb[14].mxu1 }
 0x1b9   : > { %v8796_v19 = vpop.f32.mrb[15].mxu1 }
 0x1bb   : > { %1741 = vmatmul.mubr.bf16.gmra.mrb[8].mxu0 %v8526_v24  ;;  %6551 = vmatmul.mubr.bf16.gmra.mrb[120].mxu1 %v6995_v16  ;;  %v7007_v16 = vld [vmem:[%s8366_s21 + $0x188] sm:$0xff]  }
 0x1bc   : > { %1750 = vmatprep.mubr.bf16.mxu0 %v8107_v0  ;;  %6554 = vmatprep.mubr.bf16.mxu1 %v6996_v28 }
 0x1be   : > { %v8800_v59 = vpop.f32.mrb[16].mxu1 }
 0x1bf   : > { %v8802_v21 = vpop.f32.mrb[17].mxu1 }
 0x1c0   : > { %v8805_v27 = vpop.f32.mrb[18].mxu1 }
 0x1c1   : > { %v8808_v31 = vpop.f32.mrb[19].mxu1 }
 0x1c3   : > { %1751 = vmatmul.mubr.bf16.gmra.mrb[12].mxu0 %v8546_v36  ;;  %6555 = vmatmul.mubr.bf16.gmra.mrb[124].mxu1 %v6997_v23 }
 0x1c4   : > { %1760 = vmatprep.mubr.bf16.mxu0 %v8107_v0  ;;  %6558 = vmatprep.mubr.bf16.mxu1 %v6998_v29 }
 0x1c6   : > { %v8812_v24 = vpop.f32.mrb[20].mxu1 }
 0x1c7   : > { %v8814_v18 = vpop.f32.mrb[21].mxu1 }
 0x1c8   : > { %v8817_v41 = vpop.f32.mrb[22].mxu1 }
 0x1c9   : > { %v8820_v44 = vpop.f32.mrb[23].mxu1 }
 0x1cb   : > { %1761 = vmatmul.mubr.bf16.gmra.mrb[16].mxu0 %v8554_v43  ;;  %6559 = vmatmul.mubr.bf16.gmra.mrb[128].mxu1 %v6999_v37 }
 0x1cc   : > { %1770 = vmatprep.mubr.bf16.mxu0 %v8107_v0  ;;  %6562 = vmatprep.mubr.bf16.mxu1 %v7000_v42 }
 0x1ce   : > { %v8824_v36 = vpop.f32.mrb[24].mxu1 }
 0x1cf   : > { %v8826_v46 = vpop.f32.mrb[25].mxu1 }
 0x1d0   : > { %v8829_v47 = vpop.f32.mrb[26].mxu1 }
 0x1d1   : > { %v8832_v53 = vpop.f32.mrb[27].mxu1 }
 0x1d3   : > { %1771 = vmatmul.mubr.bf16.gmra.mrb[20].mxu0 %v8575_v7  ;;  %6563 = vmatmul.mubr.bf16.gmra.mrb[132].mxu1 %v7001_v30  ;;  %v770_v7 = vlaneseq }
 0x1d4   : > { %1780 = vmatprep.mubr.bf16.mxu0 %v8107_v0  ;;  %6566 = vmatprep.mubr.bf16.mxu1 %v7002_v32 }
 0x1d5   : > { %v8858_v3 = vshrl.u32 %v770_v7, 7  ;;  %v7009_v7 = vld [vmem:[%s8366_s21 + $0x198] sm:$0xff]  }
 0x1d6   : > { %v8836_v43 = vpop.f32.mrb[28].mxu1 }
 0x1d7   : > { %v8838_v54 = vpop.f32.mrb[29].mxu1  ;;  %11219 = vst [vmem:[#allocation27_spill] sm:$0xff] %v8858_v3 }
 0x1d8   : > { %v8841_v56 = vpop.f32.mrb[30].mxu1 }
 0x1d9   : > { %v8844_v57 = vpop.f32.mrb[31].mxu1 }
 0x1db   : > { %1781 = vmatmul.mubr.bf16.gmra.mrb[24].mxu0 %v8581_v14  ;;  %6567 = vmatmul.mubr.bf16.gmra.mrb[136].mxu1 %v7003_v49  ;;  %v780_v14 = vsub.s32 2, %v8858_v3 }
 0x1dc   : > { %1790 = vmatprep.mubr.bf16.mxu0 %v8107_v0  ;;  %6570 = vmatprep.mubr.bf16.mxu1 %v7004_v25 }
 0x1dd   : > { %v8879_v29 = vrot.slane %v8868_v9, %v780_v14  ;;  %v7010_v14 = vld [vmem:[%s8366_s21 + $0x1a0] sm:$0xff]  }
 0x1de   : > { %v8848_v62 = vpop.f32.mrb[32].mxu1 }
 0x1df   : > { %11215 = vst [vmem:[#allocation23_spill] sm:$0xff] %v8848_v62  ;;  %v8850_v58 = vpop.f32.mrb[33].mxu1  ;;  %v1404_v37 = vadd.f32 %v8764_v38, %v8879_v29  ;;  %v1394_v42 = vadd.f32 %v8752_v15, %v8879_v29  ;;  %v1408_v32 = vadd.f32 %v8769_v50, %v8879_v29  ;;  %v1414_v50 = vadd.f32 %v8776_v48, %v8879_v29 }
 0x1e0   : > { %11216 = vst [vmem:[#allocation24_spill] sm:$0xff] %v8850_v58  ;;  %v8853_v60 = vpop.f32.mrb[34].mxu1  ;;  %v7021_v58 = vld [vmem:[%s8366_s21 + $0x1f8] sm:$0xff]  }
 0x1e1   : > { %11217 = vst [vmem:[#allocation25_spill] sm:$0xff] %v8853_v60  ;;  %v8856_v39 = vpop.f32.mrb[35].mxu1 }
 0x1e2   : > { %11218 = vst [vmem:[#allocation26_spill] sm:$0xff] %v8856_v39 }
 0x1e3   : > { %1791 = vmatmul.mubr.bf16.gmra.mrb[28].mxu0 %v8603_v51  ;;  %6571 = vmatmul.mubr.bf16.gmra.mrb[140].mxu1 %v7005_v20  ;;  %v7008_v51 = vld [vmem:[%s8366_s21 + $0x190] sm:$0xff]  }
 0x1e4   : > { %1800 = vmatprep.mubr.bf16.mxu0 %v8107_v0  ;;  %6574 = vmatprep.mubr.bf16.mxu1 %v7006_v63 }
 0x1e6   : > { %v8863_v4 = vpop.f32.mrb[36].mxu1 }
 0x1e7   : > { %11220 = vst [vmem:[#allocation28_spill] sm:$0xff] %v8863_v4  ;;  %v8870_v11 = vpop.f32.mrb[37].mxu1  ;;  %v7020_v4 = vld [vmem:[%s8366_s21 + $0x1f0] sm:$0xff]  }
 0x1e8   : > { %11221 = vst [vmem:[#allocation29_spill] sm:$0xff] %v8870_v11  ;;  %v8873_v28 = vpop.f32.mrb[38].mxu1  ;;  %v784_v11 = vsub.s32 3, %v8858_v3 }
 0x1e9   : > { %11222 = vst [vmem:[#allocation30_spill] sm:$0xff] %v8873_v28  ;;  %v8876_v23 = vpop.f32.mrb[39].mxu1 }
 0x1ea   : > { %11223 = vst [vmem:[#allocation31_spill] sm:$0xff] %v8876_v23 }
 0x1eb   : > { %1801 = vmatmul.mubr.bf16.gmra.mrb[32].mxu0 %v8608_v55  ;;  %6575 = vmatmul.mubr.bf16.gmra.mrb[144].mxu1 %v7007_v16  ;;  %v1398_v55 = vadd.f32 %v8757_v61, %v8879_v29  ;;  %v1424_v61 = vadd.f32 %v8788_v34, %v8879_v29  ;;  %v7012_v34 = vld [vmem:[%s8366_s21 + $0x1b0] sm:$0xff]  }
 0x1ec   : > { %1810 = vmatprep.mubr.bf16.mxu0 %v8107_v0  ;;  %6578 = vmatprep.mubr.bf16.mxu1 %v7008_v51 }
 0x1ee   : > { %v6456_v30 = vpop.f32.mrb[40].mxu1 }
 0x1ef   : > { %v8889_v49 = vadd.f32 %v6456_v30, %v1404_v37  ;;  %v2011_v25 = vpop.f32.mrb[41].mxu1  ;;  %v1428_v37 = vadd.f32 %v8793_v17, %v8879_v29 }
 0x1f0   : > { %v8894_v20 = vadd.f32 %v2011_v25, %v1394_v42  ;;  %v6457_v63 = vpop.f32.mrb[42].mxu1 }
 0x1f1   : > { %v8897_v38 = vadd.f32 %v6457_v63, %v1408_v32  ;;  %v2014_v16 = vpop.f32.mrb[43].mxu1  ;;  %v7011_v32 = vld [vmem:[%s8366_s21 + $0x1a8] sm:$0xff]   ;;  %7022 = vtanh.f32 %v8889_v49 }
 0x1f2   : > { %v8899_v15 = vadd.f32 %v2014_v16, %v1398_v55  ;;  %7024 = vtanh.f32 %v8894_v20 }
 0x1f3   : > { %1811 = vmatmul.mubr.bf16.gmra.mrb[36].mxu0 %v8632_v33  ;;  %6579 = vmatmul.mubr.bf16.gmra.mrb[148].mxu1 %v7009_v7  ;;  %v1418_v33 = vadd.f32 %v8781_v10, %v8879_v29 }
 0x1f4   : > { %1820 = vmatprep.mubr.bf16.mxu0 %v8107_v0  ;;  %6582 = vmatprep.mubr.bf16.mxu1 %v7010_v14  ;;  %v7013_v14 = vld [vmem:[%s8366_s21 + $0x1b8] sm:$0xff]  }
 0x1f6   : > { %v6460_v51 = vpop.f32.mrb[44].mxu1 }
 0x1f7   : > { %v8909_v42 = vadd.f32 %v6460_v51, %v1424_v61  ;;  %v2027_v30 = vpop.f32.mrb[45].mxu1  ;;  %v7014_v61 = vld [vmem:[%s8366_s21 + $0x1c0] sm:$0xff]  }
 0x1f8   : > { %v8914_v25 = vadd.f32 %v2027_v30, %v1414_v50  ;;  %v6461_v7 = vpop.f32.mrb[46].mxu1 }
 0x1f9   : > { %v8917_v55 = vadd.f32 %v6461_v7, %v1428_v37  ;;  %v2030_v48 = vpop.f32.mrb[47].mxu1  ;;  %v7015_v37 = vld [vmem:[%s8366_s21 + $0x1c8] sm:$0xff]  }
 0x1fa   : > { %v8919_v63 = vadd.f32 %v2030_v48, %v1418_v33 }
 0x1fb   : > { %1821 = vmatmul.mubr.bf16.gmra.mrb[40].mxu0 %v8637_v22  ;;  %6583 = vmatmul.mubr.bf16.gmra.mrb[152].mxu1 %v7011_v32  ;;  %v7016_v32 = vld [vmem:[%s8366_s21 + $0x1d0] sm:$0xff]  }
 0x1fc   : > { %1830 = vmatprep.mubr.bf16.mxu0 %v8107_v0  ;;  %6586 = vmatprep.mubr.bf16.mxu1 %v7012_v34  ;;  %v7017_v34 = vld [vmem:[%s8366_s21 + $0x1d8] sm:$0xff]  }
 0x1fe   : > { %v8923_v17 = vpop.f32.mrb[48].mxu1 }
 0x1ff   : > { %v3164_v10 = vpop.f32.mrb[49].mxu1 }
 0x200   : > { %v8926_v16 = vpop.f32.mrb[50].mxu1 }
 0x201   : > { %v3167_v50 = vpop.f32.mrb[51].mxu1 }
 0x203   : > { %1831 = vmatmul.mubr.bf16.gmra.mrb[44].mxu0 %v8656_v6  ;;  %6587 = vmatmul.mubr.bf16.gmra.mrb[156].mxu1 %v7013_v14  ;;  %v7018_v14 = vld [vmem:[%s8366_s21 + $0x1e0] sm:$0xff]  }
 0x204   : > { %1840 = vmatprep.mubr.bf16.mxu0 %v8107_v0  ;;  %6590 = vmatprep.mubr.bf16.mxu1 %v7014_v61 }
 0x206   : > { %v8931_v22 = vpop.f32.mrb[52].mxu1 }
 0x207   : > { %v8933_v51 = vpop.f32.mrb[53].mxu1 }
 0x208   : > { %v8936_v30 = vpop.f32.mrb[54].mxu1 }
 0x209   : > { %v8939_v33 = vpop.f32.mrb[55].mxu1 }
 0x20b   : > { %1841 = vmatmul.mubr.bf16.gmra.mrb[48].mxu0 %v8660_v12  ;;  %6591 = vmatmul.mubr.bf16.gmra.mrb[160].mxu1 %v7015_v37 }
 0x20c   : > { %1850 = vmatprep.mubr.bf16.mxu0 %v8107_v0  ;;  %6594 = vmatprep.mubr.bf16.mxu1 %v7016_v32  ;;  %v7019_v32 = vld [vmem:[%s8366_s21 + $0x1e8] sm:$0xff]  }
 0x20e   : > { %v8943_v6 = vpop.f32.mrb[56].mxu1 }
 0x20f   : > { %v8945_v7 = vpop.f32.mrb[57].mxu1 }
 0x210   : > { %v8948_v48 = vpop.f32.mrb[58].mxu1 }
 0x211   : > { %v8951_v61 = vpop.f32.mrb[59].mxu1 }
 0x213   : > { %1851 = vmatmul.mubr.bf16.gmra.mrb[52].mxu0 %v8673_v40  ;;  %6595 = vmatmul.mubr.bf16.gmra.mrb[164].mxu1 %v7017_v34  ;;  %v8969_v40 = vrot.slane %v8868_v9, %v784_v11 }
 0x214   : > { %1860 = vmatprep.mubr.bf16.mxu0 %v8107_v0  ;;  %6598 = vmatprep.mubr.bf16.mxu1 %v7018_v14 }
 0x215   : > { %v9026_v49 = vadd.f32 %v8766_v2, %v8969_v40 }
 0x216   : > { %v8955_v12 = vpop.f32.mrb[60].mxu1 }
 0x217   : > { %v8957_v37 = vpop.f32.mrb[61].mxu1  ;;  %11234 = vst [vmem:[#allocation42_spill] sm:$0xff] %v9026_v49 }
 0x218   : > { %v8960_v28 = vpop.f32.mrb[62].mxu1 }
 0x219   : > { %11224 = vst [vmem:[#allocation32_spill] sm:$0xff] %v8960_v28  ;;  %v8963_v23 = vpop.f32.mrb[63].mxu1 }
 0x21b   : > { %1861 = vmatmul.mubr.bf16.gmra.mrb[56].mxu0 %v8676_v45  ;;  %6599 = vmatmul.mubr.bf16.gmra.mrb[168].mxu1 %v7019_v32 }
 0x21c   : > { %1870 = vmatprep.mubr.bf16.mxu0 %v8107_v0  ;;  %6602 = vmatprep.mubr.bf16.mxu1 %v7020_v4 }
 0x21e   : > { %v1273_v34 = vpop.f32.mrb[64].mxu0  ;;  %v8971_v14 = vpop.f32.mrb[64].mxu1 }
 0x21f   : > { %11225 = vst [vmem:[#allocation33_spill] sm:$0xff] %v8971_v14  ;;  %v1274_v60 = vadd.f32 %v1273_v34, %v8879_v29  ;;  %v1275_v62 = vpop.f32.mrb[65].mxu0  ;;  %v8974_v39 = vpop.f32.mrb[65].mxu1 }
 0x220   : > { %11226 = vst [vmem:[#allocation34_spill] sm:$0xff] %v8974_v39  ;;  %v8978_v3 = vadd.f32 %v1275_v62, %v8969_v40  ;;  %v1277_v45 = vpop.f32.mrb[66].mxu0  ;;  %v8980_v32 = vpop.f32.mrb[66].mxu1 }
 0x221   : > { %11228 = vst [vmem:[#allocation36_spill] sm:$0xff] %v8980_v32  ;;  %v8983_v0 = vadd.f32 %v8802_v21, %v1274_v60  ;;  %v1278_v4 = vadd.f32 %v1277_v45, %v8879_v29  ;;  %v1279_v9 = vpop.f32.mrb[67].mxu0  ;;  %v8986_v11 = vpop.f32.mrb[67].mxu1 }
 0x222   : > { %11227 = vst [vmem:[#allocation35_spill] sm:$0xff] %v8978_v3  ;;  %11229 = vst [vmem:[#allocation37_spill] sm:$0xff] %v8986_v11  ;;  %v3675_v34 = vadd.f32 %v3164_v10, %v8978_v3  ;;  %v8990_v14 = vadd.f32 %v1279_v9, %v8969_v40 }
 0x223   : > { %v8993_v39 = vadd.f32 %v8808_v31, %v1278_v4  ;;  %1871 = vmatmul.mubr.bf16.gmra.mrb[60].mxu0 %v8686_v52  ;;  %6603 = vmatmul.mubr.bf16.gmra.mrb[172].mxu1 %v7021_v58 }
 0x224   : > { %11230 = vst [vmem:[#allocation38_spill] sm:$0xff] %v8990_v14  ;;  %v3676_v62 = vadd.f32 %v3167_v50, %v8990_v14  ;;  %v5769_v45 = vmul.f32 -1.442695, %v3675_v34 }
 0x226   : > { %v1283_v21 = vpop.f32.mrb[68].mxu0  ;;  %v8997_v60 = vpop.f32.mrb[68].mxu1  ;;  %7026 = vpow2.f32 %v5769_v45 }
 0x227   : > { %v1284_v32 = vadd.f32 %v1283_v21, %v8879_v29  ;;  %v1285_v11 = vpop.f32.mrb[69].mxu0  ;;  %v9000_v28 = vpop.f32.mrb[69].mxu1  ;;  %v5770_v21 = vmul.f32 -1.442695, %v3676_v62  ;;  %7028 = vtanh.f32 %v8897_v38 }
 0x228   : > { %v9003_v10 = vadd.f32 %v1285_v11, %v8969_v40  ;;  %v1287_v9 = vpop.f32.mrb[70].mxu0  ;;  %v9005_v31 = vpop.f32.mrb[70].mxu1  ;;  %7030 = vtanh.f32 %v8899_v15  ;;  %v9038_v15 = vadd.f32 %v8772_v8, %v8969_v40 }
 0x229   : > { %11232 = vst [vmem:[#allocation40_spill] sm:$0xff] %v9005_v31  ;;  %v2050_v52 = vadd.f32 %v8800_v59, %v1284_v32  ;;  %v1288_v58 = vadd.f32 %v1287_v9, %v8879_v29  ;;  %v1289_v50 = vpop.f32.mrb[71].mxu0  ;;  %v9010_v4 = vpop.f32.mrb[71].mxu1  ;;  %7032 = vtanh.f32 %v8909_v42 }
 0x22a   : > { %11231 = vst [vmem:[#allocation39_spill] sm:$0xff] %v9003_v10  ;;  %v3677_v34 = vadd.f32 %v8923_v17, %v9003_v10  ;;  %v9016_v11 = vadd.f32 %v1289_v50, %v8969_v40  ;;  %v9031_v17 = vadd.f32 %v8754_v35, %v8969_v40  ;;  %7034 = vpow2.f32 %v5770_v21  ;;  %11236 = vst [vmem:[#allocation44_spill] sm:$0xff] %v9038_v15 }
 0x22b   : > { %v9019_v31 = vadd.f32 %v8805_v27, %v1288_v58  ;;  %7036 = vtanh.f32 %v8914_v25  ;;  %v9047_v50 = vadd.f32 %v8760_v1, %v8969_v40  ;;  %v9060_v1 = vpop.eup %7022 }
 0x22c   : > { %11233 = vst [vmem:[#allocation41_spill] sm:$0xff] %v9016_v11  ;;  %v3678_v59 = vadd.f32 %v8926_v16, %v9016_v11  ;;  %v5771_v20 = vmul.f32 -1.442695, %v3677_v34  ;;  %11235 = vst [vmem:[#allocation43_spill] sm:$0xff] %v9031_v17 }
 0x22d   : > { %11238 = vst [vmem:[#allocation46_spill] sm:$0xff] %v9047_v50  ;;  %11240 = vst [vmem:[#allocation48_spill] sm:$0xff] %v9060_v1 }
 0x22e   : > { %v1293_v27 = vpop.f32.mrb[72].mxu0  ;;  %v6504_v32 = vpop.f32.mrb[72].mxu1  ;;  %v5772_v38 = vmul.f32 -1.442695, %v3678_v59  ;;  %7038 = vpow2.f32 %v5771_v20 }
 0x22f   : > { %v1294_v62 = vadd.f32 %v1293_v27, %v8879_v29  ;;  %v3701_v16 = vadd.f32 %v6504_v32, %v9026_v49  ;;  %v1295_v45 = vpop.f32.mrb[73].mxu0  ;;  %v3260_v2 = vpop.f32.mrb[73].mxu1  ;;  %7040 = vtanh.f32 %v8917_v55 }
 0x230   : > { %v9042_v35 = vadd.f32 %v1295_v45, %v8969_v40  ;;  %v3699_v42 = vadd.f32 %v3260_v2, %v9031_v17  ;;  %v1297_v9 = vpop.f32.mrb[74].mxu0  ;;  %v6505_v58 = vpop.f32.mrb[74].mxu1  ;;  %7042 = vpow2.f32 %v5772_v38  ;;  %v9073_v2 = vadd.f32 %v8790_v13, %v8969_v40 }
 0x231   : > { %v9050_v34 = vadd.f32 %v8814_v18, %v1294_v62  ;;  %v1298_v8 = vadd.f32 %v1297_v9, %v8879_v29  ;;  %v1299_v21 = vpop.f32.mrb[75].mxu0  ;;  %v3263_v59 = vpop.f32.mrb[75].mxu1  ;;  %v3702_v27 = vadd.f32 %v6505_v58, %v9038_v15  ;;  %7044 = vtanh.f32 %v8919_v63 }
 0x232   : > { %11237 = vst [vmem:[#allocation45_spill] sm:$0xff] %v9042_v35  ;;  %v3679_v25 = vadd.f32 %v8933_v51, %v9042_v35  ;;  %v9058_v32 = vadd.f32 %v1299_v21, %v8969_v40  ;;  %v3700_v20 = vadd.f32 %v3263_v59, %v9047_v50  ;;  %v9066_v62 = vpop.eup %7024  ;;  %v5795_v55 = vmul.f32 -1.442695, %v3701_v16  ;;  %11242 = vst [vmem:[#allocation50_spill] sm:$0xff] %v9073_v2 }
 0x233   : > { %v9063_v18 = vadd.f32 %v8820_v44, %v1298_v8  ;;  %11241 = vst [vmem:[#allocation49_spill] sm:$0xff] %v9066_v62  ;;  %v7027_v45 = vpop.eup %7026  ;;  %7046 = vtanh.f32 %v8983_v0  ;;  %v9080_v44 = vadd.f32 %v8778_v5, %v8969_v40 }
 0x234   : > { %11239 = vst [vmem:[#allocation47_spill] sm:$0xff] %v9058_v32  ;;  %v3680_v51 = vadd.f32 %v8939_v33, %v9058_v32  ;;  %v9076_v38 = vpop.eup %7028  ;;  %7048 = vtanh.f32 %v8993_v39  ;;  %v5773_v63 = vmul.f32 -1.442695, %v3679_v25  ;;  %v5793_v33 = vmul.f32 -1.442695, %v3699_v42 }
 0x235   : > { %11243 = vst [vmem:[#allocation51_spill] sm:$0xff] %v9076_v38  ;;  %11244 = vst [vmem:[#allocation52_spill] sm:$0xff] %v9080_v44  ;;  %v9083_v58 = vpop.eup %7030  ;;  %7050 = vtanh.f32 %v2050_v52  ;;  %v3803_v38 = vadd.f32 1.0, %v7027_v45  ;;  %v9095_v52 = vadd.f32 %v8796_v19, %v8969_v40  ;;  %v5796_v42 = vmul.f32 -1.442695, %v3702_v27 }
 0x236   : > { %v1303_v16 = vpop.f32.mrb[76].mxu0  ;;  %v6508_v9 = vpop.f32.mrb[76].mxu1  ;;  %11245 = vst [vmem:[#allocation53_spill] sm:$0xff] %v9083_v58  ;;  %7052 = vpow2.f32 %v5795_v55 }
 0x237   : > { %v1304_v13 = vadd.f32 %v1303_v16, %v8879_v29  ;;  %v3705_v8 = vadd.f32 %v6508_v9, %v9073_v2  ;;  %v1305_v0 = vpop.f32.mrb[77].mxu0  ;;  %v3276_v21 = vpop.f32.mrb[77].mxu1  ;;  %11248 = vst [vmem:[#allocation56_spill] sm:$0xff] %v9095_v52  ;;  %7054 = vtanh.f32 %v9019_v31  ;;  %v5774_v31 = vmul.f32 -1.442695, %v3680_v51 }
 0x238   : > { %v9087_v59 = vpop.eup %7032  ;;  %v9090_v5 = vadd.f32 %v1305_v0, %v8969_v40  ;;  %v3703_v39 = vadd.f32 %v3276_v21, %v9080_v44  ;;  %v1307_v25 = vpop.f32.mrb[78].mxu0  ;;  %v9103_v0 = vadd.f32 %v8784_v26, %v8969_v40  ;;  %7056 = vpow2.f32 %v5773_v63 }
 0x239   : > { %11246 = vst [vmem:[#allocation54_spill] sm:$0xff] %v9087_v59  ;;  %v6509_v1 = vpop.f32.mrb[78].mxu1  ;;  %v7035_v58 = vpop.eup %7034  ;;  %v2062_v16 = vadd.f32 %v8812_v24, %v1304_v13  ;;  %v1308_v19 = vadd.f32 %v1307_v25, %v8879_v29  ;;  %7058 = vpow2.f32 %v5793_v33 }
 0x23a   : > { %11247 = vst [vmem:[#allocation55_spill] sm:$0xff] %v9090_v5  ;;  %v1309_v9 = vpop.f32.mrb[79].mxu0  ;;  %v3279_v45 = vpop.f32.mrb[79].mxu1  ;;  %11250 = vst [vmem:[#allocation58_spill] sm:$0xff] %v9103_v0  ;;  %v3681_v21 = vadd.f32 %v8931_v22, %v9090_v5  ;;  %v9109_v27 = vadd.f32 %v6509_v1, %v9095_v52  ;;  %7060 = vrcp.f32 %v3803_v38  ;;  %v3804_v26 = vadd.f32 1.0, %v7035_v58 }
 0x23b   : > { %v9099_v55 = vpop.eup %7036  ;;  %v9112_v24 = vadd.f32 %v1309_v9, %v8969_v40  ;;  %v9117_v63 = vadd.f32 %v8817_v41, %v1308_v19  ;;  %v9120_v22 = vadd.f32 %v3279_v45, %v9103_v0  ;;  %7062 = vpow2.f32 %v5796_v42 }
 0x23c   : > { %11249 = vst [vmem:[#allocation57_spill] sm:$0xff] %v9099_v55  ;;  %v7039_v59 = vpop.eup %7038  ;;  %7064 = vtanh.f32 %v9050_v34  ;;  %v5794_v41 = vmul.f32 -1.442695, %v3700_v20 }
 0x23d   : > { %11251 = vst [vmem:[#allocation59_spill] sm:$0xff] %v9112_v24  ;;  %v9114_v13 = vpop.eup %7040  ;;  %v9124_v51 = vadd.f32 %v8936_v30, %v9112_v24  ;;  %v3805_v33 = vadd.f32 1.0, %v7039_v59  ;;  %7066 = vpow2.f32 %v5774_v31 }
 0x23e   : > { %11252 = vst [vmem:[#allocation60_spill] sm:$0xff] %v9114_v13  ;;  %v7043_v25 = vpop.eup %7042  ;;  %v1313_v9 = vpop.f32.mrb[80].mxu0  ;;  %7068 = vrcp.f32 %v3804_v26  ;;  %v5799_v26 = vmul.f32 -1.442695, %v3705_v8 }
 0x23f   : > { %v9126_v1 = vpop.eup %7044  ;;  %v6512_v38 = vpop.f32.mrb[80].mxu1  ;;  %v1314_v45 = vadd.f32 %v1313_v9, %v8879_v29  ;;  %7070 = vtanh.f32 %v9063_v18 }
 0x240   : > { %11253 = vst [vmem:[#allocation61_spill] sm:$0xff] %v9126_v1  ;;  %v9129_v58 = vpop.eup %7046  ;;  %v9133_v19 = vadd.f32 %v6512_v38, %v9003_v10  ;;  %v1315_v42 = vpop.f32.mrb[81].mxu0  ;;  %v3806_v1 = vadd.f32 1.0, %v7043_v25  ;;  %7072 = vrcp.f32 %v3805_v33 }
 0x241   : > { %11254 = vst [vmem:[#allocation62_spill] sm:$0xff] %v9129_v58  ;;  %v3292_v13 = vpop.f32.mrb[81].mxu1  ;;  %v9135_v30 = vpop.eup %7048  ;;  %v9138_v59 = vadd.f32 %v1315_v42, %v8969_v40  ;;  %v9147_v9 = vadd.f32 %v8826_v46, %v1314_v45  ;;  %7074 = vpow2.f32 %v5794_v41  ;;  %v5775_v42 = vmul.f32 -1.442695, %v3681_v21 }
 0x242   : > { %11255 = vst [vmem:[#allocation63_spill] sm:$0xff] %v9135_v30  ;;  %v9141_v34 = vadd.f32 %v3292_v13, %v8978_v3  ;;  %v1317_v55 = vpop.f32.mrb[82].mxu0  ;;  %v6513_v31 = vpop.f32.mrb[82].mxu1  ;;  %7076 = vrcp.f32 %v3806_v1  ;;  %v5797_v45 = vmul.f32 -1.442695, %v3703_v39 }
 0x243   : > { %11256 = vst [vmem:[#allocation64_spill] sm:$0xff] %v9138_v59  ;;  %v9143_v20 = vpop.eup %7050  ;;  %v1319_v38 = vpop.f32.mrb[83].mxu0  ;;  %v9151_v25 = vadd.f32 %v8945_v7, %v9138_v59  ;;  %v9157_v18 = vadd.f32 %v6513_v31, %v9016_v11  ;;  %7078 = vtanh.f32 %v2062_v16 }
 0x244   : > { %11257 = vst [vmem:[#allocation65_spill] sm:$0xff] %v9143_v20  ;;  %v3295_v62 = vpop.f32.mrb[83].mxu1  ;;  %v7053_v30 = vpop.eup %7052  ;;  %v1318_v20 = vadd.f32 %v1317_v55, %v8879_v29  ;;  %v9160_v58 = vadd.f32 %v1319_v38, %v8969_v40  ;;  %7080 = vpow2.f32 %v5799_v26 }
 0x245   : > { %v9153_v13 = vpop.eup %7054  ;;  %v9163_v8 = vadd.f32 %v3295_v62, %v8990_v14  ;;  %v3829_v33 = vadd.f32 1.0, %v7053_v30  ;;  %7082 = vpow2.f32 %v5775_v42  ;;  %v5804_v0 = vmul.f32 -1.442695, %v9157_v18  ;;  %v9270_v18 = vld [vmem:[%s8372_s12 + $0x18] sm:$0xff]  }
 0x246   : > { %11258 = vst [vmem:[#allocation66_spill] sm:$0xff] %v9153_v13  ;;  %v7057_v46 = vpop.eup %7056  ;;  %11259 = vst [vmem:[#allocation67_spill] sm:$0xff] %v9160_v58  ;;  %v9166_v41 = vadd.f32 %v8832_v53, %v1318_v20  ;;  %v9172_v55 = vadd.f32 %v8951_v61, %v9160_v58  ;;  %v1323_v39 = vpop.f32.mrb[84].mxu0  ;;  %7084 = vpow2.f32 %v5797_v45 }
 0x247   : > { %v7059_v7 = vpop.eup %7058  ;;  %v6516_v1 = vpop.f32.mrb[84].mxu1  ;;  %v3807_v38 = vadd.f32 1.0, %v7057_v46  ;;  %v1324_v62 = vadd.f32 %v1323_v39, %v8879_v29  ;;  %7086 = vrcp.f32 %v3829_v33  ;;  %v9184_v46 = vld [vmem:[%s8372_s12] sm:$0xff]  }
 0x248   : > { %v9168_v21 = vpop.eup %7060  ;;  %v9176_v16 = vadd.f32 %v6516_v1, %v9090_v5  ;;  %v1325_v53 = vpop.f32.mrb[85].mxu0  ;;  %v3827_v26 = vadd.f32 1.0, %v7059_v7 }
 0x249   : > { %v7063_v31 = vpop.eup %7062  ;;  %v3308_v30 = vpop.f32.mrb[85].mxu1  ;;  %v9181_v61 = vadd.f32 %v1325_v53, %v8969_v40  ;;  %v9187_v42 = vadd.f32 %v8824_v36, %v1324_v62  ;;  %7088 = vrcp.f32 %v3807_v38  ;;  %v5800_v36 = vmul.f32 -1.442695, %v9109_v27 }
 0x24a   : > { %v9178_v20 = vpop.eup %7064  ;;  %v1327_v13 = vpop.f32.mrb[86].mxu0  ;;  %v9196_v7 = vadd.f32 %v3308_v30, %v9042_v35  ;;  %7090 = vrcp.f32 %v3827_v26  ;;  %v5803_v38 = vmul.f32 -1.442695, %v9133_v19  ;;  %v5776_v26 = vmul.f32 -1.442695, %v9124_v51 }
 0x24b   : > { %11260 = vst [vmem:[#allocation68_spill] sm:$0xff] %v9178_v20  ;;  %11261 = vst [vmem:[#allocation69_spill] sm:$0xff] %v9181_v61  ;;  %v6517_v14 = vpop.f32.mrb[86].mxu1  ;;  %v7067_v11 = vpop.eup %7066  ;;  %v3830_v20 = vadd.f32 1.0, %v7063_v31  ;;  %v9193_v45 = vadd.f32 %v8943_v6, %v9181_v61  ;;  %v1328_v33 = vadd.f32 %v1327_v13, %v8879_v29  ;;  %7092 = vtanh.f32 %v9117_v63  ;;  %v9213_v13 = vld [vmem:[%s8372_s12 + $0x8] sm:$0xff]  }
 0x24c   : > { %v1329_v39 = vpop.f32.mrb[87].mxu0  ;;  %v3311_v1 = vpop.f32.mrb[87].mxu1  ;;  %v9203_v62 = vadd.f32 %v6517_v14, %v9112_v24  ;;  %v3808_v6 = vadd.f32 1.0, %v7067_v11  ;;  %v9250_v24 = vld [vmem:[%s8372_s12 + $0x88] sm:$0xff]  }
 0x24d   : > { %v9189_v5 = vpop.eup %7068  ;;  %v9206_v3 = vadd.f32 %v1329_v39, %v8969_v40  ;;  %v9218_v14 = vadd.f32 %v8829_v47, %v1328_v33  ;;  %7094 = vrcp.f32 %v3830_v20  ;;  %v9228_v63 = vadd.f32 %v3311_v1, %v9058_v32 }
 0x24e   : > { %v9199_v53 = vpop.eup %7070  ;;  %v1333_v30 = vpop.f32.mrb[88].mxu0  ;;  %7096 = vpow2.f32 %v5800_v36  ;;  %v5801_v47 = vmul.f32 -1.442695, %v9141_v34  ;;  %v5798_v34 = vmul.f32 -1.442695, %v9120_v22 }
 0x24f   : > { %11262 = vst [vmem:[#allocation70_spill] sm:$0xff] %v9199_v53  ;;  %11263 = vst [vmem:[#allocation71_spill] sm:$0xff] %v9206_v3  ;;  %v9208_v31 = vpop.eup %7072  ;;  %v9225_v11 = vadd.f32 %v8948_v48, %v9206_v3  ;;  %v6520_v53 = vpop.f32.mrb[88].mxu1  ;;  %v1334_v33 = vadd.f32 %v1333_v30, %v8879_v29  ;;  %7098 = vrcp.f32 %v3808_v6  ;;  %v9241_v30 = vld [vmem:[%s8372_s12 + $0x10] sm:$0xff]  }
 0x250   : > { %v7075_v35 = vpop.eup %7074  ;;  %v9235_v20 = vadd.f32 %v6520_v53, %v9181_v61  ;;  %v1335_v51 = vpop.f32.mrb[89].mxu0  ;;  %7100 = vpow2.f32 %v5803_v38 }
 0x251   : > { %v9220_v39 = vpop.eup %7076  ;;  %v3324_v27 = vpop.f32.mrb[89].mxu1  ;;  %v3828_v1 = vadd.f32 1.0, %v7075_v35  ;;  %v9244_v53 = vadd.f32 %v8838_v54, %v1334_v33  ;;  %v9247_v61 = vadd.f32 %v1335_v51, %v8969_v40  ;;  %7102 = vpow2.f32 %v5776_v26 }
 0x252   : > { %v9230_v19 = vpop.eup %7078  ;;  %v6521_v36 = vpop.f32.mrb[90].mxu1  ;;  %v9254_v22 = vadd.f32 %v3324_v27, %v9138_v59  ;;  %7104 = vpow2.f32 %v5801_v47 }
 0x253   : > { %11264 = vst [vmem:[#allocation72_spill] sm:$0xff] %v9230_v19  ;;  %v7081_v48 = vpop.eup %7080  ;;  %v1337_v19 = vpop.f32.mrb[90].mxu0  ;;  %11265 = vst [vmem:[#allocation73_spill] sm:$0xff] %v9244_v53  ;;  %v9261_v51 = vadd.f32 %v8957_v37, %v9247_v61  ;;  %v9264_v52 = vadd.f32 %v6521_v36, %v9206_v3  ;;  %7106 = vrcp.f32 %v3828_v1  ;;  %v9267_v53 = vld [vmem:[%s8372_s12 + $0x80] sm:$0xff]  }
 0x254   : > { %v7083_v10 = vpop.eup %7082  ;;  %11266 = vst [vmem:[#allocation74_spill] sm:$0xff] %v9247_v61  ;;  %v1339_v35 = vpop.f32.mrb[91].mxu0  ;;  %v1338_v38 = vadd.f32 %v1337_v19, %v8879_v29  ;;  %v3833_v33 = vadd.f32 1.0, %v7081_v48  ;;  %7108 = vpow2.f32 %v5798_v34  ;;  %v9304_v34 = vld [vmem:[%s8372_s12 + $0x98] sm:$0xff]  }
 0x255   : > { %v3327_v6 = vpop.f32.mrb[91].mxu1  ;;  %v7085_v32 = vpop.eup %7084  ;;  %v3809_v26 = vadd.f32 1.0, %v7083_v10  ;;  %7110 = vpow2.f32 %v5804_v0  ;;  %v5802_v10 = vmul.f32 -1.442695, %v9163_v8  ;;  %v9284_v1 = vadd.f32 %v1339_v35, %v8969_v40 }
 0x256   : > { %v9257_v54 = vpop.eup %7086  ;;  %v9274_v19 = vadd.f32 %v8844_v57, %v1338_v38  ;;  %v3831_v47 = vadd.f32 1.0, %v7085_v32  ;;  %v9287_v27 = vadd.f32 %v3327_v6, %v9160_v58  ;;  %v1343_v57 = vpop.f32.mrb[92].mxu0  ;;  %7112 = vrcp.f32 %v3833_v33 }
 0x257   : > { %11267 = vst [vmem:[#allocation75_spill] sm:$0xff] %v9257_v54  ;;  %v9276_v48 = vpop.eup %7088  ;;  %11270 = vst [vmem:[#allocation78_spill] sm:$0xff] %v9284_v1  ;;  %v6524_v38 = vpop.f32.mrb[92].mxu1  ;;  %v1344_v0 = vadd.f32 %v1343_v57, %v8879_v29  ;;  %7114 = vrcp.f32 %v3809_v26  ;;  %v5807_v35 = vmul.f32 -1.442695, %v9176_v16  ;;  %v9300_v33 = vadd.f32 %v8963_v23, %v9284_v1 }
 0x258   : > { %11268 = vst [vmem:[#allocation76_spill] sm:$0xff] %v9274_v19  ;;  %v9280_v54 = vpop.eup %7090  ;;  %v1345_v36 = vpop.f32.mrb[93].mxu0  ;;  %7116 = vrcp.f32 %v3831_v47  ;;  %v5777_v57 = vmul.f32 -1.442695, %v9151_v25  ;;  %v9317_v47 = vld [vmem:[%s8372_s12 + $0x20] sm:$0xff]   ;;  %v9339_v19 = vld [vmem:[%s8372_s12 + $0x90] sm:$0xff]  }
 0x259   : > { %11269 = vst [vmem:[#allocation77_spill] sm:$0xff] %v9280_v54  ;;  %v9289_v3 = vpop.eup %7092  ;;  %v3340_v8 = vpop.f32.mrb[93].mxu1  ;;  %v9310_v16 = vadd.f32 %v1345_v36, %v8969_v40  ;;  %7118 = vpow2.f32 %v5802_v10 }
 0x25a   : > { %11271 = vst [vmem:[#allocation79_spill] sm:$0xff] %v9289_v3  ;;  %v9294_v37 = vpop.eup %7094  ;;  %v1347_v3 = vpop.f32.mrb[94].mxu0  ;;  %v9320_v25 = vadd.f32 %v3340_v8, %v9247_v61  ;;  %7120 = vtanh.f32 %v9147_v9 }
 0x25b   : > { %11272 = vst [vmem:[#allocation80_spill] sm:$0xff] %v9294_v37  ;;  %v6525_v32 = vpop.f32.mrb[94].mxu1  ;;  %v7097_v54 = vpop.eup %7096  ;;  %v9307_v37 = vadd.f32 %v8836_v43, %v1344_v0  ;;  %11274 = vst [vmem:[#allocation82_spill] sm:$0xff] %v9310_v16  ;;  %v9325_v36 = vadd.f32 %v8955_v12, %v9310_v16  ;;  %v9328_v0 = vadd.f32 %v6524_v38, %v9310_v16  ;;  %7122 = vpow2.f32 %v5807_v35 }
 0x25c   : > { %v1349_v26 = vpop.f32.mrb[95].mxu0  ;;  %v3343_v6 = vpop.f32.mrb[95].mxu1  ;;  %v1348_v10 = vadd.f32 %v1347_v3, %v8879_v29  ;;  %v3834_v9 = vadd.f32 1.0, %v7097_v54  ;;  %7124 = vpow2.f32 %v5777_v57  ;;  %v5805_v12 = vmul.f32 -1.442695, %v9196_v7 }
 0x25d   : > { %11273 = vst [vmem:[#allocation81_spill] sm:$0xff] %v9307_v37  ;;  %v9312_v58 = vpop.eup %7098  ;;  %11275 = vst [vmem:[#allocation83_spill] sm:$0xff] %v9328_v0  ;;  %v9335_v8 = vadd.f32 %v1349_v26, %v8969_v40  ;;  %v9358_v38 = vadd.f32 %v3343_v6, %v9284_v1  ;;  %v5778_v1 = vmul.f32 -1.442695, %v9172_v55  ;;  %v11292_v55 = vld [vmem:[#allocation26_spill] sm:$0xff] }
 0x25e   : > { %v7101_v43 = vpop.eup %7100  ;;  %v9345_v35 = vadd.f32 %v8841_v56, %v1348_v10  ;;  %v1353_v37 = vpop.f32.mrb[96].mxu0 }
 0x25f   : > { %v9331_v23 = vpop.eup %7102  ;;  %v4157_v59 = vadd.f32 1.0, %v7101_v43  ;;  %11276 = vst [vmem:[#allocation84_spill] sm:$0xff] %v9335_v8  ;;  %v11279_v43 = vld [vmem:[#allocation32_spill] sm:$0xff]  ;;  %v9351_v54 = vpop.f32.mrb[96].mxu1  ;;  %v9355_v7 = vadd.f32 %v6525_v32, %v9335_v8 }
 0x260   : > { %v7105_v61 = vpop.eup %7104  ;;  %11278 = vst [vmem:[#allocation86_spill] sm:$0xff] %v9345_v35  ;;  %v9349_v26 = vadd.f32 %v11279_v43, %v9335_v8  ;;  %v1355_v56 = vpop.f32.mrb[97].mxu0  ;;  %v11284_v43 = vld [vmem:[#allocation24_spill] sm:$0xff] }
 0x261   : > { %v9342_v16 = vpop.eup %7106  ;;  %7126 = vrcp.f32 %v4157_v59  ;;  %v4155_v3 = vadd.f32 1.0, %v7105_v61  ;;  %11281 = vst [vmem:[#allocation87_spill] sm:$0xff] %v9355_v7  ;;  %v1354_v59 = vadd.f32 %v1353_v37, %v8879_v29  ;;  %v3356_v61 = vpop.f32.mrb[97].mxu1  ;;  %v9364_v35 = vadd.f32 %v1355_v56, %v8969_v40  ;;  %v11286_v7 = vld [vmem:[#allocation34_spill] sm:$0xff] }
 0x262   : > { %11277 = vst [vmem:[#allocation85_spill] sm:$0xff] %v9342_v16  ;;  %11280 = vst [vmem:[#allocation32_spill] sm:$0xff] %v9349_v26  ;;  %v7109_v57 = vpop.eup %7108  ;;  %7128 = vtanh.f32 %v9166_v41  ;;  %v5808_v16 = vmul.f32 -1.442695, %v9203_v62  ;;  %v1357_v41 = vpop.f32.mrb[98].mxu0 }
 0x263   : > { %v7111_v10 = vpop.eup %7110  ;;  %7130 = vrcp.f32 %v4155_v3  ;;  %11282 = vst [vmem:[#allocation88_spill] sm:$0xff] %v9364_v35  ;;  %v9366_v26 = vpop.f32.mrb[98].mxu1  ;;  %v5779_v62 = vmul.f32 -1.442695, %v9193_v45  ;;  %v9376_v56 = vadd.f32 %v11284_v43, %v1354_v59  ;;  %v9380_v0 = vadd.f32 %v11286_v7, %v9364_v35 }
 0x264   : > { %v9368_v32 = vpop.eup %7112  ;;  %v4158_v6 = vadd.f32 1.0, %v7111_v10  ;;  %7132 = vpow2.f32 %v5805_v12  ;;  %v1359_v8 = vpop.f32.mrb[99].mxu0  ;;  %v9386_v12 = vadd.f32 %v3356_v61, %v9364_v35  ;;  %v11288_v45 = vunpack.c.l.bf16 %v9184_v46 }
 0x265   : > { %11283 = vst [vmem:[#allocation89_spill] sm:$0xff] %v9368_v32  ;;  %v9372_v3 = vpop.eup %7114  ;;  %7134 = vrcp.f32 %v3834_v9  ;;  %11285 = vst [vmem:[#allocation24_spill] sm:$0xff] %v9376_v56  ;;  %v3359_v32 = vpop.f32.mrb[99].mxu1  ;;  %v1358_v9 = vadd.f32 %v1357_v41, %v8879_v29  ;;  %v5806_v7 = vmul.f32 -1.442695, %v9228_v63  ;;  %v9394_v43 = vadd.f32 %v1359_v8, %v8969_v40  ;;  %v11294_v63 = vld [vmem:[#allocation37_spill] sm:$0xff] }
 0x266   : > { %v9382_v10 = vpop.eup %7116  ;;  %7136 = vrcp.f32 %v4158_v6  ;;  %v3963_v59 = vmul.f32 %v9168_v21, %v11288_v45  ;;  %v11291_v6 = vunpack.c.h.bf16 %v9184_v46  ;;  %v5780_v21 = vmul.f32 -1.442695, %v9225_v11  ;;  %v9414_v46 = vpop.f32.mrb[100].mxu1 }
 0x267   : > { %11287 = vst [vmem:[#allocation34_spill] sm:$0xff] %v9382_v10  ;;  %v7119_v37 = vpop.eup %7118  ;;  %7138 = vpow2.f32 %v5808_v16  ;;  %11289 = vst [vmem:[#allocation90_spill] sm:$0xff] %v9394_v43  ;;  %v9404_v35 = vadd.f32 %v11292_v55, %v1358_v9  ;;  %v9409_v16 = vadd.f32 %v11294_v63, %v9394_v43  ;;  %v9412_v8 = vadd.f32 %v3359_v32, %v9394_v43  ;;  %v9418_v45 = vpop.f32.mrb[101].mxu1 }
 0x268   : > { %v9396_v10 = vpop.eup %7120  ;;  %7140 = vpow2.f32 %v5778_v1  ;;  %v9401_v61 = vmul.f32 %v9189_v5, %v11291_v6  ;;  %v4156_v41 = vadd.f32 1.0, %v7119_v37  ;;  %v1363_v1 = vpop.f32.mrb[100].mxu0  ;;  %v3810_v37 = vadd.f32 1.0, %v9331_v23 }
 0x269   : > { %11290 = vst [vmem:[#allocation91_spill] sm:$0xff] %v9396_v10  ;;  %11293 = vst [vmem:[#allocation26_spill] sm:$0xff] %v9404_v35  ;;  %v7123_v56 = vpop.eup %7122  ;;  %7142 = vpow2.f32 %v5779_v62  ;;  %v1364_v9 = vadd.f32 %v1363_v1, %v8879_v29  ;;  %v1365_v62 = vpop.f32.mrb[101].mxu0  ;;  %v3832_v6 = vadd.f32 1.0, %v7109_v57  ;;  %v11297_v63 = vunpack.c.l.bf16 %v9213_v13 }
 0x26a   : > { %11295 = vst [vmem:[#allocation37_spill] sm:$0xff] %v9409_v16  ;;  %11296 = vst [vmem:[#allocation92_spill] sm:$0xff] %v9412_v8  ;;  %v7125_v5 = vpop.eup %7124  ;;  %7144 = vrcp.f32 %v4156_v41  ;;  %v4161_v55 = vadd.f32 1.0, %v7123_v56  ;;  %v5811_v10 = vmul.f32 -1.442695, %v9235_v20  ;;  %v1367_v43 = vpop.f32.mrb[102].mxu0  ;;  %v11299_v23 = vunpack.c.l.bf16 %v9250_v24 }
 0x26b   : > { %v7127_v11 = vpop.eup %7126  ;;  %v3965_v32 = vmul.f32 %v9208_v31, %v11297_v63  ;;  %7146 = vpow2.f32 %v5806_v7  ;;  %v11300_v41 = vld [vmem:[#allocation23_spill] sm:$0xff]  ;;  %v9432_v8 = vadd.f32 %v1365_v62, %v8969_v40  ;;  %v9434_v57 = vpop.f32.mrb[102].mxu1  ;;  %v5809_v20 = vmul.f32 -1.442695, %v9254_v22 }
 0x26c   : > { %v9424_v35 = vpop.eup %7128  ;;  %v4318_v56 = vmul.f32 %v7127_v11, %v11299_v23  ;;  %7148 = vrcp.f32 %v4161_v55  ;;  %v9429_v1 = vadd.f32 %v11300_v41, %v1364_v9  ;;  %v1369_v16 = vpop.f32.mrb[103].mxu0  ;;  %v1368_v7 = vadd.f32 %v1367_v43, %v8879_v29  ;;  %v11306_v41 = vld [vmem:[#allocation33_spill] sm:$0xff] }
 0x26d   : > { %11298 = vst [vmem:[#allocation93_spill] sm:$0xff] %v9424_v35  ;;  %11302 = vst [vmem:[#allocation94_spill] sm:$0xff] %v9432_v8  ;;  %v7131_v31 = vpop.eup %7130  ;;  %7150 = vpow2.f32 %v5780_v21  ;;  %v9439_v63 = vadd.f32 %v1369_v16, %v8969_v40  ;;  %v9441_v11 = vpop.f32.mrb[103].mxu1  ;;  %v11305_v62 = vunpack.c.l.bf16 %v9267_v53  ;;  %v9449_v35 = vadd.f32 %v11306_v41, %v9432_v8  ;;  %v11308_v16 = vld [vmem:[#allocation25_spill] sm:$0xff] }
 0x26e   : > { %11301 = vst [vmem:[#allocation23_spill] sm:$0xff] %v9429_v1  ;;  %v7133_v55 = vpop.eup %7132  ;;  %7152 = vrcp.f32 %v3810_v37  ;;  %v9443_v9 = vadd.f32 %v4318_v56, %v3965_v32  ;;  %v9455_v43 = vadd.f32 %v9351_v54, %v9432_v8  ;;  %v9458_v1 = vadd.f32 %v11308_v16, %v1368_v7 }
 0x26f   : > { %11303 = vst [vmem:[#allocation95_spill] sm:$0xff] %v9439_v63  ;;  %v4316_v23 = vmul.f32 %v7131_v31, %v11305_v62  ;;  %v9451_v21 = vpop.eup %7134  ;;  %v4159_v22 = vadd.f32 1.0, %v7133_v55  ;;  %7154 = vpow2.f32 %v5811_v10  ;;  %v11311_v56 = vunpack.c.h.bf16 %v9213_v13  ;;  %v11312_v62 = vld [vmem:[#allocation36_spill] sm:$0xff] }
 0x270   : > { %11304 = vst [vmem:[#allocation96_spill] sm:$0xff] %v9443_v9  ;;  %11307 = vst [vmem:[#allocation33_spill] sm:$0xff] %v9451_v21  ;;  %v7137_v37 = vpop.eup %7136  ;;  %7156 = vrcp.f32 %v3832_v6  ;;  %v9467_v41 = vadd.f32 %v11312_v62, %v9439_v63  ;;  %v11313_v55 = vunpack.c.h.bf16 %v9250_v24  ;;  %v5812_v7 = vmul.f32 -1.442695, %v9264_v52 }
 0x271   : > { %11309 = vst [vmem:[#allocation25_spill] sm:$0xff] %v9458_v1  ;;  %v9460_v32 = vadd.f32 %v4316_v23, %v3963_v59  ;;  %v3966_v31 = vmul.f32 %v9220_v39, %v11311_v56  ;;  %v7139_v10 = vpop.eup %7138  ;;  %7158 = vrcp.f32 %v4159_v22  ;;  %v9474_v6 = vadd.f32 %v9366_v26, %v9439_v63  ;;  %v1373_v59 = vpop.f32.mrb[104].mxu0 }
 0x272   : > { %v4319_v54 = vmul.f32 %v7137_v37, %v11313_v55  ;;  %v6536_v23 = vpop.f32.mrb[104].mxu1  ;;  %v7141_v13 = vpop.eup %7140  ;;  %v3811_v16 = vadd.f32 1.0, %v7125_v5  ;;  %v4162_v39 = vadd.f32 1.0, %v7139_v10  ;;  %7160 = vpow2.f32 %v5809_v20  ;;  %v11316_v10 = vld [vmem:[#allocation29_spill] sm:$0xff] }
 0x273   : > { %11310 = vst [vmem:[#allocation97_spill] sm:$0xff] %v9460_v32  ;;  %v1374_v56 = vadd.f32 %v1373_v59, %v8879_v29  ;;  %v1375_v62 = vpop.f32.mrb[105].mxu0  ;;  %v3388_v32 = vpop.f32.mrb[105].mxu1  ;;  %7162 = vtanh.f32 %v9187_v42  ;;  %v5781_v52 = vmul.f32 -1.442695, %v9261_v51  ;;  %v11315_v5 = vunpack.c.l.bf16 %v9270_v18 }
 0x274   : > { %v7143_v9 = vpop.eup %7142  ;;  %v9477_v24 = vadd.f32 %v4319_v54, %v3966_v31  ;;  %v5810_v26 = vmul.f32 -1.442695, %v9287_v27  ;;  %v1377_v22 = vpop.f32.mrb[106].mxu0  ;;  %7164 = vrcp.f32 %v4162_v39  ;;  %v9489_v31 = vadd.f32 %v6536_v23, %v9026_v49 }
 0x275   : > { %v6537_v37 = vpop.f32.mrb[106].mxu1  ;;  %v7145_v55 = vpop.eup %7144  ;;  %v3969_v20 = vmul.f32 %v9372_v3, %v11315_v5  ;;  %v9486_v59 = vadd.f32 %v11316_v10, %v1374_v56  ;;  %v11317_v51 = vunpack.c.h.bf16 %v9267_v53  ;;  %7166 = vpow2.f32 %v5812_v7 }
 0x276   : > { %11314 = vst [vmem:[#allocation36_spill] sm:$0xff] %v9477_v24  ;;  %v1379_v54 = vpop.f32.mrb[107].mxu0  ;;  %v3391_v42 = vpop.f32.mrb[107].mxu1  ;;  %v9494_v1 = vadd.f32 %v1375_v62, %v8969_v40  ;;  %v9497_v21 = vadd.f32 %v3388_v32, %v9031_v17  ;;  %7168 = vrcp.f32 %v3811_v16  ;;  %v3813_v39 = vadd.f32 1.0, %v7143_v9 }
 0x277   : > { %v7147_v24 = vpop.eup %7146  ;;  %v4317_v27 = vmul.f32 %v7145_v55, %v11317_v51  ;;  %v1378_v23 = vadd.f32 %v1377_v22, %v8879_v29  ;;  %v11319_v53 = vunpack.c.l.bf16 %v9304_v34  ;;  %7170 = vpow2.f32 %v5781_v52 }
 0x278   : > { %v7149_v3 = vpop.eup %7148  ;;  %v4160_v56 = vadd.f32 1.0, %v7147_v24  ;;  %v9507_v7 = vadd.f32 %v9000_v28, %v9494_v1  ;;  %v11320_v62 = vunpack.c.l.bf16 %v9241_v30  ;;  %v3812_v22 = vadd.f32 1.0, %v7141_v13  ;;  %v11322_v28 = vld [vmem:[#allocation31_spill] sm:$0xff]  ;;  %v9529_v13 = vld [vmem:[%s8372_s12 + $0x28] sm:$0xff]  }
 0x279   : > { %v7151_v5 = vpop.eup %7150  ;;  %v9501_v10 = vadd.f32 %v4317_v27, %v9401_v61  ;;  %v4322_v55 = vmul.f32 %v7149_v3, %v11319_v53  ;;  %v9515_v61 = vadd.f32 %v9418_v45, %v9494_v1  ;;  %v9520_v51 = vadd.f32 %v11322_v28, %v1378_v23  ;;  %v1383_v27 = vpop.f32.mrb[108].mxu0 }
 0x27a   : > { %v7153_v32 = vpop.eup %7152  ;;  %v3967_v9 = vmul.f32 %v9276_v48, %v11320_v62  ;;  %7172 = vrcp.f32 %v4160_v56  ;;  %v6540_v3 = vpop.f32.mrb[108].mxu1  ;;  %v3814_v48 = vadd.f32 1.0, %v7151_v5  ;;  %v9525_v62 = vadd.f32 %v6537_v37, %v9038_v15  ;;  %v11328_v15 = vld [vmem:[#allocation28_spill] sm:$0xff] }
 0x27b   : > { %11318 = vst [vmem:[#allocation29_spill] sm:$0xff] %v9501_v10  ;;  %v7155_v24 = vpop.eup %7154  ;;  %v9517_v52 = vadd.f32 %v4322_v55, %v3969_v20  ;;  %7174 = vpow2.f32 %v5810_v26  ;;  %11323 = vst [vmem:[#allocation31_spill] sm:$0xff] %v9520_v51  ;;  %v1385_v45 = vpop.f32.mrb[109].mxu0  ;;  %v5782_v26 = vmul.f32 -1.442695, %v9300_v33  ;;  %v9533_v20 = vadd.f32 %v1379_v54, %v8969_v40 }
 0x27c   : > { %v9522_v53 = vpop.eup %7156  ;;  %7176 = vrcp.f32 %v3813_v39  ;;  %v4165_v56 = vadd.f32 1.0, %v7155_v24  ;;  %v3404_v16 = vpop.f32.mrb[109].mxu1  ;;  %v9536_v23 = vadd.f32 %v3391_v42, %v9047_v50  ;;  %v11325_v37 = vunpack.c.l.bf16 %v9339_v19 }
 0x27d   : > { %11321 = vst [vmem:[#allocation98_spill] sm:$0xff] %v9517_v52  ;;  %v7159_v10 = vpop.eup %7158  ;;  %7178 = vtanh.f32 %v9218_v14  ;;  %11324 = vst [vmem:[#allocation99_spill] sm:$0xff] %v9533_v20  ;;  %v1387_v39 = vpop.f32.mrb[110].mxu0  ;;  %v5813_v14 = vmul.f32 -1.442695, %v9320_v25  ;;  %v1384_v28 = vadd.f32 %v1383_v27, %v8879_v29  ;;  %v9548_v50 = vadd.f32 %v9010_v4, %v9533_v20 }
 0x27e   : > { %v6541_v5 = vpop.f32.mrb[110].mxu1  ;;  %v7161_v55 = vpop.eup %7160  ;;  %v4320_v24 = vmul.f32 %v7159_v10, %v11325_v37  ;;  %7180 = vrcp.f32 %v4165_v56  ;;  %v9552_v10 = vadd.f32 %v9441_v11, %v9533_v20  ;;  %v6021_v27 = vunpack.c.l.bf16 %v9529_v13  ;;  %v9558_v37 = vld [vmem:[%s8372_s12 + $0xa8] sm:$0xff]   ;;  %v9568_v11 = vld [vmem:[%s8372_s12 + $0xa0] sm:$0xff]  }
 0x27f   : > { %v1389_v52 = vpop.f32.mrb[111].mxu0  ;;  %v9542_v33 = vpop.f32.mrb[111].mxu1  ;;  %7182 = vrcp.f32 %v3812_v22  ;;  %v4163_v42 = vadd.f32 1.0, %v7161_v55  ;;  %v11330_v55 = vunpack.c.h.bf16 %v9270_v18  ;;  %v11331_v17 = vunpack.c.h.bf16 %v9304_v34 }
 0x280   : > { %v9544_v54 = vpop.eup %7162  ;;  %v9554_v25 = vadd.f32 %v4320_v24, %v3967_v9  ;;  %7184 = vrcp.f32 %v3814_v48  ;;  %v5783_v9 = vmul.f32 -1.442695, %v9325_v36  ;;  %v6085_v34 = vunpack.c.l.bf16 %v9558_v37  ;;  %v9585_v36 = vpop.f32.mrb[112].mxu1 }
 0x281   : > { %11326 = vst [vmem:[#allocation100_spill] sm:$0xff] %v9544_v54  ;;  %v7165_v56 = vpop.eup %7164  ;;  %v9561_v54 = vadd.f32 %v11328_v15, %v1384_v28  ;;  %v3970_v4 = vmul.f32 %v7153_v32, %v11330_v55  ;;  %7186 = vrcp.f32 %v4163_v42  ;;  %v9575_v15 = vadd.f32 %v1385_v45, %v8969_v40  ;;  %v9583_v32 = vpop.f32.mrb[0].mxu0 }
 0x282   : > { %11327 = vst [vmem:[#allocation101_spill] sm:$0xff] %v9554_v25  ;;  %v7167_v22 = vpop.eup %7166  ;;  %v4323_v51 = vmul.f32 %v7165_v56, %v11331_v17  ;;  %7188 = vpow2.f32 %v5813_v14  ;;  %v9572_v25 = vadd.f32 %v6540_v3, %v9073_v2  ;;  %v9581_v17 = vadd.f32 %v3404_v16, %v9080_v44  ;;  %v9597_v16 = vpop.f32.mrb[113].mxu1  ;;  %v11338_v44 = vld [vmem:[#allocation83_spill] sm:$0xff] }
 0x283   : > { %11329 = vst [vmem:[#allocation28_spill] sm:$0xff] %v9561_v54  ;;  %v7169_v48 = vpop.eup %7168  ;;  %v4166_v24 = vadd.f32 1.0, %v7167_v22  ;;  %11332 = vst [vmem:[#allocation102_spill] sm:$0xff] %v9575_v15  ;;  %7190 = vpow2.f32 %v5782_v26  ;;  %v11334_v3 = vunpack.c.h.bf16 %v9241_v30  ;;  %v6081_v45 = vunpack.c.l.bf16 %v9568_v11  ;;  %v9595_v26 = vpop.f32.mrb[1].mxu0  ;;  %v11342_v54 = vld [vmem:[#allocation76_spill] sm:$0xff] }
 0x284   : > { %v7171_v28 = vpop.eup %7170  ;;  %v9577_v18 = vadd.f32 %v4323_v51, %v3970_v4  ;;  %v9593_v51 = vadd.f32 %v8997_v60, %v9575_v15  ;;  %11335 = vst [vmem:[#allocation104_spill] sm:$0xff] %v9595_v26  ;;  %v11336_v22 = vunpack.c.h.bf16 %v9339_v19  ;;  %v11337_v4 = vld [vmem:[#allocation73_spill] sm:$0xff]  ;;  %v5814_v30 = vmul.f32 -1.442695, %v9358_v38  ;;  %v9609_v60 = vpop.f32.mrb[114].mxu1  ;;  %v11343_v26 = vld [vmem:[#allocation56_spill] sm:$0xff] }
 0x285   : > { %v7173_v14 = vpop.eup %7172  ;;  %v3968_v42 = vmul.f32 %v9312_v58, %v11334_v3  ;;  %7192 = vrcp.f32 %v4166_v24  ;;  %v9605_v58 = vadd.f32 %v9414_v46, %v9575_v15  ;;  %v9607_v24 = vpop.f32.mrb[2].mxu0  ;;  %v5815_v2 = vmul.f32 -1.442695, %v11338_v44 }
 0x286   : > { %11333 = vst [vmem:[#allocation103_spill] sm:$0xff] %v9577_v18  ;;  %v7175_v56 = vpop.eup %7174  ;;  %v4321_v55 = vmul.f32 %v7173_v14, %v11336_v22  ;;  %7194 = vtanh.f32 %v11337_v4  ;;  %v1388_v19 = vadd.f32 %v1387_v39, %v8879_v29  ;;  %v9613_v14 = vpop.f32.mrb[3].mxu0  ;;  %v3815_v46 = vadd.f32 1.0, %v7171_v28  ;;  %v11346_v28 = vld [vmem:[#allocation58_spill] sm:$0xff] }
 0x287   : > { %v7177_v3 = vpop.eup %7176  ;;  %v4164_v18 = vadd.f32 1.0, %v7175_v56  ;;  %7196 = vpow2.f32 %v5783_v9  ;;  %11339 = vst [vmem:[#allocation73_spill] sm:$0xff] %v9613_v14  ;;  %v9615_v22 = vpop.f32.mrb[115].mxu1  ;;  %v9623_v49 = vadd.f32 %v6541_v5, %v11343_v26  ;;  %v5785_v44 = vmul.f32 -1.442695, %v9380_v0  ;;  %v11344_v9 = vld [vmem:[#allocation30_spill] sm:$0xff] }
 0x288   : > { %v9617_v38 = vpop.eup %7178  ;;  %v9619_v4 = vadd.f32 %v4321_v55, %v3968_v42  ;;  %7198 = vtanh.f32 %v11342_v54  ;;  %v9627_v29 = vadd.f32 %v11344_v9, %v1388_v19  ;;  %v9630_v39 = vadd.f32 %v1389_v52, %v8969_v40  ;;  %v11347_v55 = vld [vmem:[#allocation81_spill] sm:$0xff]  ;;  %v11348_v0 = vld [vmem:[#allocation40_spill] sm:$0xff] }
 0x289   : > { %11340 = vst [vmem:[#allocation83_spill] sm:$0xff] %v9617_v38  ;;  %v7181_v56 = vpop.eup %7180  ;;  %7200 = vrcp.f32 %v4164_v18  ;;  %v3973_v38 = vmul.f32 %v7177_v3, %v6021_v27  ;;  %v9634_v54 = vadd.f32 %v9542_v33, %v11346_v28  ;;  %v5817_v18 = vmul.f32 -1.442695, %v9386_v12  ;;  %v9652_v3 = vpop.f32.mrb[116].mxu1 }
 0x28a   : > { %11341 = vst [vmem:[#allocation105_spill] sm:$0xff] %v9619_v4  ;;  %11345 = vst [vmem:[#allocation76_spill] sm:$0xff] %v9627_v29  ;;  %v7183_v14 = vpop.eup %7182  ;;  %v4326_v42 = vmul.f32 %v7181_v56, %v6085_v34  ;;  %7202 = vpow2.f32 %v5814_v30  ;;  %v9640_v19 = vadd.f32 %v11348_v0, %v9630_v39  ;;  %v9644_v40 = vadd.f32 %v9434_v57, %v9630_v39  ;;  %v9650_v30 = vpop.f32.mrb[4].mxu0  ;;  %v11351_v0 = vld [vmem:[#allocation32_spill] sm:$0xff] }
 0x28b   : > { %v7185_v5 = vpop.eup %7184  ;;  %7204 = vtanh.f32 %v11347_v55  ;;  %v6022_v33 = vunpack.c.h.bf16 %v9529_v13  ;;  %v6086_v34 = vunpack.c.h.bf16 %v9558_v37  ;;  %v11350_v56 = vunpack.c.l.bf16 %v9317_v47  ;;  %v9657_v4 = vpop.f32.mrb[5].mxu0 }
 0x28c   : > { %v7187_v52 = vpop.eup %7186  ;;  %v9646_v27 = vadd.f32 %v4326_v42, %v3973_v38  ;;  %7206 = vrcp.f32 %v3815_v46  ;;  %v5784_v57 = vmul.f32 -1.442695, %v11351_v0  ;;  %11352 = vst [vmem:[#allocation81_spill] sm:$0xff] %v9657_v4  ;;  %v9659_v38 = vpop.f32.mrb[117].mxu1  ;;  %v6082_v13 = vunpack.c.h.bf16 %v9568_v11  ;;  %v11353_v42 = vld [vmem:[#allocation37_spill] sm:$0xff]  ;;  %v11359_v4 = vld [vmem:[#allocation92_spill] sm:$0xff] }
 0x28d   : > { %v7189_v12 = vpop.eup %7188  ;;  %v3971_v9 = vmul.f32 %v7169_v48, %v11350_v56  ;;  %v4324_v55 = vmul.f32 %v7187_v52, %v6081_v45  ;;  %7208 = vpow2.f32 %v5785_v44  ;;  %v9663_v28 = vpop.f32.mrb[6].mxu0  ;;  %v11355_v52 = vld [vmem:[#allocation87_spill] sm:$0xff]  ;;  %v5822_v20 = vmul.f32 -1.442695, %v9552_v10 }
 0x28e   : > { %11349 = vst [vmem:[#allocation30_spill] sm:$0xff] %v9646_v27  ;;  %v7191_v46 = vpop.eup %7190  ;;  %7210 = vpow2.f32 %v5815_v2  ;;  %v4167_v37 = vadd.f32 1.0, %v7189_v12  ;;  %v5786_v27 = vmul.f32 -1.442695, %v11353_v42  ;;  %v9665_v29 = vpop.f32.mrb[118].mxu1  ;;  %v11356_v56 = vld [vmem:[#allocation39_spill] sm:$0xff]  ;;  %v3974_v12 = vmul.f32 %v7185_v5, %v6022_v33 }
 0x28f   : > { %v7193_v48 = vpop.eup %7192  ;;  %v9667_v45 = vadd.f32 %v4324_v55, %v3971_v9  ;;  %v5816_v44 = vmul.f32 -1.442695, %v11355_v52  ;;  %7212 = vpow2.f32 %v5817_v18  ;;  %v9672_v0 = vadd.f32 %v9585_v36, %v11356_v56  ;;  %v9674_v26 = vpop.f32.mrb[7].mxu0  ;;  %v11360_v18 = vld [vmem:[#allocation35_spill] sm:$0xff] }
 0x290   : > { %11357 = vst [vmem:[#allocation32_spill] sm:$0xff] %v9674_v26  ;;  %v9676_v2 = vpop.f32.mrb[119].mxu1  ;;  %v9678_v11 = vpop.eup %7194  ;;  %v4327_v42 = vmul.f32 %v7193_v48, %v6086_v34  ;;  %7214 = vrcp.f32 %v4167_v37  ;;  %v5818_v9 = vmul.f32 -1.442695, %v11359_v4  ;;  %v3816_v52 = vadd.f32 1.0, %v7191_v46  ;;  %v9692_v48 = vld [vmem:[%s8372_s12 + $0x30] sm:$0xff]  }
 0x291   : > { %11354 = vst [vmem:[#allocation40_spill] sm:$0xff] %v9667_v45  ;;  %11358 = vst [vmem:[#allocation37_spill] sm:$0xff] %v9678_v11  ;;  %v7197_v55 = vpop.eup %7196  ;;  %7216 = vpow2.f32 %v5784_v57  ;;  %v9683_v36 = vadd.f32 %v9597_v16, %v11360_v18  ;;  %v11363_v33 = vunpack.c.h.bf16 %v9317_v47  ;;  %v9695_v57 = vld [vmem:[%s8372_s12 + $0xb0] sm:$0xff]   ;;  %v9697_v16 = vpop.f32.mrb[8].mxu0 }
 0x292   : > { %v9685_v45 = vpop.eup %7198  ;;  %v9687_v56 = vadd.f32 %v4327_v42, %v3974_v12  ;;  %7218 = vpow2.f32 %v5786_v27  ;;  %v3817_v4 = vadd.f32 1.0, %v7197_v55  ;;  %11364 = vst [vmem:[#allocation106_spill] sm:$0xff] %v9697_v16  ;;  %v9699_v46 = vpop.f32.mrb[120].mxu1  ;;  %v11366_v42 = vld [vmem:[#allocation41_spill] sm:$0xff]  ;;  %v11369_v55 = vld [vmem:[#allocation86_spill] sm:$0xff] }
 0x293   : > { %11361 = vst [vmem:[#allocation87_spill] sm:$0xff] %v9685_v45  ;;  %v7201_v11 = vpop.eup %7200  ;;  %7220 = vpow2.f32 %v5816_v44  ;;  %v3972_v34 = vmul.f32 %v7183_v14, %v11363_v33  ;;  %v5787_v44 = vmul.f32 -1.442695, %v9449_v35  ;;  %v9706_v47 = vadd.f32 %v9609_v60, %v11366_v42  ;;  %v9708_v14 = vpop.f32.mrb[9].mxu0 }
 0x294   : > { %11362 = vst [vmem:[#allocation92_spill] sm:$0xff] %v9687_v56  ;;  %v7203_v5 = vpop.eup %7202  ;;  %v4325_v37 = vmul.f32 %v7201_v11, %v6082_v13  ;;  %7222 = vpow2.f32 %v5818_v9  ;;  %11367 = vst [vmem:[#allocation108_spill] sm:$0xff] %v9708_v14  ;;  %v9710_v13 = vpop.f32.mrb[121].mxu1  ;;  %v6025_v35 = vunpack.c.l.bf16 %v9692_v48  ;;  %v5819_v60 = vmul.f32 -1.442695, %v9455_v43  ;;  %v11373_v14 = vld [vmem:[#allocation55_spill] sm:$0xff] }
 0x295   : > { %v9701_v12 = vpop.eup %7204  ;;  %7224 = vrcp.f32 %v3816_v52  ;;  %v4168_v27 = vadd.f32 1.0, %v7203_v5  ;;  %v9715_v33 = vpop.f32.mrb[10].mxu0  ;;  %v6089_v5 = vunpack.c.l.bf16 %v9695_v57  ;;  %v9732_v18 = vadd.f32 %v9652_v3, %v11373_v14 }
 0x296   : > { %11365 = vst [vmem:[#allocation107_spill] sm:$0xff] %v9701_v12  ;;  %v7207_v11 = vpop.eup %7206  ;;  %v9712_v9 = vadd.f32 %v4325_v37, %v3972_v34  ;;  %7226 = vtanh.f32 %v11369_v55  ;;  %11370 = vst [vmem:[#allocation86_spill] sm:$0xff] %v9715_v33  ;;  %v9717_v12 = vpop.f32.mrb[122].mxu1  ;;  %v11372_v55 = vld [vmem:[#allocation38_spill] sm:$0xff] }
 0x297   : > { %v7209_v52 = vpop.eup %7208  ;;  %7228 = vrcp.f32 %v4168_v27  ;;  %v9722_v45 = vpop.f32.mrb[11].mxu0  ;;  %v3975_v33 = vmul.f32 %v7207_v11, %v6025_v35  ;;  %v11377_v11 = vld [vmem:[#allocation24_spill] sm:$0xff] }
 0x298   : > { %11368 = vst [vmem:[#allocation109_spill] sm:$0xff] %v9712_v9  ;;  %11371 = vst [vmem:[#allocation110_spill] sm:$0xff] %v9722_v45  ;;  %v9724_v56 = vpop.f32.mrb[123].mxu1  ;;  %v7211_v34 = vpop.eup %7210  ;;  %7230 = vrcp.f32 %v3817_v4  ;;  %v3819_v37 = vadd.f32 1.0, %v7209_v52  ;;  %v9728_v9 = vadd.f32 %v9615_v22, %v11372_v55  ;;  %v5788_v45 = vmul.f32 -1.442695, %v9467_v41 }
 0x299   : > { %v7213_v42 = vpop.eup %7212  ;;  %7232 = vpow2.f32 %v5787_v44  ;;  %v5820_v22 = vmul.f32 -1.442695, %v9474_v6  ;;  %v11374_v52 = vld [vmem:[#allocation45_spill] sm:$0xff]  ;;  %v9740_v3 = vpop.f32.mrb[12].mxu0  ;;  %v6026_v41 = vunpack.c.h.bf16 %v9692_v48 }
 0x29a   : > { %v7215_v27 = vpop.eup %7214  ;;  %7234 = vrcp.f32 %v3819_v37  ;;  %v4171_v43 = vadd.f32 1.0, %v7213_v42  ;;  %v9738_v44 = vadd.f32 %v9659_v38, %v11374_v52  ;;  %11375 = vst [vmem:[#allocation111_spill] sm:$0xff] %v9740_v3  ;;  %v9742_v14 = vpop.f32.mrb[124].mxu1  ;;  %v6090_v38 = vunpack.c.h.bf16 %v9695_v57 }
 0x29b   : > { %v7217_v26 = vpop.eup %7216  ;;  %v4328_v16 = vmul.f32 %v7215_v27, %v6089_v5  ;;  %7236 = vpow2.f32 %v5819_v60  ;;  %v9748_v5 = vpop.f32.mrb[13].mxu0  ;;  %v9754_v27 = vld [vmem:[%s8372_s12 + $0x40] sm:$0xff]  }
 0x29c   : > { %v7219_v4 = vpop.eup %7218  ;;  %7238 = vrcp.f32 %v4171_v43  ;;  %11378 = vst [vmem:[#allocation24_spill] sm:$0xff] %v9748_v5  ;;  %v9750_v60 = vpop.f32.mrb[125].mxu1  ;;  %v5827_v43 = vmul.f32 -1.442695, %v9489_v31  ;;  %v9772_v31 = vld [vmem:[%s8372_s12 + $0xc0] sm:$0xff]  }
 0x29d   : > { %v7221_v42 = vpop.eup %7220  ;;  %v9744_v37 = vadd.f32 %v4328_v16, %v3975_v33  ;;  %7240 = vtanh.f32 %v11377_v11  ;;  %v3820_v35 = vadd.f32 1.0, %v7219_v4  ;;  %v11379_v16 = vld [vmem:[#allocation59_spill] sm:$0xff]  ;;  %v9761_v48 = vpop.f32.mrb[14].mxu0 }
 0x29e   : > { %v7223_v6 = vpop.eup %7222  ;;  %7242 = vpow2.f32 %v5788_v45  ;;  %v9759_v33 = vadd.f32 %v9665_v29, %v11379_v16  ;;  %11381 = vst [vmem:[#allocation114_spill] sm:$0xff] %v9761_v48  ;;  %v9763_v4 = vpop.f32.mrb[126].mxu1  ;;  %v3818_v45 = vadd.f32 1.0, %v7217_v26  ;;  %v11384_v29 = vld [vmem:[#allocation47_spill] sm:$0xff]  ;;  %v4170_v3 = vadd.f32 1.0, %v7221_v42 }
 0x29f   : > { %11376 = vst [vmem:[#allocation112_spill] sm:$0xff] %v9744_v37  ;;  %v7225_v11 = vpop.eup %7224  ;;  %v4169_v37 = vadd.f32 1.0, %v7211_v34  ;;  %7244 = vrcp.f32 %v3820_v35  ;;  %v4172_v5 = vadd.f32 1.0, %v7223_v6  ;;  %v9765_v52 = vpop.f32.mrb[15].mxu0  ;;  %v9776_v16 = vadd.f32 %v9676_v2, %v11384_v29  ;;  %v11386_v35 = vld [vmem:[#allocation69_spill] sm:$0xff] }
 0x2a0   : > { %11380 = vst [vmem:[#allocation113_spill] sm:$0xff] %v9759_v33  ;;  %11382 = vst [vmem:[#allocation115_spill] sm:$0xff] %v9765_v52  ;;  %v9767_v57 = vpop.f32.mrb[127].mxu1  ;;  %v9769_v55 = vpop.eup %7226  ;;  %7246 = vpow2.f32 %v5820_v22  ;;  %v6033_v34 = vunpack.c.l.bf16 %v9754_v27  ;;  %v9781_v6 = vadd.f32 %v9699_v46, %v11386_v35  ;;  %v3976_v26 = vmul.f32 %v7225_v11, %v6026_v41 }
 0x2a1   : > { %11383 = vst [vmem:[#allocation116_spill] sm:$0xff] %v9769_v55  ;;  %11385 = vst [vmem:[#allocation117_spill] sm:$0xff] %v9776_v16  ;;  %v7229_v48 = vpop.eup %7228  ;;  %7248 = vrcp.f32 %v4172_v5  ;;  %v5789_v22 = vmul.f32 -1.442695, %v9507_v7  ;;  %v6097_v29 = vunpack.c.l.bf16 %v9772_v31  ;;  %v5825_v42 = vmul.f32 -1.442695, %v9497_v21 }
 0x2a2   : > { %11387 = vst [vmem:[#allocation118_spill] sm:$0xff] %v9781_v6  ;;  %v9783_v52 = vpop.eup %7230  ;;  %v4329_v55 = vmul.f32 %v7229_v48, %v6090_v38  ;;  %7250 = vpow2.f32 %v5827_v43  ;;  %v9789_v5 = vld [vmem:[%s8372_s12 + $0x68] sm:$0xff]   ;;  %v5821_v35 = vmul.f32 -1.442695, %v9515_v61  ;;  %v9794_v41 = vpop.f32.mrb[16].mxu0  ;;  %v9799_v7 = vld [vmem:[%s8372_s12 + $0x60] sm:$0xff]  }
 0x2a3   : > { %v7233_v2 = vpop.eup %7232  ;;  %7252 = vrcp.f32 %v4169_v37  ;;  %11389 = vst [vmem:[#allocation120_spill] sm:$0xff] %v9794_v41  ;;  %v9796_v38 = vpop.f32.mrb[128].mxu1  ;;  %v5828_v48 = vmul.f32 -1.442695, %v9525_v62  ;;  %v11390_v21 = vld [vmem:[#allocation64_spill] sm:$0xff] }
 0x2a4   : > { %v7235_v16 = vpop.eup %7234  ;;  %7254 = vrcp.f32 %v3818_v45  ;;  %v9791_v46 = vadd.f32 %v4329_v55, %v3976_v26  ;;  %v9804_v11 = vadd.f32 %v9710_v13, %v11390_v21  ;;  %v9806_v45 = vpop.f32.mrb[17].mxu0  ;;  %v6034_v26 = vunpack.c.h.bf16 %v9754_v27 }
 0x2a5   : > { %v7237_v43 = vpop.eup %7236  ;;  %7256 = vrcp.f32 %v4170_v3  ;;  %v3979_v37 = vmul.f32 %v7235_v16, %v6033_v34  ;;  %11392 = vst [vmem:[#allocation122_spill] sm:$0xff] %v9806_v45  ;;  %v9808_v55 = vpop.f32.mrb[129].mxu1  ;;  %v3821_v45 = vadd.f32 1.0, %v7233_v2  ;;  %v9837_v2 = vld [vmem:[%s8372_s12 + $0x70] sm:$0xff]  }
 0x2a6   : > { %11388 = vst [vmem:[#allocation119_spill] sm:$0xff] %v9791_v46  ;;  %11391 = vst [vmem:[#allocation121_spill] sm:$0xff] %v9804_v11  ;;  %v7239_v61 = vpop.eup %7238  ;;  %7258 = vpow2.f32 %v5789_v22  ;;  %v11393_v46 = vld [vmem:[#allocation71_spill] sm:$0xff]  ;;  %v9815_v3 = vpop.f32.mrb[18].mxu0 }
 0x2a7   : > { %v9813_v41 = vadd.f32 %v9717_v12, %v11393_v46  ;;  %11395 = vst [vmem:[#allocation124_spill] sm:$0xff] %v9815_v3  ;;  %v9817_v62 = vpop.f32.mrb[130].mxu1  ;;  %v9819_v13 = vpop.eup %7240  ;;  %v4332_v34 = vmul.f32 %v7239_v61, %v6097_v29  ;;  %7260 = vpow2.f32 %v5825_v42  ;;  %v9828_v46 = vld [vmem:[%s8372_s12 + $0x78] sm:$0xff]   ;;  %v6098_v3 = vunpack.c.h.bf16 %v9772_v31 }
 0x2a8   : > { %11396 = vst [vmem:[#allocation125_spill] sm:$0xff] %v9819_v13  ;;  %v9822_v21 = vpop.f32.mrb[19].mxu0  ;;  %v9824_v27 = vpop.f32.mrb[131].mxu1  ;;  %7262 = vpow2.f32 %v5821_v35  ;;  %v5790_v13 = vmul.f32 -1.442695, %v9548_v50  ;;  %v4173_v61 = vadd.f32 1.0, %v7237_v43 }
 0x2a9   : > { %11394 = vst [vmem:[#allocation123_spill] sm:$0xff] %v9813_v41  ;;  %11397 = vst [vmem:[#allocation126_spill] sm:$0xff] %v9822_v21  ;;  %v7243_v22 = vpop.eup %7242  ;;  %v9833_v41 = vld [vmem:[%s8372_s12 + $0x38] sm:$0xff]   ;;  %v9839_v42 = vadd.f32 %v4332_v34, %v3979_v37  ;;  %7264 = vpow2.f32 %v5828_v48  ;;  %v5826_v31 = vmul.f32 -1.442695, %v9536_v23  ;;  %v11400_v35 = vld [vmem:[#allocation67_spill] sm:$0xff] }
 0x2aa   : > { %v7245_v16 = vpop.eup %7244  ;;  %v11399_v21 = vld [vmem:[#allocation26_spill] sm:$0xff]  ;;  %v9845_v50 = vadd.f32 %v9724_v56, %v11400_v35  ;;  %v6029_v37 = vunpack.c.l.bf16 %v9833_v41  ;;  %v9854_v56 = vpop.f32.mrb[20].mxu0 }
 0x2ab   : > { %11398 = vst [vmem:[#allocation127_spill] sm:$0xff] %v9839_v42  ;;  %v7247_v12 = vpop.eup %7246  ;;  %7266 = vtanh.f32 %v11399_v21  ;;  %v3980_v11 = vmul.f32 %v7245_v16, %v6034_v26  ;;  %v9851_v43 = vld [vmem:[%s8372_s12 + $0xb8] sm:$0xff]   ;;  %v3822_v26 = vadd.f32 1.0, %v7243_v22  ;;  %11402 = vst [vmem:[#allocation128_spill] sm:$0xff] %v9854_v56  ;;  %v9856_v16 = vpop.f32.mrb[132].mxu1 }
 0x2ac   : > { %11401 = vst [vmem:[#allocation26_spill] sm:$0xff] %v9845_v50  ;;  %v7249_v6 = vpop.eup %7248  ;;  %7268 = vrcp.f32 %v3821_v45  ;;  %v4174_v29 = vadd.f32 1.0, %v7247_v12  ;;  %v9859_v42 = vpop.f32.mrb[21].mxu0  ;;  %v6093_v22 = vunpack.c.l.bf16 %v9851_v43  ;;  %v11410_v56 = vld [vmem:[#allocation74_spill] sm:$0xff] }
 0x2ad   : > { %v7251_v48 = vpop.eup %7250  ;;  %v4333_v23 = vmul.f32 %v7249_v6, %v6098_v3  ;;  %7270 = vpow2.f32 %v5790_v13  ;;  %11403 = vst [vmem:[#allocation129_spill] sm:$0xff] %v9859_v42  ;;  %v9861_v35 = vpop.f32.mrb[133].mxu1  ;;  %v9866_v6 = vld [vmem:[%s8372_s12 + $0xe8] sm:$0xff]   ;;  %v9869_v3 = vld [vmem:[%s8372_s12 + $0xe0] sm:$0xff]   ;;  %v3977_v13 = vmul.f32 %v9783_v52, %v6029_v37  ;;  %v9890_v33 = vadd.f32 %v9750_v60, %v11410_v56 }
 0x2ae   : > { %v7253_v34 = vpop.eup %7252  ;;  %7272 = vrcp.f32 %v4173_v61  ;;  %v4181_v45 = vadd.f32 1.0, %v7251_v48  ;;  %v9873_v12 = vpop.f32.mrb[22].mxu0  ;;  %v5791_v48 = vmul.f32 -1.442695, %v9593_v51  ;;  %v5823_v60 = vmul.f32 -1.442695, %v9605_v58 }
 0x2af   : > { %v7255_v50 = vpop.eup %7254  ;;  %v9863_v21 = vadd.f32 %v4333_v23, %v3980_v11  ;;  %7274 = vpow2.f32 %v5826_v31  ;;  %11405 = vst [vmem:[#allocation131_spill] sm:$0xff] %v9873_v12  ;;  %v9875_v61 = vpop.f32.mrb[134].mxu1  ;;  %v5831_v11 = vmul.f32 -1.442695, %v9572_v25  ;;  %v11406_v23 = vld [vmem:[#allocation82_spill] sm:$0xff]  ;;  %v4330_v12 = vmul.f32 %v7253_v34, %v6093_v22  ;;  %11411 = vst [vmem:[#allocation135_spill] sm:$0xff] %v9890_v33 }
 0x2b0   : > { %v7257_v10 = vpop.eup %7256  ;;  %7276 = vrcp.f32 %v4181_v45  ;;  %v9883_v42 = vpop.f32.mrb[23].mxu0  ;;  %v6117_v25 = vunpack.c.l.bf16 %v9866_v6  ;;  %v5829_v34 = vmul.f32 -1.442695, %v9581_v17  ;;  %v6094_v51 = vunpack.c.h.bf16 %v9851_v43  ;;  %v9922_v56 = vld [vmem:[%s8372_s12 + $0x48] sm:$0xff]  }
 0x2b1   : > { %11404 = vst [vmem:[#allocation130_spill] sm:$0xff] %v9863_v21  ;;  %v9881_v21 = vadd.f32 %v9742_v14, %v11406_v23  ;;  %11408 = vst [vmem:[#allocation133_spill] sm:$0xff] %v9883_v42  ;;  %v9885_v31 = vpop.f32.mrb[135].mxu1  ;;  %v7259_v52 = vpop.eup %7258  ;;  %7278 = vrcp.f32 %v3822_v26  ;;  %v9896_v37 = vadd.f32 %v4330_v12, %v3977_v13 }
 0x2b2   : > { %11409 = vst [vmem:[#allocation134_spill] sm:$0xff] %v9885_v31  ;;  %v7261_v45 = vpop.eup %7260  ;;  %7280 = vrcp.f32 %v4174_v29  ;;  %v6030_v29 = vunpack.c.h.bf16 %v9833_v41  ;;  %v9908_v13 = vpop.f32.mrb[24].mxu0 }
 0x2b3   : > { %11407 = vst [vmem:[#allocation132_spill] sm:$0xff] %v9881_v21  ;;  %v7263_v42 = vpop.eup %7262  ;;  %v4179_v23 = vadd.f32 1.0, %v7261_v45  ;;  %7282 = vpow2.f32 %v5822_v20  ;;  %v11412_v21 = vld [vmem:[#allocation27_spill] sm:$0xff]  ;;  %v11415_v45 = vld [vmem:[#allocation84_spill] sm:$0xff]  ;;  %11417 = vst [vmem:[#allocation138_spill] sm:$0xff] %v9908_v13  ;;  %v9910_v12 = vpop.f32.mrb[136].mxu1 }
 0x2b4   : > { %v772_v31 = vsub.s32 0, %v11412_v21  ;;  %11413 = vst [vmem:[#allocation27_spill] sm:$0xff] %v9896_v37  ;;  %v7265_v26 = vpop.eup %7264  ;;  %7284 = vpow2.f32 %v5831_v11  ;;  %v9906_v20 = vadd.f32 %v9763_v4, %v11415_v45  ;;  %v3823_v11 = vadd.f32 1.0, %v7259_v52  ;;  %v11419_v45 = vld [vmem:[#allocation78_spill] sm:$0xff] }
 0x2b5   : > { %v9901_v22 = vpop.eup %7266  ;;  %7286 = vrcp.f32 %v4179_v23  ;;  %v4182_v14 = vadd.f32 1.0, %v7265_v26  ;;  %v3978_v41 = vmul.f32 %v7255_v50, %v6030_v29  ;;  %v9915_v23 = vpop.f32.mrb[137].mxu1  ;;  %v4175_v26 = vadd.f32 1.0, %v7263_v42  ;;  %v11423_v29 = vld [vmem:[#allocation75_spill] sm:$0xff] }
 0x2b6   : > { %11414 = vst [vmem:[#allocation136_spill] sm:$0xff] %v9901_v22  ;;  %11416 = vst [vmem:[#allocation137_spill] sm:$0xff] %v9906_v20  ;;  %v7269_v58 = vpop.eup %7268  ;;  %7288 = vpow2.f32 %v5791_v48  ;;  %v9913_v22 = vpop.f32.mrb[25].mxu0  ;;  %v4331_v4 = vmul.f32 %v7257_v10, %v6094_v51  ;;  %v9919_v13 = vadd.f32 %v9767_v57, %v11419_v45  ;;  %v11422_v48 = vunpack.c.l.bf16 %v9789_v5  ;;  %v9935_v42 = vld [vmem:[%s11135_s6] sm:$0xf]  ;;  %v9941_v10 = vld [vmem:[%s8372_s12 + $0xc8] sm:$0xff]  }
 0x2b7   : > { %11418 = vst [vmem:[#allocation139_spill] sm:$0xff] %v9913_v22  ;;  %v7271_v43 = vpop.eup %7270  ;;  %7290 = vrcp.f32 %v4182_v14  ;;  %v9924_v52 = vpop.f32.mrb[26].mxu0  ;;  %v9938_v57 = vrot.slane %v9935_v42, %v772_v31  ;;  %v6037_v31 = vunpack.c.l.bf16 %v9922_v56 }
 0x2b8   : > { %11420 = vst [vmem:[#allocation140_spill] sm:$0xff] %v9919_v13  ;;  %11421 = vst [vmem:[#allocation141_spill] sm:$0xff] %v9924_v52  ;;  %v9926_v17 = vpop.f32.mrb[138].mxu1  ;;  %v7273_v50 = vpop.eup %7272  ;;  %v3989_v22 = vmul.f32 %v11423_v29, %v11422_v48  ;;  %7292 = vpow2.f32 %v5823_v60  ;;  %v3824_v45 = vadd.f32 1.0, %v7271_v43  ;;  %v5832_v48 = vmul.f32 -1.442695, %v9623_v49 }
 0x2b9   : > { %v9943_v14 = vpop.f32.mrb[27].mxu0  ;;  %v9945_v51 = vpop.f32.mrb[139].mxu1  ;;  %7294 = vpow2.f32 %v5829_v34  ;;  %v9948_v60 = vadd.f32 %v4331_v4, %v3978_v41  ;;  %v5792_v13 = vmul.f32 -1.442695, %v9640_v19  ;;  %v9955_v43 = vadd.f32 %v9796_v38, %v9432_v8  ;;  %v11432_v8 = vld [vmem:[#allocation80_spill] sm:$0xff] }
 0x2ba   : > { %11424 = vst [vmem:[#allocation75_spill] sm:$0xff] %v9943_v14  ;;  %v7275_v52 = vpop.eup %7274  ;;  %7296 = vrcp.f32 %v3823_v11  ;;  %v6101_v14 = vunpack.c.l.bf16 %v9941_v10  ;;  %v5824_v49 = vmul.f32 -1.442695, %v9644_v40  ;;  %v6622_v11 = vadd.f32 %v9583_v32, %v9938_v57  ;;  %v9967_v38 = vpop.f32.mrb[140].mxu1 }
 0x2bb   : > { %11425 = vst [vmem:[#allocation142_spill] sm:$0xff] %v9948_v60  ;;  %v7277_v29 = vpop.eup %7276  ;;  %v4180_v37 = vadd.f32 1.0, %v7275_v52  ;;  %7298 = vrcp.f32 %v4175_v26  ;;  %11426 = vst [vmem:[#allocation143_spill] sm:$0xff] %v9955_v43  ;;  %v3981_v41 = vmul.f32 %v7269_v58, %v6037_v31  ;;  %v11427_v4 = vunpack.c.l.bf16 %v9799_v7  ;;  %v11428_v52 = vld [vmem:[#allocation77_spill] sm:$0xff]  ;;  %v9965_v60 = vpop.f32.mrb[28].mxu0  ;;  %v11433_v58 = vld [vmem:[#allocation88_spill] sm:$0xff] }
 0x2bc   : > { %v7279_v20 = vpop.eup %7278  ;;  %v4342_v33 = vmul.f32 %v7277_v29, %v6117_v25  ;;  %v4334_v29 = vmul.f32 %v7273_v50, %v6101_v14  ;;  %11430 = vst [vmem:[#allocation144_spill] sm:$0xff] %v9965_v60  ;;  %v11431_v40 = vunpack.c.h.bf16 %v9789_v5  ;;  %v5830_v32 = vmul.f32 -1.442695, %v9634_v54 }
 0x2bd   : > { %v7281_v34 = vpop.eup %7280  ;;  %7300 = vrcp.f32 %v4180_v37  ;;  %v3987_v25 = vmul.f32 %v11428_v52, %v11427_v4  ;;  %v9975_v31 = vadd.f32 %v9808_v55, %v11433_v58  ;;  %v5867_v14 = vmul.f32 -1.442695, %v9672_v0 }
 0x2be   : > { %v7283_v19 = vpop.eup %7282  ;;  %v9963_v26 = vadd.f32 %v4342_v33, %v3989_v22  ;;  %7302 = vrcp.f32 %v3824_v45  ;;  %v3990_v43 = vmul.f32 %v11432_v8, %v11431_v40  ;;  %v9977_v33 = vpop.f32.mrb[29].mxu0  ;;  %v9982_v4 = vadd.f32 %v4334_v29, %v3981_v41 }
 0x2bf   : > { %v7285_v37 = vpop.eup %7284  ;;  %7304 = vpow2.f32 %v5832_v48  ;;  %11434 = vst [vmem:[#allocation80_spill] sm:$0xff] %v9977_v33  ;;  %v9979_v22 = vpop.f32.mrb[141].mxu1  ;;  %v11437_v55 = vunpack.c.l.bf16 %v9869_v3  ;;  %v5633_v52 = vmul.f32 -1.442695, %v6622_v11  ;;  %v6624_v40 = vadd.f32 %v9607_v24, %v9938_v57  ;;  %v10002_v11 = vld [vmem:[%s8372_s12 + $0xf8] sm:$0xff]  }
 0x2c0   : > { %11429 = vst [vmem:[#allocation77_spill] sm:$0xff] %v9963_v26  ;;  %v7287_v45 = vpop.eup %7286  ;;  %v4185_v50 = vadd.f32 1.0, %v7285_v37  ;;  %7306 = vpow2.f32 %v5792_v13  ;;  %11435 = vst [vmem:[#allocation145_spill] sm:$0xff] %v9982_v4  ;;  %v9984_v5 = vpop.f32.mrb[30].mxu0  ;;  %v4176_v41 = vadd.f32 1.0, %v7283_v19  ;;  %v6038_v33 = vunpack.c.h.bf16 %v9922_v56 }
 0x2c1   : > { %11436 = vst [vmem:[#allocation146_spill] sm:$0xff] %v9984_v5  ;;  %v9986_v8 = vpop.f32.mrb[142].mxu1  ;;  %v7289_v54 = vpop.eup %7288  ;;  %v4340_v48 = vmul.f32 %v7287_v45, %v11437_v55  ;;  %7308 = vpow2.f32 %v5824_v49  ;;  %v11440_v45 = vunpack.c.h.bf16 %v9866_v6  ;;  %v6102_v24 = vunpack.c.h.bf16 %v9941_v10 }
 0x2c2   : > { %v9992_v37 = vpop.f32.mrb[31].mxu0  ;;  %v9994_v13 = vpop.f32.mrb[143].mxu1  ;;  %7310 = vrcp.f32 %v4185_v50  ;;  %v3825_v29 = vadd.f32 1.0, %v7289_v54  ;;  %v3982_v19 = vmul.f32 %v7279_v20, %v6038_v33  ;;  %v10007_v50 = vadd.f32 %v9817_v62, %v9439_v63 }
 0x2c3   : > { %11438 = vst [vmem:[#allocation147_spill] sm:$0xff] %v9992_v37  ;;  %v7291_v0 = vpop.eup %7290  ;;  %v9997_v5 = vadd.f32 %v4340_v48, %v3987_v25  ;;  %7312 = vpow2.f32 %v5830_v32  ;;  %v4335_v6 = vmul.f32 %v7281_v34, %v6102_v24  ;;  %v11442_v32 = vunpack.c.h.bf16 %v9799_v7  ;;  %v10019_v20 = vpop.f32.mrb[32].mxu0  ;;  %v11446_v7 = vld [vmem:[#allocation90_spill] sm:$0xff] }
 0x2c4   : > { %v7293_v26 = vpop.eup %7292  ;;  %v4343_v49 = vmul.f32 %v7291_v0, %v11440_v45  ;;  %7314 = vrcp.f32 %v3825_v29  ;;  %v11443_v0 = vld [vmem:[#allocation85_spill] sm:$0xff]  ;;  %v6125_v10 = vunpack.c.l.bf16 %v10002_v11  ;;  %v5865_v62 = vmul.f32 -1.442695, %v9683_v36 }
 0x2c5   : > { %11439 = vst [vmem:[#allocation148_spill] sm:$0xff] %v9997_v5  ;;  %v7295_v55 = vpop.eup %7294  ;;  %v4177_v37 = vadd.f32 1.0, %v7293_v26  ;;  %7316 = vpow2.f32 %v5633_v52  ;;  %v3988_v45 = vmul.f32 %v11443_v0, %v11442_v32  ;;  %v10016_v26 = vld [vmem:[%s8372_s12 + $0xf0] sm:$0xff]   ;;  %11444 = vst [vmem:[#allocation85_spill] sm:$0xff] %v10019_v20  ;;  %v5634_v34 = vmul.f32 -1.442695, %v6624_v40 }
 0x2c6   : > { %v7297_v56 = vpop.eup %7296  ;;  %v10009_v25 = vadd.f32 %v4343_v49, %v3990_v43  ;;  %v4183_v54 = vadd.f32 1.0, %v7295_v55  ;;  %v10021_v43 = vpop.f32.mrb[144].mxu1  ;;  %v10023_v52 = vadd.f32 %v4335_v6, %v3982_v19  ;;  %v10027_v29 = vadd.f32 %v9824_v27, %v11446_v7  ;;  %v11449_v55 = vld [vmem:[#allocation89_spill] sm:$0xff]  ;;  %v11451_v40 = vld [vmem:[#allocation34_spill] sm:$0xff] }
 0x2c7   : > { %v7299_v48 = vpop.eup %7298  ;;  %7318 = vrcp.f32 %v4177_v37  ;;  %v10029_v37 = vpop.f32.mrb[33].mxu0  ;;  %v11448_v36 = vunpack.c.l.bf16 %v9828_v46  ;;  %v11452_v6 = vunpack.c.h.bf16 %v9869_v3  ;;  %v10046_v0 = vld [vmem:[%s8372_s12 + $0x58] sm:$0xff]  }
 0x2c8   : > { %11441 = vst [vmem:[#allocation149_spill] sm:$0xff] %v10009_v25  ;;  %v7301_v33 = vpop.eup %7300  ;;  %7320 = vrcp.f32 %v4183_v54  ;;  %11445 = vst [vmem:[#allocation150_spill] sm:$0xff] %v10023_v52  ;;  %v10031_v49 = vpop.f32.mrb[145].mxu1  ;;  %v11450_v54 = vunpack.c.l.bf16 %v9837_v2 }
 0x2c9   : > { %11447 = vst [vmem:[#allocation151_spill] sm:$0xff] %v10029_v37  ;;  %v10033_v24 = vpop.eup %7302  ;;  %v3993_v32 = vmul.f32 %v11449_v55, %v11448_v36  ;;  %v4341_v27 = vmul.f32 %v7301_v33, %v11452_v6  ;;  %7322 = vpow2.f32 %v5867_v14  ;;  %v10048_v37 = vpop.f32.mrb[34].mxu0  ;;  %v11454_v36 = vunpack.c.h.bf16 %v9828_v46  ;;  %v11455_v55 = vld [vmem:[#allocation33_spill] sm:$0xff] }
 0x2ca   : > { %v10041_v19 = vmul.f32 %v11451_v40, %v11450_v54  ;;  %11453 = vst [vmem:[#allocation89_spill] sm:$0xff] %v10048_v37  ;;  %v10050_v25 = vpop.f32.mrb[146].mxu1  ;;  %v7305_v5 = vpop.eup %7304  ;;  %v11456_v54 = vunpack.c.h.bf16 %v9837_v2  ;;  %7324 = vrcp.f32 %v4176_v41  ;;  %v6121_v14 = vunpack.c.l.bf16 %v10016_v26  ;;  %v10064_v33 = vld [vmem:[%s8372_s12 + $0x50] sm:$0xff]  }
 0x2cb   : > { %v10055_v20 = vmul.f32 %v11455_v55, %v11454_v36  ;;  %v10066_v40 = vpop.f32.mrb[35].mxu0  ;;  %v7307_v6 = vpop.eup %7306  ;;  %v10068_v37 = vadd.f32 %v4341_v27, %v3988_v45  ;;  %v4186_v60 = vadd.f32 1.0, %v7305_v5  ;;  %7326 = vpow2.f32 %v5865_v62  ;;  %v10072_v36 = vld [vmem:[%s8372_s12 + $0xd8] sm:$0xff]   ;;  %v10075_v2 = vld [vmem:[%s8372_s12 + $0xd0] sm:$0xff]  }
 0x2cc   : > { %v10060_v3 = vmul.f32 %v9522_v53, %v11456_v54  ;;  %11457 = vst [vmem:[#allocation34_spill] sm:$0xff] %v10066_v40  ;;  %v5868_v46 = vmul.f32 -1.442695, %v9706_v47  ;;  %v7309_v53 = vpop.eup %7308  ;;  %v3826_v55 = vadd.f32 1.0, %v7307_v6  ;;  %7328 = vpow2.f32 %v5634_v34  ;;  %v10085_v62 = vpop.f32.mrb[147].mxu1 }
 0x2cd   : > { %11458 = vst [vmem:[#allocation33_spill] sm:$0xff] %v10068_v37  ;;  %v6045_v41 = vunpack.c.l.bf16 %v10046_v0  ;;  %v10080_v54 = vadd.f32 %v9856_v16, %v9575_v15  ;;  %v7311_v40 = vpop.eup %7310  ;;  %7330 = vrcp.f32 %v4186_v60  ;;  %v4178_v45 = vadd.f32 1.0, %v7309_v53 }
 0x2ce   : > { %v6626_v5 = vadd.f32 %v9650_v30, %v9938_v57  ;;  %v6041_v47 = vunpack.c.l.bf16 %v10064_v33  ;;  %v7313_v27 = vpop.eup %7312  ;;  %v4346_v37 = vmul.f32 %v7311_v40, %v6125_v10  ;;  %7332 = vrcp.f32 %v3826_v55 }
 0x2cf   : > { %v6109_v34 = vunpack.c.l.bf16 %v10072_v36  ;;  %v6105_v6 = vunpack.c.l.bf16 %v10075_v2  ;;  %v7315_v52 = vpop.eup %7314  ;;  %7334 = vrcp.f32 %v4178_v45  ;;  %v4184_v16 = vadd.f32 1.0, %v7313_v27  ;;  %v11460_v45 = vld [vmem:[#allocation23_spill] sm:$0xff] }
 0x2d0   : > { %v5866_v60 = vmul.f32 -1.442695, %v9728_v9  ;;  %v3983_v53 = vmul.f32 %v7297_v56, %v6041_v47  ;;  %v7317_v15 = vpop.eup %7316  ;;  %v10090_v7 = vadd.f32 %v4346_v37, %v3993_v32  ;;  %7336 = vpow2.f32 %v5868_v46 }
 0x2d1   : > { %v3985_v30 = vmul.f32 %v7315_v52, %v6045_v41  ;;  %v4336_v4 = vmul.f32 %v7299_v48, %v6105_v6  ;;  %v7319_v63 = vpop.eup %7318  ;;  %7338 = vrcp.f32 %v4184_v16  ;;  %v2234_v10 = vadd.f32 1.0, %v7317_v15 }
 0x2d2   : > { %11459 = vst [vmem:[#allocation152_spill] sm:$0xff] %v10090_v7  ;;  %v5635_v40 = vmul.f32 -1.442695, %v6626_v5  ;;  %v10094_v55 = vadd.f32 %v9861_v35, %v9494_v1  ;;  %v7321_v58 = vpop.eup %7320  ;;  %7340 = vtanh.f32 %v11460_v45  ;;  %v6126_v9 = vunpack.c.h.bf16 %v10002_v11  ;;  %v10105_v5 = vpop.f32.mrb[36].mxu0 }
 0x2d3   : > { %v4338_v56 = vmul.f32 %v7319_v63, %v6109_v34  ;;  %v10098_v47 = vadd.f32 %v4336_v4, %v3983_v53  ;;  %v7323_v37 = vpop.eup %7322  ;;  %v4344_v32 = vmul.f32 %v7321_v58, %v6121_v14  ;;  %v6122_v48 = vunpack.c.h.bf16 %v10016_v26  ;;  %11461 = vst [vmem:[#allocation23_spill] sm:$0xff] %v10105_v5  ;;  %v10107_v11 = vpop.f32.mrb[148].mxu1  ;;  %v10281_v5 = vld [vmem:[%s8372_s12 + $0x128] sm:$0xff]  }
 0x2d4   : > { %7342 = vrcp.f32 %v2234_v10  ;;  %v776_v15 = vsub.s32 1, %v11412_v21  ;;  %v7325_v52 = vpop.eup %7324  ;;  %v4510_v46 = vadd.f32 1.0, %v7323_v37  ;;  %v5871_v35 = vmul.f32 -1.442695, %v9732_v18  ;;  %v10115_v26 = vpop.f32.mrb[37].mxu0 }
 0x2d5   : > { %7344 = vpow2.f32 %v5866_v60  ;;  %v10103_v41 = vadd.f32 %v4338_v56, %v3985_v30  ;;  %v7327_v63 = vpop.eup %7326  ;;  %v10110_v4 = vadd.f32 %v4344_v32, %v10041_v19  ;;  %v6628_v58 = vadd.f32 %v9663_v28, %v9938_v57  ;;  %11463 = vst [vmem:[#allocation154_spill] sm:$0xff] %v10115_v26  ;;  %v11464_v19 = vld [vmem:[#allocation25_spill] sm:$0xff]  ;;  %v10127_v60 = vpop.f32.mrb[149].mxu1  ;;  %v11483_v26 = vld [vmem:[#allocation118_spill] sm:$0xff] }
 0x2d6   : > { %7346 = vpow2.f32 %v5635_v40  ;;  %v6046_v21 = vunpack.c.h.bf16 %v10046_v0  ;;  %v7329_v14 = vpop.eup %7328  ;;  %v4508_v18 = vadd.f32 1.0, %v7327_v63  ;;  %v6110_v27 = vunpack.c.h.bf16 %v10072_v36 }
 0x2d7   : > { %11462 = vst [vmem:[#allocation153_spill] sm:$0xff] %v10110_v4  ;;  %7348 = vrcp.f32 %v4510_v46  ;;  %v10120_v34 = vadd.f32 %v9875_v61, %v9630_v39  ;;  %v7331_v6 = vpop.eup %7330  ;;  %v10124_v16 = vrot.slane %v9935_v42, %v776_v15  ;;  %v2235_v28 = vadd.f32 1.0, %v7329_v14  ;;  %v10138_v15 = vpop.f32.mrb[38].mxu0  ;;  %v11467_v46 = vld [vmem:[#allocation113_spill] sm:$0xff] }
 0x2d8   : > { %7350 = vtanh.f32 %v11464_v19  ;;  %v6042_v0 = vunpack.c.h.bf16 %v10064_v33  ;;  %v7333_v53 = vpop.eup %7332  ;;  %v4347_v30 = vmul.f32 %v7331_v6, %v6126_v9  ;;  %v5869_v36 = vmul.f32 -1.442695, %v9738_v44  ;;  %v10136_v33 = vld [vmem:[%s8372_s12 + $0x108] sm:$0xff]   ;;  %11466 = vst [vmem:[#allocation155_spill] sm:$0xff] %v10138_v15  ;;  %v10146_v14 = vpop.f32.mrb[150].mxu1  ;;  %v11471_v19 = vld [vmem:[#allocation106_spill] sm:$0xff] }
 0x2d9   : > { %7352 = vrcp.f32 %v4508_v18  ;;  %v6106_v61 = vunpack.c.h.bf16 %v10075_v2  ;;  %v7335_v10 = vpop.eup %7334  ;;  %v5636_v40 = vmul.f32 -1.442695, %v6628_v58  ;;  %v3986_v45 = vmul.f32 %v7333_v53, %v6046_v21  ;;  %v11468_v58 = vld [vmem:[#allocation99_spill] sm:$0xff]  ;;  %v10162_v53 = vpop.f32.mrb[151].mxu1 }
 0x2da   : > { %7354 = vrcp.f32 %v2235_v28  ;;  %v3984_v42 = vmul.f32 %v10033_v24, %v6042_v0  ;;  %v7337_v56 = vpop.eup %7336  ;;  %v10133_v37 = vadd.f32 %v4347_v30, %v10055_v20  ;;  %v4339_v9 = vmul.f32 %v7335_v10, %v6110_v27  ;;  %v11469_v24 = vld [vmem:[#allocation134_spill] sm:$0xff]  ;;  %v10160_v0 = vpop.f32.mrb[39].mxu0 }
 0x2db   : > { %7356 = vpow2.f32 %v5871_v35  ;;  %v4337_v32 = vmul.f32 %v7325_v52, %v6106_v61  ;;  %v7339_v44 = vpop.eup %7338  ;;  %v4511_v2 = vadd.f32 1.0, %v7337_v56  ;;  %v5872_v63 = vmul.f32 -1.442695, %v11467_v46  ;;  %v10151_v35 = vld [vmem:[%s8372_s12 + $0x100] sm:$0xff]   ;;  %11472 = vst [vmem:[#allocation99_spill] sm:$0xff] %v10160_v0  ;;  %v11476_v10 = vld [vmem:[#allocation42_spill] sm:$0xff] }
 0x2dc   : > { %11465 = vst [vmem:[#allocation25_spill] sm:$0xff] %v10133_v37  ;;  %7358 = vtanh.f32 %v9486_v59  ;;  %v10144_v21 = vadd.f32 %v11469_v24, %v11468_v58  ;;  %v10148_v20 = vpop.eup %7340  ;;  %v4345_v18 = vmul.f32 %v7339_v44, %v6122_v48  ;;  %v10153_v52 = vadd.f32 %v4339_v9, %v3986_v45  ;;  %v11477_v56 = vld [vmem:[#allocation31_spill] sm:$0xff]  ;;  %v11479_v24 = vld [vmem:[#allocation117_spill] sm:$0xff] }
 0x2dd   : > { %11470 = vst [vmem:[#allocation113_spill] sm:$0xff] %v10148_v20  ;;  %7360 = vpow2.f32 %v5869_v36  ;;  %v10155_v27 = vadd.f32 %v4337_v32, %v3984_v42  ;;  %v6133_v6 = vunpack.c.l.bf16 %v10136_v33  ;;  %v6630_v28 = vadd.f32 %v11471_v19, %v9938_v57  ;;  %v11474_v36 = vld [vmem:[#allocation62_spill] sm:$0xff]  ;;  %v11481_v19 = vld [vmem:[#allocation43_spill] sm:$0xff] }
 0x2de   : > { %v7343_v59 = vpop.eup %7342  ;;  %7362 = vrcp.f32 %v4511_v2  ;;  %v10165_v48 = vadd.f32 %v4345_v18, %v10060_v3  ;;  %v10172_v45 = vadd.f32 %v9910_v12, %v11476_v10  ;;  %v6129_v9 = vunpack.c.l.bf16 %v10151_v35  ;;  %v11478_v2 = vld [vmem:[#allocation104_spill] sm:$0xff]  ;;  %v11488_v20 = vld [vmem:[#allocation63_spill] sm:$0xff] }
 0x2df   : > { %v7345_v30 = vpop.eup %7344  ;;  %v10168_v61 = vmul.f32 %v7343_v59, %v11474_v36  ;;  %7364 = vpow2.f32 %v5636_v40  ;;  %v6623_v46 = vadd.f32 %v11478_v2, %v10124_v16  ;;  %v5870_v18 = vmul.f32 -1.442695, %v11479_v24 }
 0x2e0   : > { %11473 = vst [vmem:[#allocation134_spill] sm:$0xff] %v10165_v48  ;;  %v7347_v42 = vpop.eup %7346  ;;  %7366 = vtanh.f32 %v11477_v56  ;;  %v4509_v32 = vadd.f32 1.0, %v7345_v30  ;;  %v5637_v12 = vmul.f32 -1.442695, %v6630_v28  ;;  %v10183_v36 = vadd.f32 %v9915_v23, %v11481_v19  ;;  %v11482_v30 = vld [vmem:[#allocation73_spill] sm:$0xff] }
 0x2e1   : > { %11475 = vst [vmem:[#allocation106_spill] sm:$0xff] %v10168_v61  ;;  %v7349_v44 = vpop.eup %7348  ;;  %v2236_v3 = vadd.f32 1.0, %v7347_v42  ;;  %7368 = vpow2.f32 %v5872_v63  ;;  %v6625_v0 = vadd.f32 %v11482_v30, %v10124_v16  ;;  %v5875_v2 = vmul.f32 -1.442695, %v11483_v26  ;;  %v11484_v42 = vld [vmem:[#allocation44_spill] sm:$0xff]  ;;  %v11491_v30 = vld [vmem:[#allocation97_spill] sm:$0xff] }
 0x2e2   : > { %v10179_v59 = vpop.eup %7350  ;;  %v4671_v40 = vmul.f32 %v7349_v44, %v6133_v6  ;;  %7370 = vrcp.f32 %v4509_v32  ;;  %v10190_v63 = vadd.f32 %v9926_v17, %v11484_v42  ;;  %v11486_v6 = vld [vmem:[#allocation96_spill] sm:$0xff]  ;;  %v5665_v44 = vmul.f32 -1.442695, %v6623_v46  ;;  %v11494_v46 = vld [vmem:[#allocation46_spill] sm:$0xff] }
 0x2e3   : > { %11480 = vst [vmem:[#allocation62_spill] sm:$0xff] %v10179_v59  ;;  %v7353_v56 = vpop.eup %7352  ;;  %7372 = vrcp.f32 %v2236_v3  ;;  %v11485_v59 = vld [vmem:[#allocation28_spill] sm:$0xff]  ;;  %v6134_v3 = vunpack.c.h.bf16 %v10136_v33  ;;  %v5666_v37 = vmul.f32 -1.442695, %v6625_v0  ;;  %v10213_v33 = vpop.f32.mrb[152].mxu1 }
 0x2e4   : > { %v7355_v24 = vpop.eup %7354  ;;  %7374 = vtanh.f32 %v11485_v59  ;;  %v10194_v28 = vadd.f32 %v4671_v40, %v11486_v6  ;;  %v4669_v32 = vmul.f32 %v7353_v56, %v6129_v9  ;;  %v11493_v9 = vld [vmem:[#allocation86_spill] sm:$0xff]  ;;  %v10211_v56 = vpop.f32.mrb[40].mxu0 }
 0x2e5   : > { %v7357_v23 = vpop.eup %7356  ;;  %v10197_v61 = vmul.f32 %v7355_v24, %v11488_v20  ;;  %7376 = vpow2.f32 %v5870_v18  ;;  %v6632_v40 = vadd.f32 %v11493_v9, %v9938_v57  ;;  %v10209_v20 = vadd.f32 %v9945_v51, %v11494_v46  ;;  %11495 = vst [vmem:[#allocation43_spill] sm:$0xff] %v10211_v56  ;;  %v10215_v6 = vpop.f32.mrb[41].mxu0  ;;  %v11499_v9 = vld [vmem:[#allocation50_spill] sm:$0xff] }
 0x2e6   : > { %11487 = vst [vmem:[#allocation42_spill] sm:$0xff] %v10194_v28  ;;  %v10200_v26 = vpop.eup %7358  ;;  %v10203_v17 = vadd.f32 %v4669_v32, %v11491_v30  ;;  %v4514_v48 = vadd.f32 1.0, %v7357_v23  ;;  %7378 = vpow2.f32 %v5637_v12  ;;  %11496 = vst [vmem:[#allocation73_spill] sm:$0xff] %v10215_v6  ;;  %v11497_v32 = vld [vmem:[#allocation121_spill] sm:$0xff] }
 0x2e7   : > { %11489 = vst [vmem:[#allocation31_spill] sm:$0xff] %v10197_v61  ;;  %11490 = vst [vmem:[#allocation104_spill] sm:$0xff] %v10200_v26  ;;  %v7361_v59 = vpop.eup %7360  ;;  %7380 = vpow2.f32 %v5875_v2  ;;  %v6130_v2 = vunpack.c.h.bf16 %v10151_v35  ;;  %v5873_v23 = vmul.f32 -1.442695, %v11497_v32  ;;  %v10223_v26 = vadd.f32 %v9967_v38, %v11499_v9  ;;  %v11502_v32 = vld [vmem:[#allocation123_spill] sm:$0xff]  ;;  %v10236_v38 = vpop.f32.mrb[153].mxu1 }
 0x2e8   : > { %11492 = vst [vmem:[#allocation117_spill] sm:$0xff] %v10203_v17  ;;  %v7363_v18 = vpop.eup %7362  ;;  %7382 = vrcp.f32 %v4514_v48  ;;  %v4512_v24 = vadd.f32 1.0, %v7361_v59  ;;  %v11500_v48 = vld [vmem:[#allocation36_spill] sm:$0xff]  ;;  %v11509_v28 = vld [vmem:[#allocation29_spill] sm:$0xff] }
 0x2e9   : > { %v7365_v12 = vpop.eup %7364  ;;  %7384 = vpow2.f32 %v5665_v44  ;;  %v4672_v0 = vmul.f32 %v7363_v18, %v6134_v3  ;;  %v10229_v44 = vld [vmem:[%s8372_s12 + $0x118] sm:$0xff]   ;;  %v5638_v3 = vmul.f32 -1.442695, %v6632_v40  ;;  %v11506_v40 = vld [vmem:[#allocation65_spill] sm:$0xff] }
 0x2ea   : > { %v10219_v30 = vpop.eup %7366  ;;  %7386 = vrcp.f32 %v4512_v24  ;;  %v2237_v51 = vadd.f32 1.0, %v7365_v12  ;;  %v11503_v24 = vld [vmem:[#allocation52_spill] sm:$0xff] }
 0x2eb   : > { %11498 = vst [vmem:[#allocation118_spill] sm:$0xff] %v10219_v30  ;;  %v7369_v61 = vpop.eup %7368  ;;  %v10226_v59 = vadd.f32 %v4672_v0, %v11500_v48  ;;  %7388 = vpow2.f32 %v5666_v37  ;;  %v5876_v30 = vmul.f32 -1.442695, %v11502_v32  ;;  %v10234_v12 = vadd.f32 %v9979_v22, %v11503_v24  ;;  %v11504_v0 = vld [vmem:[#allocation81_spill] sm:$0xff]  ;;  %v10249_v22 = vpop.f32.mrb[42].mxu0  ;;  %v11518_v24 = vld [vmem:[#allocation98_spill] sm:$0xff] }
 0x2ec   : > { %v7371_v35 = vpop.eup %7370  ;;  %7390 = vrcp.f32 %v2237_v51  ;;  %v4515_v18 = vadd.f32 1.0, %v7369_v61  ;;  %v6627_v37 = vadd.f32 %v11504_v0, %v10124_v16  ;;  %v6141_v61 = vunpack.c.l.bf16 %v10229_v44  ;;  %v10247_v51 = vld [vmem:[%s8372_s12 + $0x110] sm:$0xff]   ;;  %11508 = vst [vmem:[#allocation63_spill] sm:$0xff] %v10249_v22  ;;  %v11514_v22 = vld [vmem:[#allocation76_spill] sm:$0xff] }
 0x2ed   : > { %11501 = vst [vmem:[#allocation44_spill] sm:$0xff] %v10226_v59  ;;  %v7373_v6 = vpop.eup %7372  ;;  %v4670_v17 = vmul.f32 %v7371_v35, %v6130_v2  ;;  %7392 = vpow2.f32 %v5873_v23  ;;  %v11511_v2 = vld [vmem:[#allocation111_spill] sm:$0xff]  ;;  %v11512_v35 = vld [vmem:[#allocation56_spill] sm:$0xff] }
 0x2ee   : > { %v10240_v48 = vpop.eup %7374  ;;  %v10243_v59 = vmul.f32 %v7373_v6, %v11506_v40  ;;  %7394 = vrcp.f32 %v4515_v18  ;;  %v6634_v23 = vadd.f32 %v11511_v2, %v9938_v57  ;;  %v10258_v0 = vadd.f32 %v9986_v8, %v11512_v35  ;;  %v11513_v40 = vld [vmem:[#allocation32_spill] sm:$0xff]  ;;  %v11516_v8 = vld [vmem:[#allocation58_spill] sm:$0xff] }
 0x2ef   : > { %11505 = vst [vmem:[#allocation28_spill] sm:$0xff] %v10240_v48  ;;  %v7377_v32 = vpop.eup %7376  ;;  %v10252_v56 = vadd.f32 %v4670_v17, %v11509_v28  ;;  %7396 = vpow2.f32 %v5638_v3  ;;  %v6629_v48 = vadd.f32 %v11513_v40, %v10124_v16  ;;  %v5667_v15 = vmul.f32 -1.442695, %v6627_v37 }
 0x2f0   : > { %11507 = vst [vmem:[#allocation96_spill] sm:$0xff] %v10243_v59  ;;  %v7379_v6 = vpop.eup %7378  ;;  %v4513_v59 = vadd.f32 1.0, %v7377_v32  ;;  %7398 = vpow2.f32 %v5876_v30  ;;  %v6137_v28 = vunpack.c.l.bf16 %v10247_v51  ;;  %v10267_v35 = vadd.f32 %v9994_v13, %v11516_v8 }
 0x2f1   : > { %11510 = vst [vmem:[#allocation97_spill] sm:$0xff] %v10252_v56  ;;  %v7381_v18 = vpop.eup %7380  ;;  %7400 = vtanh.f32 %v11514_v22  ;;  %v2238_v17 = vadd.f32 1.0, %v7379_v6  ;;  %v11515_v56 = vld [vmem:[#allocation26_spill] sm:$0xff]  ;;  %v5639_v30 = vmul.f32 -1.442695, %v6634_v23  ;;  %v6142_v37 = vunpack.c.h.bf16 %v10229_v44  ;;  %v11517_v6 = vld [vmem:[#allocation39_spill] sm:$0xff] }
 0x2f2   : > { %v7383_v3 = vpop.eup %7382  ;;  %7402 = vrcp.f32 %v4513_v59  ;;  %v4518_v2 = vadd.f32 1.0, %v7381_v18  ;;  %v5874_v4 = vmul.f32 -1.442695, %v11515_v56  ;;  %v5668_v22 = vmul.f32 -1.442695, %v6629_v48  ;;  %v10274_v18 = vpop.f32.mrb[154].mxu1 }
 0x2f3   : > { %v7385_v7 = vpop.eup %7384  ;;  %v4675_v40 = vmul.f32 %v7383_v3, %v6141_v61  ;;  %7404 = vrcp.f32 %v2238_v17  ;;  %v10272_v59 = vadd.f32 %v10021_v43, %v11517_v6  ;;  %v11520_v3 = vld [vmem:[#allocation132_spill] sm:$0xff]  ;;  %v11521_v44 = vld [vmem:[#allocation114_spill] sm:$0xff]  ;;  %v10285_v43 = vpop.f32.mrb[43].mxu0  ;;  %v11523_v6 = vld [vmem:[#allocation101_spill] sm:$0xff] }
 0x2f4   : > { %v7387_v32 = vpop.eup %7386  ;;  %7406 = vrcp.f32 %v4518_v2  ;;  %v5879_v17 = vmul.f32 -1.442695, %v11520_v3  ;;  %v2426_v8 = vadd.f32 1.0, %v7385_v7  ;;  %v6636_v48 = vadd.f32 %v11521_v44, %v9938_v57  ;;  %11522 = vst [vmem:[#allocation46_spill] sm:$0xff] %v10285_v43  ;;  %v10297_v7 = vpop.f32.mrb[155].mxu1 }
 0x2f5   : > { %v7389_v56 = vpop.eup %7388  ;;  %v10277_v13 = vadd.f32 %v4675_v40, %v11518_v24  ;;  %7408 = vpow2.f32 %v5667_v15  ;;  %v4673_v61 = vmul.f32 %v7387_v32, %v6137_v28  ;;  %v11525_v24 = vld [vmem:[#allocation66_spill] sm:$0xff]  ;;  %v11527_v15 = vld [vmem:[#allocation35_spill] sm:$0xff]  ;;  %v6138_v32 = vunpack.c.h.bf16 %v10247_v51 }
 0x2f6   : > { %v7391_v23 = vpop.eup %7390  ;;  %7410 = vpow2.f32 %v5874_v4  ;;  %v10295_v28 = vadd.f32 %v10031_v49, %v11527_v15 }
 0x2f7   : > { %11519 = vst [vmem:[#allocation86_spill] sm:$0xff] %v10277_v13  ;;  %v7393_v2 = vpop.eup %7392  ;;  %v10288_v9 = vadd.f32 %v4673_v61, %v11523_v6  ;;  %v10291_v40 = vmul.f32 %v7391_v23, %v11525_v24  ;;  %7412 = vpow2.f32 %v5639_v30  ;;  %v6149_v61 = vunpack.c.l.bf16 %v10281_v5  ;;  %v11529_v6 = vld [vmem:[#allocation108_spill] sm:$0xff]  ;;  %v11530_v24 = vld [vmem:[#allocation135_spill] sm:$0xff] }
 0x2f8   : > { %11528 = vst [vmem:[#allocation123_spill] sm:$0xff] %v10295_v28  ;;  %v7395_v4 = vpop.eup %7394  ;;  %7414 = vpow2.f32 %v5668_v22  ;;  %v4516_v3 = vadd.f32 1.0, %v7393_v2  ;;  %v6631_v23 = vadd.f32 %v11529_v6, %v10124_v16  ;;  %v5877_v15 = vmul.f32 -1.442695, %v11530_v24 }
 0x2f9   : > { %11524 = vst [vmem:[#allocation121_spill] sm:$0xff] %v10288_v9  ;;  %11526 = vst [vmem:[#allocation36_spill] sm:$0xff] %v10291_v40  ;;  %v7397_v44 = vpop.eup %7396  ;;  %v4676_v43 = vmul.f32 %v7395_v4, %v6142_v37  ;;  %7416 = vpow2.f32 %v5879_v17  ;;  %v11531_v9 = vld [vmem:[#allocation41_spill] sm:$0xff]  ;;  %v11533_v37 = vld [vmem:[#allocation103_spill] sm:$0xff]  ;;  %v5640_v13 = vmul.f32 -1.442695, %v6636_v48 }
 0x2fa   : > { %v7399_v30 = vpop.eup %7398  ;;  %7418 = vrcp.f32 %v4516_v3  ;;  %v2239_v49 = vadd.f32 1.0, %v7397_v44  ;;  %v10306_v22 = vadd.f32 %v10050_v25, %v11531_v9  ;;  %v11535_v17 = vld [vmem:[#allocation137_spill] sm:$0xff]  ;;  %v11536_v40 = vld [vmem:[#allocation38_spill] sm:$0xff]  ;;  %v2427_v28 = vadd.f32 1.0, %v7389_v56  ;;  %v10319_v9 = vld [vmem:[%s8372_s12 + $0x120] sm:$0xff]  }
 0x2fb   : > { %v10308_v51 = vpop.eup %7400  ;;  %7420 = vrcp.f32 %v2426_v8  ;;  %v10311_v2 = vadd.f32 %v4676_v43, %v11533_v37  ;;  %v4519_v4 = vadd.f32 1.0, %v7399_v30  ;;  %v5880_v3 = vmul.f32 -1.442695, %v11535_v17  ;;  %v10321_v8 = vpop.f32.mrb[44].mxu0  ;;  %v11538_v48 = vld [vmem:[#allocation68_spill] sm:$0xff]  ;;  %v11541_v56 = vld [vmem:[#allocation105_spill] sm:$0xff] }
 0x2fc   : > { %11532 = vst [vmem:[#allocation81_spill] sm:$0xff] %v10308_v51  ;;  %v7403_v6 = vpop.eup %7402  ;;  %7422 = vrcp.f32 %v2239_v49  ;;  %v10316_v44 = vadd.f32 %v10085_v62, %v11536_v40  ;;  %11537 = vst [vmem:[#allocation29_spill] sm:$0xff] %v10321_v8  ;;  %v10323_v43 = vpop.f32.mrb[156].mxu1  ;;  %v5669_v49 = vmul.f32 -1.442695, %v6631_v23  ;;  %v6145_v8 = vunpack.c.l.bf16 %v10319_v9 }
 0x2fd   : > { %11534 = vst [vmem:[#allocation65_spill] sm:$0xff] %v10311_v2  ;;  %v7405_v24 = vpop.eup %7404  ;;  %v4674_v25 = vmul.f32 %v7403_v6, %v6138_v32  ;;  %7424 = vrcp.f32 %v4519_v4  ;;  %v10328_v17 = vpop.f32.mrb[45].mxu0  ;;  %v11543_v4 = vld [vmem:[#allocation120_spill] sm:$0xff] }
 0x2fe   : > { %v7407_v30 = vpop.eup %7406  ;;  %v10326_v37 = vmul.f32 %v7405_v24, %v11538_v48  ;;  %7426 = vpow2.f32 %v5877_v15  ;;  %11540 = vst [vmem:[#allocation32_spill] sm:$0xff] %v10328_v17  ;;  %v10330_v62 = vpop.f32.mrb[157].mxu1  ;;  %v6638_v51 = vadd.f32 %v11543_v4, %v9938_v57  ;;  %v11544_v24 = vld [vmem:[#allocation55_spill] sm:$0xff] }
 0x2ff   : > { %v7409_v40 = vpop.eup %7408  ;;  %v10333_v32 = vadd.f32 %v4674_v25, %v11541_v56  ;;  %v4679_v6 = vmul.f32 %v7407_v30, %v6149_v61  ;;  %7428 = vpow2.f32 %v5640_v13  ;;  %v10340_v23 = vadd.f32 %v10107_v11, %v11544_v24  ;;  %v10342_v15 = vpop.f32.mrb[46].mxu0  ;;  %v11547_v25 = vld [vmem:[#allocation30_spill] sm:$0xff]  ;;  %v11549_v30 = vld [vmem:[#allocation140_spill] sm:$0xff] }
 0x300   : > { %11539 = vst [vmem:[#allocation111_spill] sm:$0xff] %v10326_v37  ;;  %v7411_v2 = vpop.eup %7410  ;;  %7430 = vpow2.f32 %v5880_v3  ;;  %11546 = vst [vmem:[#allocation39_spill] sm:$0xff] %v10342_v15  ;;  %v10344_v48 = vpop.f32.mrb[158].mxu1  ;;  %v5878_v56 = vmul.f32 -1.442695, %v11549_v30  ;;  %v11550_v3 = vld [vmem:[#allocation45_spill] sm:$0xff]  ;;  %v6150_v24 = vunpack.c.h.bf16 %v10281_v5 }
 0x301   : > { %11542 = vst [vmem:[#allocation76_spill] sm:$0xff] %v10333_v32  ;;  %11545 = vst [vmem:[#allocation26_spill] sm:$0xff] %v10340_v23  ;;  %v7413_v17 = vpop.eup %7412  ;;  %7432 = vrcp.f32 %v2427_v28  ;;  %v10347_v61 = vadd.f32 %v4679_v6, %v11547_v25  ;;  %v4517_v13 = vadd.f32 1.0, %v7411_v2  ;;  %v10352_v37 = vadd.f32 %v10127_v60, %v11550_v3  ;;  %v11552_v25 = vld [vmem:[#allocation59_spill] sm:$0xff] }
 0x302   : > { %v7415_v4 = vpop.eup %7414  ;;  %7434 = vpow2.f32 %v5669_v49  ;;  %v2240_v32 = vadd.f32 1.0, %v7413_v17  ;;  %v5641_v15 = vmul.f32 -1.442695, %v6638_v51  ;;  %v2428_v28 = vadd.f32 1.0, %v7409_v40  ;;  %v11553_v17 = vld [vmem:[#allocation110_spill] sm:$0xff]  ;;  %v11554_v3 = vld [vmem:[#allocation143_spill] sm:$0xff] }
 0x303   : > { %11548 = vst [vmem:[#allocation98_spill] sm:$0xff] %v10347_v61  ;;  %11551 = vst [vmem:[#allocation132_spill] sm:$0xff] %v10352_v37  ;;  %v7417_v11 = vpop.eup %7416  ;;  %7436 = vrcp.f32 %v4517_v13  ;;  %v10357_v2 = vadd.f32 %v10146_v14, %v11552_v25  ;;  %v6633_v60 = vadd.f32 %v11553_v17, %v10124_v16  ;;  %v5883_v61 = vmul.f32 -1.442695, %v11554_v3  ;;  %v11555_v40 = vld [vmem:[#allocation40_spill] sm:$0xff]  ;;  %v11559_v14 = vld [vmem:[#allocation47_spill] sm:$0xff] }
 0x304   : > { %v7419_v23 = vpop.eup %7418  ;;  %7438 = vrcp.f32 %v2240_v32  ;;  %v4522_v6 = vadd.f32 1.0, %v7417_v11  ;;  %v2429_v13 = vadd.f32 1.0, %v7415_v4  ;;  %v11557_v11 = vld [vmem:[#allocation70_spill] sm:$0xff]  ;;  %v11560_v25 = vld [vmem:[#allocation124_spill] sm:$0xff]  ;;  %v10378_v17 = vpop.f32.mrb[159].mxu1 }
 0x305   : > { %v10359_v30 = vpop.eup %7420  ;;  %v4677_v49 = vmul.f32 %v7419_v23, %v6145_v8  ;;  %7440 = vpow2.f32 %v5878_v56  ;;  %v10372_v8 = vadd.f32 %v10162_v53, %v11559_v14  ;;  %v6640_v4 = vadd.f32 %v11560_v25, %v9938_v57  ;;  %v11562_v53 = vld [vmem:[#allocation92_spill] sm:$0xff] }
 0x306   : > { %v7423_v5 = vpop.eup %7422  ;;  %7442 = vrcp.f32 %v4522_v6  ;;  %v10376_v6 = vpop.f32.mrb[47].mxu0  ;;  %v5670_v3 = vmul.f32 -1.442695, %v6633_v60 }
 0x307   : > { %v7425_v51 = vpop.eup %7424  ;;  %v10365_v32 = vadd.f32 %v4677_v49, %v11555_v40  ;;  %v10368_v37 = vmul.f32 %v7423_v5, %v11557_v11  ;;  %7444 = vpow2.f32 %v5641_v15  ;;  %11561 = vst [vmem:[#allocation66_spill] sm:$0xff] %v10376_v6  ;;  %v6146_v5 = vunpack.c.h.bf16 %v10319_v9 }
 0x308   : > { %v7427_v23 = vpop.eup %7426  ;;  %7446 = vrcp.f32 %v2428_v28  ;;  %v4680_v56 = vmul.f32 %v7425_v51, %v6150_v24  ;;  %v10385_v28 = vld [vmem:[%s8372_s12 + $0x138] sm:$0xff]   ;;  %v11564_v51 = vld [vmem:[#allocation69_spill] sm:$0xff]  ;;  %v5881_v9 = vmul.f32 -1.442695, %v9975_v31 }
 0x309   : > { %11556 = vst [vmem:[#allocation114_spill] sm:$0xff] %v10365_v32  ;;  %11558 = vst [vmem:[#allocation101_spill] sm:$0xff] %v10368_v37  ;;  %v7429_v49 = vpop.eup %7428  ;;  %v4520_v15 = vadd.f32 1.0, %v7427_v23  ;;  %7448 = vpow2.f32 %v5883_v61  ;;  %v10389_v14 = vadd.f32 %v10213_v33, %v11564_v51 }
 0x30a   : > { %v7431_v40 = vpop.eup %7430  ;;  %7450 = vrcp.f32 %v2429_v13  ;;  %v10382_v11 = vadd.f32 %v4680_v56, %v11562_v53  ;;  %v2241_v24 = vadd.f32 1.0, %v7429_v49  ;;  %v5642_v13 = vmul.f32 -1.442695, %v6640_v4  ;;  %v11566_v53 = vld [vmem:[#allocation64_spill] sm:$0xff] }
 0x30b   : > { %v10391_v25 = vpop.eup %7432  ;;  %7452 = vrcp.f32 %v4520_v15  ;;  %v4523_v60 = vadd.f32 1.0, %v7431_v40  ;;  %v6157_v56 = vunpack.c.l.bf16 %v10385_v28  ;;  %v5884_v49 = vmul.f32 -1.442695, %v10007_v50  ;;  %v10401_v15 = vld [vmem:[%s8372_s12 + $0x130] sm:$0xff]   ;;  %v11567_v40 = vld [vmem:[#allocation71_spill] sm:$0xff]  ;;  %v11569_v50 = vld [vmem:[#allocation24_spill] sm:$0xff] }
 0x30c   : > { %11563 = vst [vmem:[#allocation35_spill] sm:$0xff] %v10382_v11  ;;  %11565 = vst [vmem:[#allocation108_spill] sm:$0xff] %v10391_v25  ;;  %v7435_v61 = vpop.eup %7434  ;;  %7454 = vrcp.f32 %v2241_v24  ;;  %v10398_v33 = vadd.f32 %v10236_v38, %v11566_v53  ;;  %v10405_v31 = vadd.f32 %v10274_v18, %v11567_v40  ;;  %v11568_v11 = vld [vmem:[#allocation72_spill] sm:$0xff]  ;;  %v11570_v53 = vld [vmem:[#allocation109_spill] sm:$0xff]  ;;  %v6158_v25 = vunpack.c.h.bf16 %v10385_v28 }
 0x30d   : > { %v7437_v23 = vpop.eup %7436  ;;  %7456 = vrcp.f32 %v4523_v60  ;;  %v2430_v24 = vadd.f32 1.0, %v7435_v61  ;;  %v6635_v60 = vadd.f32 %v11569_v50, %v10124_v16  ;;  %v6153_v61 = vunpack.c.l.bf16 %v10401_v15 }
 0x30e   : > { %v7439_v51 = vpop.eup %7438  ;;  %7458 = vpow2.f32 %v5670_v3  ;;  %v4678_v6 = vmul.f32 %v7437_v23, %v6146_v5  ;;  %v11572_v5 = vld [vmem:[#allocation128_spill] sm:$0xff] }
 0x30f   : > { %v7441_v4 = vpop.eup %7440  ;;  %v10408_v32 = vmul.f32 %v7439_v51, %v11568_v11  ;;  %7460 = vpow2.f32 %v5881_v9  ;;  %v6642_v23 = vadd.f32 %v11572_v5, %v9938_v57  ;;  %v5882_v11 = vmul.f32 -1.442695, %v10027_v29  ;;  %v11573_v9 = vld [vmem:[#allocation115_spill] sm:$0xff]  ;;  %v6592_v29 = vpop.f32.mrb[160].mxu1 }
 0x310   : > { %v7443_v38 = vpop.eup %7442  ;;  %v10413_v37 = vadd.f32 %v4678_v6, %v11570_v53  ;;  %v4521_v3 = vadd.f32 1.0, %v7441_v4  ;;  %7462 = vpow2.f32 %v5642_v13  ;;  %v6637_v50 = vadd.f32 %v11573_v9, %v10124_v16  ;;  %v11574_v53 = vld [vmem:[#allocation67_spill] sm:$0xff] }
 0x311   : > { %v7445_v18 = vpop.eup %7444  ;;  %v4683_v40 = vmul.f32 %v7443_v38, %v6157_v56  ;;  %7464 = vpow2.f32 %v5884_v49  ;;  %v10425_v13 = vadd.f32 %v10297_v7, %v11574_v53  ;;  %v11575_v5 = vld [vmem:[#allocation27_spill] sm:$0xff]  ;;  %v5671_v38 = vmul.f32 -1.442695, %v6635_v60  ;;  %v10430_v49 = vpop.f32.mrb[48].mxu0  ;;  %v11580_v53 = vld [vmem:[#allocation82_spill] sm:$0xff] }
 0x312   : > { %11571 = vst [vmem:[#allocation135_spill] sm:$0xff] %v10413_v37  ;;  %v10419_v51 = vpop.eup %7446  ;;  %7466 = vrcp.f32 %v4521_v3  ;;  %v2242_v6 = vadd.f32 1.0, %v7445_v18  ;;  %11577 = vst [vmem:[#allocation103_spill] sm:$0xff] %v10430_v49  ;;  %v5643_v18 = vmul.f32 -1.442695, %v6642_v23  ;;  %v10435_v9 = vpop.f32.mrb[49].mxu0 }
 0x313   : > { %v7449_v4 = vpop.eup %7448  ;;  %7468 = vrcp.f32 %v2430_v24  ;;  %v10428_v56 = vadd.f32 %v4683_v40, %v11575_v5  ;;  %11579 = vst [vmem:[#allocation38_spill] sm:$0xff] %v10435_v9  ;;  %v5887_v24 = vmul.f32 -1.442695, %v10080_v54  ;;  %v10440_v40 = vadd.f32 %v10323_v43, %v11580_v53  ;;  %v3612_v60 = vpop.f32.mrb[161].mxu1  ;;  %v11586_v53 = vld [vmem:[#allocation131_spill] sm:$0xff] }
 0x314   : > { %v10432_v37 = vpop.eup %7450  ;;  %7470 = vrcp.f32 %v2242_v6  ;;  %v4526_v3 = vadd.f32 1.0, %v7449_v4  ;;  %v10442_v5 = vpop.f32.mrb[50].mxu0  ;;  %v5672_v28 = vmul.f32 -1.442695, %v6637_v50  ;;  %v11583_v6 = vld [vmem:[#allocation74_spill] sm:$0xff]  ;;  %v6644_v9 = vadd.f32 %v11586_v53, %v9938_v57 }
 0x315   : > { %11576 = vst [vmem:[#allocation41_spill] sm:$0xff] %v10428_v56  ;;  %11578 = vst [vmem:[#allocation137_spill] sm:$0xff] %v10432_v37  ;;  %v7453_v7 = vpop.eup %7452  ;;  %7472 = vpow2.f32 %v5882_v11  ;;  %v10446_v23 = vadd.f32 %v10330_v62, %v11583_v6  ;;  %v11585_v11 = vld [vmem:[#allocation79_spill] sm:$0xff]  ;;  %v5885_v43 = vmul.f32 -1.442695, %v10094_v55  ;;  %v11587_v37 = vld [vmem:[#allocation112_spill] sm:$0xff] }
 0x316   : > { %11581 = vst [vmem:[#allocation68_spill] sm:$0xff] %v10440_v40  ;;  %11582 = vst [vmem:[#allocation105_spill] sm:$0xff] %v10442_v5  ;;  %v7455_v56 = vpop.eup %7454  ;;  %v4681_v49 = vmul.f32 %v7453_v7, %v6153_v61  ;;  %7474 = vrcp.f32 %v4526_v3  ;;  %v6593_v40 = vpop.f32.mrb[162].mxu1  ;;  %v10458_v3 = vld [vmem:[%s8372_s12 + $0x148] sm:$0xff]   ;;  %v11591_v6 = vld [vmem:[#allocation142_spill] sm:$0xff] }
 0x317   : > { %11584 = vst [vmem:[#allocation120_spill] sm:$0xff] %v10446_v23  ;;  %v7457_v4 = vpop.eup %7456  ;;  %7476 = vpow2.f32 %v5671_v38  ;;  %v10449_v54 = vmul.f32 %v7455_v56, %v11585_v11  ;;  %v6154_v38 = vunpack.c.h.bf16 %v10401_v15  ;;  %v11589_v56 = vld [vmem:[#allocation84_spill] sm:$0xff]  ;;  %v6165_v15 = vunpack.c.l.bf16 %v10458_v3 }
 0x318   : > { %v7459_v5 = vpop.eup %7458  ;;  %v10455_v61 = vadd.f32 %v4681_v49, %v11587_v37  ;;  %v4684_v50 = vmul.f32 %v7457_v4, %v6158_v25  ;;  %7478 = vpow2.f32 %v5643_v18  ;;  %v10463_v7 = vadd.f32 %v10344_v48, %v11589_v56  ;;  %v11593_v37 = vld [vmem:[#allocation122_spill] sm:$0xff]  ;;  %v10470_v4 = vpop.f32.mrb[51].mxu0 }
 0x319   : > { %v7461_v62 = vpop.eup %7460  ;;  %7480 = vpow2.f32 %v5887_v24  ;;  %v6639_v49 = vadd.f32 %v11593_v37, %v10124_v16  ;;  %11594 = vst [vmem:[#allocation45_spill] sm:$0xff] %v10470_v4  ;;  %v3615_v18 = vpop.f32.mrb[163].mxu1  ;;  %v2431_v56 = vadd.f32 1.0, %v7459_v5  ;;  %v5888_v4 = vmul.f32 -1.442695, %v10120_v34  ;;  %v11597_v5 = vld [vmem:[#allocation119_spill] sm:$0xff] }
 0x31a   : > { %11588 = vst [vmem:[#allocation55_spill] sm:$0xff] %v10455_v61  ;;  %11590 = vst [vmem:[#allocation30_spill] sm:$0xff] %v10463_v7  ;;  %v7463_v55 = vpop.eup %7462  ;;  %v10466_v11 = vadd.f32 %v4684_v50, %v11591_v6  ;;  %7482 = vpow2.f32 %v5672_v28  ;;  %v4524_v25 = vadd.f32 1.0, %v7461_v62  ;;  %v5644_v61 = vmul.f32 -1.442695, %v6644_v9  ;;  %v11595_v6 = vld [vmem:[#allocation78_spill] sm:$0xff] }
 0x31b   : > { %v7465_v53 = vpop.eup %7464  ;;  %v2243_v24 = vadd.f32 1.0, %v7463_v55  ;;  %7484 = vpow2.f32 %v5885_v43  ;;  %v10475_v28 = vadd.f32 %v10378_v17, %v11595_v6  ;;  %v5673_v9 = vmul.f32 -1.442695, %v6639_v49  ;;  %v10490_v17 = vld [vmem:[%s8372_s12 + $0x140] sm:$0xff]   ;;  %v11601_v49 = vld [vmem:[#allocation88_spill] sm:$0xff] }
 0x31c   : > { %11592 = vst [vmem:[#allocation140_spill] sm:$0xff] %v10466_v11  ;;  %v7467_v48 = vpop.eup %7466  ;;  %7486 = vrcp.f32 %v4524_v25  ;;  %v4527_v50 = vadd.f32 1.0, %v7465_v53  ;;  %v11596_v11 = vld [vmem:[#allocation94_spill] sm:$0xff]  ;;  %v11599_v53 = vld [vmem:[#allocation91_spill] sm:$0xff] }
 0x31d   : > { %v10477_v37 = vpop.eup %7468  ;;  %v4682_v62 = vmul.f32 %v7467_v48, %v6154_v38  ;;  %7488 = vrcp.f32 %v2243_v24  ;;  %v10481_v7 = vadd.f32 %v6592_v29, %v11596_v11  ;;  %v11600_v38 = vld [vmem:[#allocation126_spill] sm:$0xff]  ;;  %v5886_v11 = vmul.f32 -1.442695, %v10144_v21 }
 0x31e   : > { %v7471_v43 = vpop.eup %7470  ;;  %7490 = vrcp.f32 %v4527_v50  ;;  %v6641_v24 = vadd.f32 %v11600_v38, %v10124_v16  ;;  %v10496_v48 = vadd.f32 %v3612_v60, %v11601_v49 }
 0x31f   : > { %v7473_v55 = vpop.eup %7472  ;;  %v10484_v25 = vadd.f32 %v4682_v62, %v11597_v5  ;;  %v10487_v23 = vmul.f32 %v7471_v43, %v11599_v53  ;;  %7492 = vpow2.f32 %v5644_v61  ;;  %v11602_v62 = vld [vmem:[#allocation138_spill] sm:$0xff]  ;;  %v11603_v5 = vld [vmem:[#allocation95_spill] sm:$0xff]  ;;  %v6161_v61 = vunpack.c.l.bf16 %v10490_v17 }
 0x320   : > { %v7475_v34 = vpop.eup %7474  ;;  %7494 = vrcp.f32 %v2431_v56  ;;  %v4525_v29 = vadd.f32 1.0, %v7473_v55  ;;  %v6646_v43 = vadd.f32 %v11602_v62, %v9938_v57  ;;  %v10501_v53 = vadd.f32 %v6593_v40, %v11603_v5  ;;  %v11605_v55 = vld [vmem:[#allocation145_spill] sm:$0xff]  ;;  %v11607_v62 = vld [vmem:[#allocation90_spill] sm:$0xff] }
 0x321   : > { %11598 = vst [vmem:[#allocation59_spill] sm:$0xff] %v10484_v25  ;;  %v7477_v50 = vpop.eup %7476  ;;  %v4687_v6 = vmul.f32 %v7475_v34, %v6165_v15  ;;  %7496 = vpow2.f32 %v5888_v4  ;;  %v5674_v21 = vmul.f32 -1.442695, %v6641_v24  ;;  %v6166_v34 = vunpack.c.h.bf16 %v10458_v3  ;;  %v11608_v3 = vld [vmem:[#allocation141_spill] sm:$0xff] }
 0x322   : > { %11604 = vst [vmem:[#allocation110_spill] sm:$0xff] %v10501_v53  ;;  %v7479_v25 = vpop.eup %7478  ;;  %7498 = vrcp.f32 %v4525_v29  ;;  %v5645_v40 = vmul.f32 -1.442695, %v6646_v43  ;;  %v10509_v5 = vadd.f32 %v3615_v18, %v11607_v62  ;;  %v2432_v24 = vadd.f32 1.0, %v7477_v50 }
 0x323   : > { %v7481_v56 = vpop.eup %7480  ;;  %v10505_v38 = vadd.f32 %v4687_v6, %v11605_v55  ;;  %7500 = vpow2.f32 %v5673_v9  ;;  %v2244_v60 = vadd.f32 1.0, %v7479_v25  ;;  %v5891_v6 = vmul.f32 -1.442695, %v10172_v45  ;;  %v10512_v55 = vpop.f32.mrb[52].mxu0  ;;  %v11611_v45 = vld [vmem:[#allocation102_spill] sm:$0xff] }
 0x324   : > { %v7483_v49 = vpop.eup %7482  ;;  %v4530_v15 = vadd.f32 1.0, %v7481_v56  ;;  %7502 = vpow2.f32 %v5886_v11  ;;  %v6596_v9 = vpop.f32.mrb[164].mxu1  ;;  %v6648_v11 = vadd.f32 %v11608_v3, %v9938_v57  ;;  %v5889_v3 = vmul.f32 -1.442695, %v10183_v36 }
 0x325   : > { %11606 = vst [vmem:[#allocation143_spill] sm:$0xff] %v10505_v38  ;;  %v7485_v4 = vpop.eup %7484  ;;  %7504 = vrcp.f32 %v2244_v60  ;;  %v10516_v43 = vpop.f32.mrb[53].mxu0  ;;  %v11610_v60 = vld [vmem:[#allocation93_spill] sm:$0xff] }
 0x326   : > { %v7487_v53 = vpop.eup %7486  ;;  %7506 = vrcp.f32 %v4530_v15  ;;  %v4528_v29 = vadd.f32 1.0, %v7485_v4  ;;  %11609 = vst [vmem:[#allocation40_spill] sm:$0xff] %v10516_v43  ;;  %v6162_v15 = vunpack.c.h.bf16 %v10490_v17  ;;  %v10523_v4 = vadd.f32 %v6596_v9, %v11611_v45  ;;  %v3628_v38 = vpop.f32.mrb[165].mxu1  ;;  %v11615_v17 = vld [vmem:[#allocation129_spill] sm:$0xff] }
 0x327   : > { %v7489_v25 = vpop.eup %7488  ;;  %v4685_v56 = vmul.f32 %v7487_v53, %v6161_v61  ;;  %7508 = vpow2.f32 %v5674_v21  ;;  %v11613_v53 = vld [vmem:[#allocation127_spill] sm:$0xff]  ;;  %v10536_v9 = vpop.f32.mrb[54].mxu0 }
 0x328   : > { %v7491_v18 = vpop.eup %7490  ;;  %v10519_v62 = vmul.f32 %v7489_v25, %v11610_v60  ;;  %7510 = vrcp.f32 %v4528_v29  ;;  %11612 = vst [vmem:[#allocation70_spill] sm:$0xff] %v10523_v4  ;;  %v10532_v25 = vld [vmem:[%s8372_s12 + $0x158] sm:$0xff]   ;;  %v6643_v29 = vadd.f32 %v11615_v17, %v10124_v16  ;;  %11616 = vst [vmem:[#allocation124_spill] sm:$0xff] %v10536_v9  ;;  %v6597_v36 = vpop.f32.mrb[166].mxu1  ;;  %v10545_v4 = vld [vmem:[%s8372_s12 + $0x150] sm:$0xff]  }
 0x329   : > { %v7493_v50 = vpop.eup %7492  ;;  %v10526_v61 = vadd.f32 %v4685_v56, %v11613_v53  ;;  %v4688_v21 = vmul.f32 %v7491_v18, %v6166_v34  ;;  %7512 = vpow2.f32 %v5645_v40  ;;  %v11617_v56 = vld [vmem:[#allocation150_spill] sm:$0xff]  ;;  %v5646_v34 = vmul.f32 -1.442695, %v6648_v11  ;;  %v11620_v11 = vld [vmem:[#allocation144_spill] sm:$0xff] }
 0x32a   : > { %v10529_v43 = vpop.eup %7494  ;;  %v2245_v60 = vadd.f32 1.0, %v7493_v50  ;;  %7514 = vpow2.f32 %v5891_v6  ;;  %v10542_v40 = vadd.f32 %v3628_v38, %v9494_v1  ;;  %v10548_v6 = vadd.f32 %v6597_v36, %v9630_v39  ;;  %v10553_v1 = vpop.f32.mrb[55].mxu0 }
 0x32b   : > { %11614 = vst [vmem:[#allocation47_spill] sm:$0xff] %v10526_v61  ;;  %v7497_v45 = vpop.eup %7496  ;;  %7516 = vrcp.f32 %v2432_v24  ;;  %v10539_v53 = vadd.f32 %v4688_v21, %v11617_v56  ;;  %v2433_v61 = vadd.f32 1.0, %v7483_v49  ;;  %v6173_v24 = vunpack.c.l.bf16 %v10532_v25  ;;  %11621 = vst [vmem:[#allocation64_spill] sm:$0xff] %v10553_v1  ;;  %v3631_v38 = vpop.f32.mrb[167].mxu1 }
 0x32c   : > { %v7499_v18 = vpop.eup %7498  ;;  %7518 = vrcp.f32 %v2245_v60  ;;  %v4531_v17 = vadd.f32 1.0, %v7497_v45  ;;  %11619 = vst [vmem:[#allocation69_spill] sm:$0xff] %v10548_v6  ;;  %v6650_v21 = vadd.f32 %v11620_v11, %v9938_v57  ;;  %v5675_v49 = vmul.f32 -1.442695, %v6643_v29 }
 0x32d   : > { %11618 = vst [vmem:[#allocation92_spill] sm:$0xff] %v10539_v53  ;;  %v7501_v50 = vpop.eup %7500  ;;  %v4686_v9 = vmul.f32 %v7499_v18, %v6162_v15  ;;  %7520 = vpow2.f32 %v5889_v3  ;;  %v5892_v60 = vmul.f32 -1.442695, %v10190_v63  ;;  %v11622_v53 = vld [vmem:[#allocation130_spill] sm:$0xff]  ;;  %v6169_v15 = vunpack.c.l.bf16 %v10545_v4  ;;  %v11623_v18 = vld [vmem:[#allocation100_spill] sm:$0xff] }
 0x32e   : > { %v7503_v56 = vpop.eup %7502  ;;  %7522 = vrcp.f32 %v4531_v17  ;;  %v5890_v1 = vmul.f32 -1.442695, %v10209_v20  ;;  %v5647_v17 = vmul.f32 -1.442695, %v6650_v21  ;;  %v10565_v63 = vadd.f32 %v3631_v38, %v11468_v58 }
 0x32f   : > { %v7505_v45 = vpop.eup %7504  ;;  %v10557_v39 = vadd.f32 %v4686_v9, %v11622_v53  ;;  %v4529_v36 = vadd.f32 1.0, %v7503_v56  ;;  %7524 = vpow2.f32 %v5646_v34  ;;  %v5895_v38 = vmul.f32 -1.442695, %v10223_v26 }
 0x330   : > { %v7507_v3 = vpop.eup %7506  ;;  %7526 = vrcp.f32 %v2433_v61  ;;  %v10561_v11 = vmul.f32 %v7505_v45, %v11623_v18  ;;  %v2434_v45 = vadd.f32 1.0, %v7501_v50  ;;  %v6174_v18 = vunpack.c.h.bf16 %v10532_v25 }
 0x331   : > { %v7509_v6 = vpop.eup %7508  ;;  %v4691_v29 = vmul.f32 %v7507_v3, %v6173_v24  ;;  %7528 = vrcp.f32 %v4529_v36  ;;  %v11627_v36 = vld [vmem:[#allocation83_spill] sm:$0xff] }
 0x332   : > { %v7511_v9 = vpop.eup %7510  ;;  %7530 = vpow2.f32 %v5892_v60  ;;  %v2435_v50 = vadd.f32 1.0, %v7509_v6  ;;  %v5893_v6 = vmul.f32 -1.442695, %v10234_v12 }
 0x333   : > { %v7513_v53 = vpop.eup %7512  ;;  %v10568_v56 = vadd.f32 %v4691_v29, %v10103_v41  ;;  %7532 = vpow2.f32 %v5675_v49  ;;  %v4689_v61 = vmul.f32 %v7511_v9, %v6169_v15  ;;  %v11626_v41 = vld [vmem:[#allocation146_spill] sm:$0xff]  ;;  %v6170_v29 = vunpack.c.h.bf16 %v10545_v4  ;;  %v6600_v9 = vpop.f32.mrb[168].mxu1 }
 0x334   : > { %v7515_v34 = vpop.eup %7514  ;;  %v2246_v20 = vadd.f32 1.0, %v7513_v53  ;;  %7534 = vpow2.f32 %v5890_v1  ;;  %v6652_v49 = vadd.f32 %v11626_v41, %v9938_v57  ;;  %v10597_v41 = vld [vmem:[%s8372_s12 + $0x168] sm:$0xff]  }
 0x335   : > { %11624 = vst [vmem:[#allocation71_spill] sm:$0xff] %v10568_v56  ;;  %v10571_v24 = vpop.eup %7516  ;;  %v10574_v21 = vadd.f32 %v4689_v61, %v10098_v47  ;;  %v4534_v58 = vadd.f32 1.0, %v7515_v34  ;;  %7536 = vpow2.f32 %v5647_v17  ;;  %v11628_v47 = vld [vmem:[#allocation133_spill] sm:$0xff]  ;;  %v10585_v17 = vpop.f32.mrb[56].mxu0  ;;  %v10589_v34 = vadd.f32 %v6600_v9, %v11476_v10 }
 0x336   : > { %v7519_v60 = vpop.eup %7518  ;;  %7538 = vrcp.f32 %v2246_v20  ;;  %v6645_v3 = vadd.f32 %v11628_v47, %v10124_v16  ;;  %v10599_v12 = vpop.f32.mrb[57].mxu0 }
 0x337   : > { %11625 = vst [vmem:[#allocation72_spill] sm:$0xff] %v10574_v21  ;;  %v7521_v15 = vpop.eup %7520  ;;  %v10580_v25 = vmul.f32 %v7519_v60, %v11627_v36  ;;  %7540 = vrcp.f32 %v4534_v58  ;;  %v5648_v58 = vmul.f32 -1.442695, %v6652_v49  ;;  %11630 = vst [vmem:[#allocation109_spill] sm:$0xff] %v10599_v12  ;;  %v3644_v10 = vpop.f32.mrb[169].mxu1 }
 0x338   : > { %v7523_v1 = vpop.eup %7522  ;;  %7542 = vrcp.f32 %v2434_v45  ;;  %v4532_v26 = vadd.f32 1.0, %v7521_v15  ;;  %v10605_v49 = vadd.f32 %v3644_v10, %v11481_v19  ;;  %v10616_v19 = vpop.f32.mrb[58].mxu0 }
 0x339   : > { %v7525_v53 = vpop.eup %7524  ;;  %v4692_v61 = vmul.f32 %v7523_v1, %v6174_v18  ;;  %7544 = vpow2.f32 %v5895_v38  ;;  %v5676_v38 = vmul.f32 -1.442695, %v6645_v3  ;;  %v10602_v1 = vld [vmem:[%s8372_s12 + $0x160] sm:$0xff]   ;;  %v6601_v10 = vpop.f32.mrb[170].mxu1 }
 0x33a   : > { %v10591_v45 = vpop.eup %7526  ;;  %7546 = vrcp.f32 %v4532_v26  ;;  %v2247_v20 = vadd.f32 1.0, %v7525_v53  ;;  %v6181_v26 = vunpack.c.l.bf16 %v10597_v41  ;;  %v11632_v3 = vld [vmem:[#allocation139_spill] sm:$0xff] }
 0x33b   : > { %v7529_v4 = vpop.eup %7528  ;;  %7548 = vrcp.f32 %v2435_v50  ;;  %v10594_v60 = vadd.f32 %v4692_v61, %v10153_v52  ;;  %v5896_v61 = vmul.f32 -1.442695, %v10258_v0  ;;  %v10624_v0 = vadd.f32 %v6601_v10, %v11484_v42 }
 0x33c   : > { %v7531_v18 = vpop.eup %7530  ;;  %v4690_v15 = vmul.f32 %v7529_v4, %v6170_v29  ;;  %7550 = vrcp.f32 %v2247_v20  ;;  %v6647_v29 = vadd.f32 %v11632_v3, %v10124_v16  ;;  %v11634_v3 = vld [vmem:[#allocation37_spill] sm:$0xff] }
 0x33d   : > { %11629 = vst [vmem:[#allocation24_spill] sm:$0xff] %v10594_v60  ;;  %v7533_v36 = vpop.eup %7532  ;;  %v4535_v47 = vadd.f32 1.0, %v7531_v18  ;;  %7552 = vpow2.f32 %v5893_v6  ;;  %v11633_v6 = vld [vmem:[#allocation85_spill] sm:$0xff]  ;;  %11635 = vst [vmem:[#allocation115_spill] sm:$0xff] %v10624_v0 }
 0x33e   : > { %v7535_v50 = vpop.eup %7534  ;;  %v10608_v52 = vadd.f32 %v4690_v15, %v10155_v27  ;;  %7554 = vpow2.f32 %v5648_v58  ;;  %v6654_v20 = vadd.f32 %v11633_v6, %v9938_v57  ;;  %v2436_v18 = vadd.f32 1.0, %v7533_v36 }
 0x33f   : > { %v7537_v9 = vpop.eup %7536  ;;  %7556 = vrcp.f32 %v4535_v47  ;;  %v4533_v53 = vadd.f32 1.0, %v7535_v50  ;;  %v6177_v27 = vunpack.c.l.bf16 %v10602_v1  ;;  %v5894_v47 = vmul.f32 -1.442695, %v10267_v35  ;;  %v11639_v35 = vld [vmem:[#allocation75_spill] sm:$0xff] }
 0x340   : > { %11631 = vst [vmem:[#allocation128_spill] sm:$0xff] %v10608_v52  ;;  %v7539_v4 = vpop.eup %7538  ;;  %7558 = vpow2.f32 %v5676_v38  ;;  %v2248_v15 = vadd.f32 1.0, %v7537_v9  ;;  %v5677_v38 = vmul.f32 -1.442695, %v6647_v29  ;;  %v5649_v52 = vmul.f32 -1.442695, %v6654_v20 }
 0x341   : > { %v7541_v12 = vpop.eup %7540  ;;  %v10620_v58 = vmul.f32 %v7539_v4, %v11634_v3  ;;  %7560 = vrcp.f32 %v4533_v53  ;;  %v10628_v9 = vpop.f32.mrb[59].mxu0  ;;  %v11637_v4 = vld [vmem:[#allocation77_spill] sm:$0xff]  ;;  %v6649_v53 = vadd.f32 %v11639_v35, %v10124_v16 }
 0x342   : > { %v10626_v50 = vpop.eup %7542  ;;  %v4695_v6 = vmul.f32 %v7541_v12, %v6181_v26  ;;  %7562 = vrcp.f32 %v2248_v15  ;;  %11636 = vst [vmem:[#allocation67_spill] sm:$0xff] %v10628_v9  ;;  %v5931_v12 = vmul.f32 -1.442695, %v10272_v59  ;;  %v3647_v26 = vpop.f32.mrb[171].mxu1  ;;  %v11640_v20 = vld [vmem:[#allocation89_spill] sm:$0xff]  ;;  %v10652_v9 = vld [vmem:[%s8372_s12 + $0x178] sm:$0xff]  }
 0x343   : > { %v7545_v36 = vpop.eup %7544  ;;  %7564 = vpow2.f32 %v5896_v61  ;;  %v6182_v61 = vunpack.c.h.bf16 %v10597_v41  ;;  %v10642_v15 = vadd.f32 %v3647_v26, %v11494_v46  ;;  %v6178_v41 = vunpack.c.h.bf16 %v10602_v1  ;;  %v11645_v46 = vld [vmem:[#allocation80_spill] sm:$0xff] }
 0x344   : > { %v7547_v60 = vpop.eup %7546  ;;  %7566 = vrcp.f32 %v2436_v18  ;;  %v10631_v3 = vadd.f32 %v4695_v6, %v11637_v4  ;;  %v4538_v42 = vadd.f32 1.0, %v7545_v36  ;;  %v6656_v18 = vadd.f32 %v11640_v20, %v9938_v57  ;;  %v11642_v36 = vld [vmem:[#allocation148_spill] sm:$0xff] }
 0x345   : > { %v10635_v10 = vpop.eup %7548  ;;  %v4693_v21 = vmul.f32 %v7547_v60, %v6177_v27  ;;  %7568 = vpow2.f32 %v5894_v47  ;;  %11641 = vst [vmem:[#allocation82_spill] sm:$0xff] %v10642_v15  ;;  %v11644_v60 = vld [vmem:[#allocation87_spill] sm:$0xff]  ;;  %v5678_v47 = vmul.f32 -1.442695, %v6649_v53  ;;  %v6651_v26 = vadd.f32 %v11645_v46, %v10124_v16  ;;  %v6604_v53 = vpop.f32.mrb[172].mxu1 }
 0x346   : > { %11638 = vst [vmem:[#allocation27_spill] sm:$0xff] %v10631_v3  ;;  %v7551_v29 = vpop.eup %7550  ;;  %7570 = vrcp.f32 %v4538_v42  ;;  %v5932_v1 = vmul.f32 -1.442695, %v10306_v22  ;;  %v11648_v3 = vld [vmem:[#allocation149_spill] sm:$0xff] }
 0x347   : > { %v7553_v6 = vpop.eup %7552  ;;  %v10645_v4 = vadd.f32 %v4693_v21, %v11642_v36  ;;  %v10648_v27 = vmul.f32 %v7551_v29, %v11644_v60  ;;  %7572 = vpow2.f32 %v5649_v52  ;;  %v11646_v21 = vld [vmem:[#allocation123_spill] sm:$0xff]  ;;  %v5650_v52 = vmul.f32 -1.442695, %v6656_v18 }
 0x348   : > { %v7555_v59 = vpop.eup %7554  ;;  %7574 = vpow2.f32 %v5677_v38  ;;  %v4536_v35 = vadd.f32 1.0, %v7553_v6  ;;  %v5929_v36 = vmul.f32 -1.442695, %v11646_v21  ;;  %v10658_v38 = vpop.f32.mrb[60].mxu0  ;;  %v5679_v18 = vmul.f32 -1.442695, %v6651_v26 }
 0x349   : > { %11643 = vst [vmem:[#allocation74_spill] sm:$0xff] %v10645_v4  ;;  %v7557_v42 = vpop.eup %7556  ;;  %v2249_v20 = vadd.f32 1.0, %v7555_v59  ;;  %7576 = vpow2.f32 %v5931_v12  ;;  %11647 = vst [vmem:[#allocation79_spill] sm:$0xff] %v10658_v38  ;;  %v6189_v59 = vunpack.c.l.bf16 %v10652_v9  ;;  %v11653_v21 = vld [vmem:[#allocation33_spill] sm:$0xff]  ;;  %v11656_v26 = vld [vmem:[#allocation23_spill] sm:$0xff] }
 0x34a   : > { %v7559_v4 = vpop.eup %7558  ;;  %v4696_v29 = vmul.f32 %v7557_v42, %v6182_v61  ;;  %7578 = vrcp.f32 %v4536_v35  ;;  %v11650_v61 = vld [vmem:[#allocation107_spill] sm:$0xff]  ;;  %v11651_v42 = vld [vmem:[#allocation50_spill] sm:$0xff]  ;;  %v11664_v38 = vld [vmem:[#allocation116_spill] sm:$0xff] }
 0x34b   : > { %v7561_v60 = vpop.eup %7560  ;;  %7580 = vrcp.f32 %v2249_v20  ;;  %v10668_v20 = vadd.f32 %v6604_v53, %v11651_v42  ;;  %v11657_v42 = vld [vmem:[#allocation52_spill] sm:$0xff] }
 0x34c   : > { %v7563_v6 = vpop.eup %7562  ;;  %v10661_v15 = vadd.f32 %v4696_v29, %v11648_v3  ;;  %7582 = vpow2.f32 %v5678_v47  ;;  %v4694_v12 = vmul.f32 %v7561_v60, %v6178_v41  ;;  %v10676_v3 = vld [vmem:[%s8372_s12 + $0x170] sm:$0xff]   ;;  %v10678_v41 = vpop.f32.mrb[61].mxu0 }
 0x34d   : > { %v7565_v46 = vpop.eup %7564  ;;  %v10665_v35 = vmul.f32 %v7563_v6, %v11650_v61  ;;  %7584 = vpow2.f32 %v5929_v36  ;;  %11652 = vst [vmem:[#allocation112_spill] sm:$0xff] %v10668_v20  ;;  %11655 = vst [vmem:[#allocation142_spill] sm:$0xff] %v10678_v41  ;;  %v3660_v29 = vpop.f32.mrb[173].mxu1  ;;  %v2437_v6 = vadd.f32 1.0, %v7559_v4  ;;  %v6658_v36 = vadd.f32 %v11656_v26, %v9938_v57 }
 0x34e   : > { %11649 = vst [vmem:[#allocation131_spill] sm:$0xff] %v10661_v15  ;;  %v10670_v22 = vpop.eup %7566  ;;  %v10673_v56 = vadd.f32 %v4694_v12, %v11653_v21  ;;  %v4539_v47 = vadd.f32 1.0, %v7565_v46  ;;  %7586 = vpow2.f32 %v5650_v52  ;;  %v10683_v15 = vadd.f32 %v3660_v29, %v11657_v42 }
 0x34f   : > { %v7569_v60 = vpop.eup %7568  ;;  %7588 = vpow2.f32 %v5932_v1  ;;  %v6185_v52 = vunpack.c.l.bf16 %v10676_v3  ;;  %v5930_v46 = vmul.f32 -1.442695, %v10316_v44  ;;  %v5651_v29 = vmul.f32 -1.442695, %v6658_v36  ;;  %v11665_v36 = vld [vmem:[#allocation56_spill] sm:$0xff] }
 0x350   : > { %11654 = vst [vmem:[#allocation84_spill] sm:$0xff] %v10673_v56  ;;  %v7571_v53 = vpop.eup %7570  ;;  %7590 = vrcp.f32 %v4539_v47  ;;  %v4537_v61 = vadd.f32 1.0, %v7569_v60  ;;  %11658 = vst [vmem:[#allocation122_spill] sm:$0xff] %v10683_v15  ;;  %v10687_v56 = vpop.f32.mrb[62].mxu0  ;;  %v11660_v47 = vld [vmem:[#allocation152_spill] sm:$0xff] }
 0x351   : > { %v7573_v12 = vpop.eup %7572  ;;  %v4699_v21 = vmul.f32 %v7571_v53, %v6189_v59  ;;  %7592 = vpow2.f32 %v5679_v18  ;;  %11659 = vst [vmem:[#allocation78_spill] sm:$0xff] %v10687_v56  ;;  %v11662_v18 = vld [vmem:[#allocation26_spill] sm:$0xff]  ;;  %v11663_v56 = vld [vmem:[#allocation147_spill] sm:$0xff] }
 0x352   : > { %v7575_v4 = vpop.eup %7574  ;;  %7594 = vrcp.f32 %v4537_v61  ;;  %v2250_v1 = vadd.f32 1.0, %v7573_v12  ;;  %v5935_v53 = vmul.f32 -1.442695, %v11662_v18  ;;  %v6653_v20 = vadd.f32 %v11663_v56, %v10124_v16  ;;  %v6605_v61 = vpop.f32.mrb[174].mxu1  ;;  %v11669_v56 = vld [vmem:[#allocation155_spill] sm:$0xff] }
 0x353   : > { %v7577_v41 = vpop.eup %7576  ;;  %7596 = vrcp.f32 %v2437_v6  ;;  %v10690_v60 = vadd.f32 %v4699_v21, %v11660_v47  ;;  %v2438_v15 = vadd.f32 1.0, %v7575_v4  ;;  %v10700_v21 = vadd.f32 %v6605_v61, %v11665_v36  ;;  %v10708_v47 = vpop.f32.mrb[63].mxu0 }
 0x354   : > { %v7579_v26 = vpop.eup %7578  ;;  %7598 = vrcp.f32 %v2250_v1  ;;  %v4863_v59 = vadd.f32 1.0, %v7577_v41  ;;  %v11667_v1 = vld [vmem:[#allocation153_spill] sm:$0xff]  ;;  %11670 = vst [vmem:[#allocation126_spill] sm:$0xff] %v10708_v47  ;;  %v3663_v18 = vpop.f32.mrb[175].mxu1  ;;  %v5680_v61 = vmul.f32 -1.442695, %v6653_v20 }
 0x355   : > { %11661 = vst [vmem:[#allocation94_spill] sm:$0xff] %v10690_v60  ;;  %v7581_v42 = vpop.eup %7580  ;;  %v4697_v44 = vmul.f32 %v7579_v26, %v6185_v52  ;;  %7600 = vpow2.f32 %v5930_v46  ;;  %11666 = vst [vmem:[#allocation119_spill] sm:$0xff] %v10700_v21  ;;  %v6190_v52 = vunpack.c.h.bf16 %v10652_v9  ;;  %v6660_v46 = vadd.f32 %v11669_v56, %v9938_v57  ;;  %v10718_v9 = vld [vmem:[%s8372_s12 + $0x188] sm:$0xff]  }
 0x356   : > { %v7583_v12 = vpop.eup %7582  ;;  %v10696_v6 = vmul.f32 %v7581_v42, %v11664_v38  ;;  %7602 = vrcp.f32 %v4863_v59  ;;  %v6186_v26 = vunpack.c.h.bf16 %v10676_v3  ;;  %v6197_v47 = vunpack.c.l.bf16 %v10718_v9 }
 0x357   : > { %v7585_v41 = vpop.eup %7584  ;;  %v10703_v4 = vadd.f32 %v4697_v44, %v11667_v1  ;;  %7604 = vpow2.f32 %v5651_v29  ;;  %v11672_v44 = vld [vmem:[#allocation58_spill] sm:$0xff]  ;;  %v5652_v56 = vmul.f32 -1.442695, %v6660_v46  ;;  %v2439_v60 = vadd.f32 1.0, %v7583_v12 }
 0x358   : > { %v7587_v38 = vpop.eup %7586  ;;  %v4861_v59 = vadd.f32 1.0, %v7585_v41  ;;  %7606 = vpow2.f32 %v5935_v53  ;;  %v10721_v36 = vadd.f32 %v3663_v18, %v11672_v44  ;;  %v11674_v53 = vld [vmem:[#allocation132_spill] sm:$0xff]  ;;  %v11675_v18 = vld [vmem:[#allocation25_spill] sm:$0xff] }
 0x359   : > { %11668 = vst [vmem:[#allocation91_spill] sm:$0xff] %v10703_v4  ;;  %v7589_v42 = vpop.eup %7588  ;;  %7608 = vrcp.f32 %v2438_v15  ;;  %v2251_v29 = vadd.f32 1.0, %v7587_v38  ;;  %v5933_v41 = vmul.f32 -1.442695, %v11674_v53  ;;  %v11679_v53 = vld [vmem:[#allocation125_spill] sm:$0xff] }
 0x35a   : > { %11673 = vst [vmem:[#allocation88_spill] sm:$0xff] %v10721_v36  ;;  %v7591_v1 = vpop.eup %7590  ;;  %7610 = vrcp.f32 %v4861_v59  ;;  %v4864_v3 = vadd.f32 1.0, %v7589_v42  ;;  %v10738_v42 = vld [vmem:[%s8372_s12 + $0x180] sm:$0xff]   ;;  %v11685_v36 = vld [vmem:[#allocation117_spill] sm:$0xff] }
 0x35b   : > { %v7593_v15 = vpop.eup %7592  ;;  %v4700_v20 = vmul.f32 %v7591_v1, %v6190_v52  ;;  %7612 = vrcp.f32 %v2251_v29  ;;  %v5936_v52 = vmul.f32 -1.442695, %v10357_v2  ;;  %v11677_v1 = vld [vmem:[#allocation134_spill] sm:$0xff] }
 0x35c   : > { %v7595_v4 = vpop.eup %7594  ;;  %7614 = vrcp.f32 %v4864_v3  ;;  %v2440_v29 = vadd.f32 1.0, %v7593_v15 }
 0x35d   : > { %v10725_v38 = vpop.eup %7596  ;;  %v10728_v44 = vadd.f32 %v4700_v20, %v11675_v18  ;;  %7616 = vpow2.f32 %v5680_v61  ;;  %v4698_v59 = vmul.f32 %v7595_v4, %v6186_v26  ;;  %v11680_v61 = vld [vmem:[#allocation43_spill] sm:$0xff] }
 0x35e   : > { %v7599_v46 = vpop.eup %7598  ;;  %7618 = vpow2.f32 %v5933_v41  ;;  %v6662_v18 = vadd.f32 %v11680_v61, %v9938_v57  ;;  %v6193_v41 = vunpack.c.l.bf16 %v10738_v42  ;;  %v6198_v61 = vunpack.c.h.bf16 %v10718_v9 }
 0x35f   : > { %11676 = vst [vmem:[#allocation138_spill] sm:$0xff] %v10728_v44  ;;  %v7601_v12 = vpop.eup %7600  ;;  %v10741_v3 = vadd.f32 %v4698_v59, %v11677_v1  ;;  %v10744_v20 = vmul.f32 %v7599_v46, %v11679_v53  ;;  %7620 = vpow2.f32 %v5652_v56  ;;  %v11681_v59 = vld [vmem:[#allocation151_spill] sm:$0xff]  ;;  %v5934_v56 = vmul.f32 -1.442695, %v10372_v8 }
 0x360   : > { %v7603_v4 = vpop.eup %7602  ;;  %7622 = vrcp.f32 %v2439_v60  ;;  %v4862_v26 = vadd.f32 1.0, %v7601_v12  ;;  %v6655_v1 = vadd.f32 %v11681_v59, %v10124_v16  ;;  %v11682_v60 = vld [vmem:[#allocation42_spill] sm:$0xff] }
 0x361   : > { %11678 = vst [vmem:[#allocation95_spill] sm:$0xff] %v10741_v3  ;;  %v7605_v2 = vpop.eup %7604  ;;  %v5024_v44 = vmul.f32 %v7603_v4, %v6197_v47  ;;  %7624 = vpow2.f32 %v5936_v52  ;;  %v5653_v52 = vmul.f32 -1.442695, %v6662_v18 }
 0x362   : > { %v7607_v15 = vpop.eup %7606  ;;  %7626 = vrcp.f32 %v4862_v26  ;;  %v2252_v46 = vadd.f32 1.0, %v7605_v2  ;;  %v11683_v26 = vld [vmem:[#allocation96_spill] sm:$0xff]  ;;  %v5681_v9 = vmul.f32 -1.442695, %v6655_v1  ;;  %v11687_v1 = vld [vmem:[#allocation106_spill] sm:$0xff] }
 0x363   : > { %v10753_v53 = vpop.eup %7608  ;;  %7628 = vrcp.f32 %v2440_v29  ;;  %v5056_v12 = vadd.f32 %v5024_v44, %v11682_v60  ;;  %v4867_v3 = vadd.f32 1.0, %v7607_v15  ;;  %v5939_v29 = vmul.f32 -1.442695, %v10389_v14  ;;  %v11684_v15 = vld [vmem:[#allocation136_spill] sm:$0xff] }
 0x364   : > { %v7611_v47 = vpop.eup %7610  ;;  %7630 = vrcp.f32 %v2252_v46  ;;  %v6194_v14 = vunpack.c.h.bf16 %v10738_v42 }
 0x365   : > { %v7613_v4 = vpop.eup %7612  ;;  %v5120_v8 = vadd.f32 %v11683_v26, %v5056_v12  ;;  %v5022_v2 = vmul.f32 %v7611_v47, %v6193_v41  ;;  %7632 = vrcp.f32 %v4867_v3  ;;  %v11686_v41 = vld [vmem:[#allocation34_spill] sm:$0xff] }
 0x366   : > { %v7615_v44 = vpop.eup %7614  ;;  %v10765_v59 = vmul.f32 %v7613_v4, %v11684_v15  ;;  %7634 = vpow2.f32 %v5934_v56  ;;  %v6657_v3 = vadd.f32 %v11686_v41, %v10124_v16  ;;  %v11688_v4 = vld [vmem:[#allocation44_spill] sm:$0xff]  ;;  %v10775_v56 = vld [vmem:[%s8372_s12 + $0x198] sm:$0xff]  }
 0x367   : > { %v7617_v60 = vpop.eup %7616  ;;  %7636 = vtanh.f32 %v5120_v8  ;;  %5248 = vst [vmem:[%s10760_s17 + $0x28] sm:$0xff] %v5120_v8  ;;  %v5054_v46 = vadd.f32 %v5022_v2, %v11685_v36  ;;  %v5025_v18 = vmul.f32 %v7615_v44, %v6198_v61  ;;  %v11689_v2 = vld [vmem:[#allocation36_spill] sm:$0xff] }
 0x368   : > { %v7619_v21 = vpop.eup %7618  ;;  %7638 = vpow2.f32 %v5653_v52  ;;  %v2441_v44 = vadd.f32 1.0, %v7617_v60 }
 0x369   : > { %v7621_v12 = vpop.eup %7620  ;;  %v5118_v47 = vadd.f32 %v11687_v1, %v5054_v46  ;;  %v5057_v26 = vadd.f32 %v5025_v18, %v11688_v4  ;;  %v4865_v15 = vadd.f32 1.0, %v7619_v21  ;;  %7640 = vpow2.f32 %v5939_v29 }
 0x36a   : > { %v10777_v36 = vpop.eup %7622  ;;  %7642 = vpow2.f32 %v5681_v9  ;;  %v2253_v61 = vadd.f32 1.0, %v7621_v12  ;;  %v6205_v46 = vunpack.c.l.bf16 %v10775_v56  ;;  %v5682_v21 = vmul.f32 -1.442695, %v6657_v3  ;;  %v10793_v3 = vld [vmem:[%s8372_s12 + $0x190] sm:$0xff]  }
 0x36b   : > { %v7625_v8 = vpop.eup %7624  ;;  %7644 = vtanh.f32 %v5118_v47  ;;  %5246 = vst [vmem:[%s10760_s17 + $0x8] sm:$0xff] %v5118_v47  ;;  %v5121_v42 = vadd.f32 %v11689_v2, %v5057_v26  ;;  %v5937_v12 = vmul.f32 -1.442695, %v10398_v33  ;;  %v11690_v47 = vld [vmem:[#allocation97_spill] sm:$0xff]  ;;  %v11693_v33 = vld [vmem:[#allocation31_spill] sm:$0xff] }
 0x36c   : > { %v7627_v52 = vpop.eup %7626  ;;  %7646 = vrcp.f32 %v4865_v15  ;;  %v4868_v18 = vadd.f32 1.0, %v7625_v8  ;;  %v11691_v26 = vld [vmem:[#allocation113_spill] sm:$0xff]  ;;  %v11692_v15 = vld [vmem:[#allocation63_spill] sm:$0xff] }
 0x36d   : > { %v10782_v41 = vpop.eup %7628  ;;  %7648 = vtanh.f32 %v5121_v42  ;;  %5249 = vst [vmem:[%s10760_s17 + $0x38] sm:$0xff] %v5121_v42  ;;  %v5023_v29 = vmul.f32 %v7627_v52, %v6194_v14  ;;  %v6664_v8 = vadd.f32 %v11692_v15, %v9938_v57 }
 0x36e   : > { %v7631_v9 = vpop.eup %7630  ;;  %7650 = vrcp.f32 %v2253_v61 }
 0x36f   : > { %v7633_v1 = vpop.eup %7632  ;;  %v5055_v4 = vadd.f32 %v5023_v29, %v11690_v47  ;;  %v10788_v60 = vmul.f32 %v7631_v9, %v11691_v26  ;;  %7652 = vrcp.f32 %v4868_v18  ;;  %v11694_v47 = vld [vmem:[#allocation86_spill] sm:$0xff] }
 0x370   : > { %v7635_v2 = vpop.eup %7634  ;;  %7654 = vrcp.f32 %v2441_v44  ;;  %v5028_v42 = vmul.f32 %v7633_v1, %v6205_v46  ;;  %v11695_v26 = vld [vmem:[#allocation154_spill] sm:$0xff]  ;;  %v6201_v44 = vunpack.c.l.bf16 %v10793_v3 }
 0x371   : > { %v7637_v14 = vpop.eup %7636  ;;  %7656 = vpow2.f32 %v5682_v21  ;;  %v5119_v61 = vadd.f32 %v11693_v33, %v5055_v4  ;;  %v4866_v52 = vadd.f32 1.0, %v7635_v2  ;;  %v6659_v15 = vadd.f32 %v11695_v26, %v10124_v16  ;;  %v11696_v2 = vld [vmem:[#allocation29_spill] sm:$0xff] }
 0x372   : > { %v7639_v29 = vpop.eup %7638  ;;  %v5184_v9 = vmul.f32 %v7637_v14, %v10419_v51  ;;  %v5060_v18 = vadd.f32 %v5028_v42, %v11694_v47  ;;  %7658 = vpow2.f32 %v5937_v12  ;;  %v5654_v21 = vmul.f32 -1.442695, %v6664_v8  ;;  %v11697_v47 = vld [vmem:[#allocation137_spill] sm:$0xff] }
 0x373   : > { %v7641_v0 = vpop.eup %7640  ;;  %7660 = vtanh.f32 %v5119_v61  ;;  %5247 = vst [vmem:[%s10760_s17 + $0x18] sm:$0xff] %v5119_v61  ;;  %v2254_v46 = vadd.f32 1.0, %v7639_v29  ;;  %v6666_v42 = vadd.f32 %v11696_v2, %v9938_v57  ;;  %v5940_v12 = vmul.f32 -1.442695, %v10405_v31 }
 0x374   : > { %v7643_v1 = vpop.eup %7642  ;;  %5216 = vst [vmem:[%s10760_s17 + $0x20] sm:$0xff] %v5184_v9  ;;  %v5124_v4 = vadd.f32 %v10408_v32, %v5060_v18  ;;  %7662 = vrcp.f32 %v4866_v52  ;;  %v4871_v51 = vadd.f32 1.0, %v7641_v0  ;;  %v5683_v8 = vmul.f32 -1.442695, %v6659_v15 }
 0x375   : > { %v7645_v14 = vpop.eup %7644  ;;  %7664 = vrcp.f32 %v2254_v46  ;;  %v6206_v29 = vunpack.c.h.bf16 %v10775_v56  ;;  %v5938_v0 = vmul.f32 -1.442695, %v10425_v13  ;;  %v5655_v31 = vmul.f32 -1.442695, %v6666_v42  ;;  %v11700_v56 = vld [vmem:[#allocation99_spill] sm:$0xff] }
 0x376   : > { %v7647_v33 = vpop.eup %7646  ;;  %v5182_v61 = vmul.f32 %v7645_v14, %v10359_v30  ;;  %7666 = vtanh.f32 %v5124_v4  ;;  %5252 = vst [vmem:[%s10760_s17 + $0x68] sm:$0xff] %v5124_v4  ;;  %v11698_v30 = vld [vmem:[#allocation121_spill] sm:$0xff]  ;;  %v11699_v4 = vld [vmem:[#allocation62_spill] sm:$0xff]  ;;  %v6661_v2 = vadd.f32 %v11700_v56, %v10124_v16  ;;  %v2442_v13 = vadd.f32 1.0, %v7643_v1 }
 0x377   : > { %v7649_v9 = vpop.eup %7648  ;;  %v5026_v32 = vmul.f32 %v7647_v33, %v6201_v44  ;;  %7668 = vrcp.f32 %v4871_v51  ;;  %v6202_v33 = vunpack.c.h.bf16 %v10793_v3 }
 0x378   : > { %v7651_v52 = vpop.eup %7650  ;;  %5214 = vst [vmem:[%s10760_s17] sm:$0xff] %v5182_v61  ;;  %v5185_v18 = vmul.f32 %v7649_v9, %v11697_v47  ;;  %7670 = vpow2.f32 %v5654_v21  ;;  %v11701_v21 = vld [vmem:[#allocation111_spill] sm:$0xff]  ;;  %v10825_v61 = vld [vmem:[%s8372_s12 + $0x1a8] sm:$0xff]   ;;  %v5684_v1 = vmul.f32 -1.442695, %v6661_v2 }
 0x379   : > { %v7653_v26 = vpop.eup %7652  ;;  %v5058_v46 = vadd.f32 %v5026_v32, %v11698_v30  ;;  %v10815_v15 = vmul.f32 %v7651_v52, %v11699_v4  ;;  %7672 = vpow2.f32 %v5940_v12  ;;  %v11702_v32 = vld [vmem:[#allocation65_spill] sm:$0xff]  ;;  %v11703_v12 = vld [vmem:[#allocation39_spill] sm:$0xff]  ;;  %v11707_v2 = vld [vmem:[#allocation104_spill] sm:$0xff] }
 0x37a   : > { %v10819_v44 = vpop.eup %7654  ;;  %5217 = vst [vmem:[%s10760_s17 + $0x30] sm:$0xff] %v5185_v18  ;;  %7674 = vpow2.f32 %v5683_v8  ;;  %v5029_v51 = vmul.f32 %v7653_v26, %v6206_v29  ;;  %v6668_v47 = vadd.f32 %v11703_v12, %v9938_v57  ;;  %v11704_v29 = vld [vmem:[#allocation68_spill] sm:$0xff] }
 0x37b   : > { %v7657_v14 = vpop.eup %7656  ;;  %v5122_v42 = vadd.f32 %v11701_v21, %v5058_v46  ;;  %7676 = vpow2.f32 %v5938_v0  ;;  %v5943_v18 = vmul.f32 -1.442695, %v11704_v29  ;;  %v11705_v26 = vld [vmem:[#allocation108_spill] sm:$0xff]  ;;  %v11709_v29 = vld [vmem:[#allocation101_spill] sm:$0xff] }
 0x37c   : > { %v7659_v9 = vpop.eup %7658  ;;  %v5061_v52 = vadd.f32 %v5029_v51, %v11702_v32  ;;  %7678 = vpow2.f32 %v5655_v31  ;;  %v6213_v31 = vunpack.c.l.bf16 %v10825_v61  ;;  %v11706_v51 = vld [vmem:[#allocation120_spill] sm:$0xff] }
 0x37d   : > { %v7661_v30 = vpop.eup %7660  ;;  %7680 = vtanh.f32 %v5122_v42  ;;  %5250 = vst [vmem:[%s10760_s17 + $0x48] sm:$0xff] %v5122_v42  ;;  %v4869_v8 = vadd.f32 1.0, %v7659_v9  ;;  %v5941_v21 = vmul.f32 -1.442695, %v11706_v51 }
 0x37e   : > { %v7663_v3 = vpop.eup %7662  ;;  %7682 = vrcp.f32 %v2442_v13  ;;  %v5183_v0 = vmul.f32 %v7661_v30, %v11705_v26  ;;  %v5125_v46 = vadd.f32 %v10449_v54, %v5061_v52  ;;  %v5656_v13 = vmul.f32 -1.442695, %v6668_v47  ;;  %v11708_v52 = vld [vmem:[#allocation76_spill] sm:$0xff]  ;;  %v10846_v26 = vld [vmem:[%s8372_s12 + $0x1a0] sm:$0xff]   ;;  %v11710_v47 = vld [vmem:[#allocation98_spill] sm:$0xff] }
 0x37f   : > { %v7665_v4 = vpop.eup %7664  ;;  %v5027_v56 = vmul.f32 %v7663_v3, %v6202_v33  ;;  %7684 = vrcp.f32 %v4869_v8 }
 0x380   : > { %v7667_v42 = vpop.eup %7666  ;;  %5215 = vst [vmem:[%s10760_s17 + $0x10] sm:$0xff] %v5183_v0  ;;  %7686 = vtanh.f32 %v5125_v46  ;;  %5253 = vst [vmem:[%s10760_s17 + $0x78] sm:$0xff] %v5125_v46  ;;  %v10839_v9 = vmul.f32 %v7665_v4, %v11707_v2 }
 0x381   : > { %v7669_v32 = vpop.eup %7668  ;;  %v5188_v54 = vmul.f32 %v7667_v42, %v10571_v24  ;;  %v5059_v12 = vadd.f32 %v5027_v56, %v11708_v52  ;;  %7688 = vpow2.f32 %v5943_v18  ;;  %v2443_v18 = vadd.f32 1.0, %v7657_v14  ;;  %v11712_v52 = vld [vmem:[#allocation30_spill] sm:$0xff] }
 0x382   : > { %v7671_v33 = vpop.eup %7670  ;;  %7690 = vpow2.f32 %v5684_v1  ;;  %v5032_v30 = vmul.f32 %v7669_v32, %v6213_v31  ;;  %v6209_v56 = vunpack.c.l.bf16 %v10846_v26 }
 0x383   : > { %v7673_v8 = vpop.eup %7672  ;;  %5220 = vst [vmem:[%s10760_s17 + $0x60] sm:$0xff] %v5188_v54  ;;  %v5123_v3 = vadd.f32 %v11709_v29, %v5059_v12  ;;  %v2255_v0 = vadd.f32 1.0, %v7671_v33  ;;  %7692 = vpow2.f32 %v5941_v21  ;;  %v11711_v21 = vld [vmem:[#allocation73_spill] sm:$0xff]  ;;  %v5944_v12 = vmul.f32 -1.442695, %v11712_v52 }
 0x384   : > { %v7675_v46 = vpop.eup %7674  ;;  %v5064_v4 = vadd.f32 %v5032_v30, %v11710_v47  ;;  %v4872_v51 = vadd.f32 1.0, %v7673_v8  ;;  %7694 = vpow2.f32 %v5656_v13  ;;  %v6663_v32 = vadd.f32 %v11711_v21, %v10124_v16 }
 0x385   : > { %v7677_v24 = vpop.eup %7676  ;;  %7696 = vtanh.f32 %v5123_v3  ;;  %5251 = vst [vmem:[%s10760_s17 + $0x58] sm:$0xff] %v5123_v3  ;;  %v2444_v33 = vadd.f32 1.0, %v7675_v46  ;;  %v5942_v21 = vmul.f32 -1.442695, %v10475_v28 }
 0x386   : > { %v7679_v1 = vpop.eup %7678  ;;  %v5128_v31 = vadd.f32 %v10561_v11, %v5064_v4  ;;  %7698 = vrcp.f32 %v2255_v0  ;;  %v4870_v42 = vadd.f32 1.0, %v7677_v24  ;;  %v5685_v0 = vmul.f32 -1.442695, %v6663_v32  ;;  %v11713_v4 = vld [vmem:[#allocation114_spill] sm:$0xff]  ;;  %v11714_v24 = vld [vmem:[#allocation103_spill] sm:$0xff] }
 0x387   : > { %v7681_v2 = vpop.eup %7680  ;;  %7700 = vrcp.f32 %v4872_v51  ;;  %v2256_v54 = vadd.f32 1.0, %v7679_v1  ;;  %v6670_v1 = vadd.f32 %v11714_v24, %v9938_v57 }
 0x388   : > { %v10854_v13 = vpop.eup %7682  ;;  %v5186_v14 = vmul.f32 %v7681_v2, %v10477_v37  ;;  %7702 = vtanh.f32 %v5128_v31  ;;  %5256 = vst [vmem:[%s10760_s17 + $0xa8] sm:$0xff] %v5128_v31 }
 0x389   : > { %v7685_v11 = vpop.eup %7684  ;;  %7704 = vrcp.f32 %v2443_v18 }
 0x38a   : > { %v7687_v30 = vpop.eup %7686  ;;  %5218 = vst [vmem:[%s10760_s17 + $0x40] sm:$0xff] %v5186_v14  ;;  %v5030_v8 = vmul.f32 %v7685_v11, %v6209_v56  ;;  %7706 = vrcp.f32 %v4870_v42  ;;  %v6214_v56 = vunpack.c.h.bf16 %v10825_v61  ;;  %v11715_v14 = vld [vmem:[#allocation46_spill] sm:$0xff] }
 0x38b   : > { %v7689_v29 = vpop.eup %7688  ;;  %v5189_v3 = vmul.f32 %v7687_v30, %v10591_v45  ;;  %7708 = vrcp.f32 %v2256_v54  ;;  %v6665_v52 = vadd.f32 %v11715_v14, %v10124_v16  ;;  %v11716_v61 = vld [vmem:[#allocation118_spill] sm:$0xff]  ;;  %v5947_v30 = vmul.f32 -1.442695, %v10481_v7  ;;  %v11718_v7 = vld [vmem:[#allocation105_spill] sm:$0xff] }
 0x38c   : > { %v7691_v47 = vpop.eup %7690  ;;  %v5062_v37 = vadd.f32 %v5030_v8, %v11713_v4  ;;  %v4875_v51 = vadd.f32 1.0, %v7689_v29  ;;  %7710 = vpow2.f32 %v5944_v12  ;;  %v10879_v29 = vld [vmem:[%s8372_s12 + $0x1b8] sm:$0xff]   ;;  %v5945_v4 = vmul.f32 -1.442695, %v10496_v48 }
 0x38d   : > { %v7693_v46 = vpop.eup %7692  ;;  %7712 = vrcp.f32 %v2444_v33  ;;  %5221 = vst [vmem:[%s10760_s17 + $0x70] sm:$0xff] %v5189_v3  ;;  %v6210_v33 = vunpack.c.h.bf16 %v10846_v26  ;;  %v2445_v8 = vadd.f32 1.0, %v7691_v47  ;;  %v6672_v47 = vadd.f32 %v11718_v7, %v9938_v57 }
 0x38e   : > { %v7695_v18 = vpop.eup %7694  ;;  %v5126_v31 = vadd.f32 %v10487_v23, %v5062_v37  ;;  %7714 = vrcp.f32 %v4875_v51  ;;  %v4873_v45 = vadd.f32 1.0, %v7693_v46  ;;  %v5657_v23 = vmul.f32 -1.442695, %v6670_v1  ;;  %v11717_v37 = vld [vmem:[#allocation35_spill] sm:$0xff] }
 0x38f   : > { %v7697_v42 = vpop.eup %7696  ;;  %7716 = vpow2.f32 %v5685_v0  ;;  %v2257_v2 = vadd.f32 1.0, %v7695_v18  ;;  %v5686_v1 = vmul.f32 -1.442695, %v6665_v52  ;;  %v6221_v18 = vunpack.c.l.bf16 %v10879_v29 }
 0x390   : > { %v7699_v32 = vpop.eup %7698  ;;  %v5187_v54 = vmul.f32 %v7697_v42, %v10529_v43  ;;  %7718 = vtanh.f32 %v5126_v31  ;;  %5254 = vst [vmem:[%s10760_s17 + $0x88] sm:$0xff] %v5126_v31  ;;  %v10891_v31 = vld [vmem:[%s8372_s12 + $0x1b0] sm:$0xff]   ;;  %v11720_v42 = vld [vmem:[#allocation32_spill] sm:$0xff] }
 0x391   : > { %v7701_v12 = vpop.eup %7700  ;;  %v10873_v11 = vmul.f32 %v7699_v32, %v11716_v61  ;;  %7720 = vrcp.f32 %v4873_v45  ;;  %v11721_v32 = vld [vmem:[#allocation135_spill] sm:$0xff] }
 0x392   : > { %v7703_v28 = vpop.eup %7702  ;;  %5219 = vst [vmem:[%s10760_s17 + $0x50] sm:$0xff] %v5187_v54  ;;  %v5033_v43 = vmul.f32 %v7701_v12, %v6214_v56  ;;  %7722 = vrcp.f32 %v2257_v2  ;;  %v11719_v56 = vld [vmem:[#allocation28_spill] sm:$0xff]  ;;  %v6667_v2 = vadd.f32 %v11720_v42, %v10124_v16  ;;  %v5658_v12 = vmul.f32 -1.442695, %v6672_v47 }
 0x393   : > { %v10881_v3 = vpop.eup %7704  ;;  %v5192_v0 = vmul.f32 %v7703_v28, %v10670_v22  ;;  %7724 = vpow2.f32 %v5942_v21 }
 0x394   : > { %v7707_v26 = vpop.eup %7706  ;;  %v5065_v51 = vadd.f32 %v5033_v43, %v11717_v37  ;;  %7726 = vpow2.f32 %v5657_v23  ;;  %v6217_v23 = vunpack.c.l.bf16 %v10891_v31  ;;  %v5687_v43 = vmul.f32 -1.442695, %v6667_v2 }
 0x395   : > { %v7709_v24 = vpop.eup %7708  ;;  %5224 = vst [vmem:[%s10760_s17 + $0xa0] sm:$0xff] %v5192_v0  ;;  %v5031_v46 = vmul.f32 %v7707_v26, %v6210_v33  ;;  %7728 = vpow2.f32 %v5947_v30  ;;  %v11722_v30 = vld [vmem:[#allocation110_spill] sm:$0xff]  ;;  %v11723_v26 = vld [vmem:[#allocation41_spill] sm:$0xff]  ;;  %v6674_v2 = vadd.f32 %v10512_v55, %v9938_v57 }
 0x396   : > { %v7711_v22 = vpop.eup %7710  ;;  %7730 = vrcp.f32 %v2445_v8  ;;  %v5129_v48 = vadd.f32 %v10580_v25, %v5065_v51  ;;  %v10895_v45 = vmul.f32 %v7709_v24, %v11719_v56  ;;  %v5948_v28 = vmul.f32 -1.442695, %v11722_v30  ;;  %v11724_v24 = vld [vmem:[#allocation81_spill] sm:$0xff]  ;;  %v11726_v30 = vld [vmem:[#allocation70_spill] sm:$0xff] }
 0x397   : > { %v10899_v21 = vpop.eup %7712  ;;  %v5063_v54 = vadd.f32 %v5031_v46, %v11721_v32  ;;  %v4876_v14 = vadd.f32 1.0, %v7711_v22  ;;  %7732 = vpow2.f32 %v5945_v4  ;;  %v6222_v56 = vunpack.c.h.bf16 %v10879_v29 }
 0x398   : > { %v7715_v52 = vpop.eup %7714  ;;  %7734 = vtanh.f32 %v5129_v48  ;;  %5257 = vst [vmem:[%s10760_s17 + $0xb8] sm:$0xff] %v5129_v48  ;;  %v5946_v29 = vmul.f32 -1.442695, %v10509_v5  ;;  %v5659_v55 = vmul.f32 -1.442695, %v6674_v2 }
 0x399   : > { %v7717_v25 = vpop.eup %7716  ;;  %v5127_v61 = vadd.f32 %v10519_v62, %v5063_v54  ;;  %v5036_v33 = vmul.f32 %v7715_v52, %v6221_v18  ;;  %7736 = vrcp.f32 %v4876_v14  ;;  %v11725_v18 = vld [vmem:[#allocation55_spill] sm:$0xff] }
 0x39a   : > { %v7719_v8 = vpop.eup %7718  ;;  %7738 = vpow2.f32 %v5686_v1  ;;  %v2446_v32 = vadd.f32 1.0, %v7717_v25 }
 0x39b   : > { %v7721_v0 = vpop.eup %7720  ;;  %v5190_v4 = vmul.f32 %v7719_v8, %v10626_v50  ;;  %7740 = vtanh.f32 %v5127_v61  ;;  %5255 = vst [vmem:[%s10760_s17 + $0x98] sm:$0xff] %v5127_v61  ;;  %v5068_v37 = vadd.f32 %v5036_v33, %v11723_v26  ;;  %v11728_v26 = vld [vmem:[#allocation140_spill] sm:$0xff] }
 0x39c   : > { %v7723_v51 = vpop.eup %7722  ;;  %v5034_v7 = vmul.f32 %v7721_v0, %v6217_v23  ;;  %7742 = vpow2.f32 %v5658_v12 }
 0x39d   : > { %v7725_v62 = vpop.eup %7724  ;;  %5222 = vst [vmem:[%s10760_s17 + $0x80] sm:$0xff] %v5190_v4  ;;  %v5132_v47 = vadd.f32 %v10665_v35, %v5068_v37  ;;  %v10912_v46 = vmul.f32 %v7723_v51, %v11724_v24  ;;  %7744 = vpow2.f32 %v5948_v28  ;;  %v5951_v28 = vmul.f32 -1.442695, %v11726_v30 }
 0x39e   : > { %v7727_v1 = vpop.eup %7726  ;;  %7746 = vpow2.f32 %v5687_v43  ;;  %v5066_v50 = vadd.f32 %v5034_v7, %v11725_v18  ;;  %v4874_v22 = vadd.f32 1.0, %v7725_v62  ;;  %v11727_v43 = vld [vmem:[#allocation66_spill] sm:$0xff]  ;;  %v6218_v51 = vunpack.c.h.bf16 %v10891_v31  ;;  %v10933_v7 = vld [vmem:[%s8372_s12 + $0x1c8] sm:$0xff]  }
 0x39f   : > { %v7729_v48 = vpop.eup %7728  ;;  %7748 = vtanh.f32 %v5132_v47  ;;  %5260 = vst [vmem:[%s10760_s17 + $0xe8] sm:$0xff] %v5132_v47  ;;  %v2258_v42 = vadd.f32 1.0, %v7727_v1  ;;  %v6669_v0 = vadd.f32 %v11727_v43, %v10124_v16  ;;  %v11729_v47 = vld [vmem:[#allocation124_spill] sm:$0xff]  ;;  %v6229_v2 = vunpack.c.l.bf16 %v10933_v7 }
 0x3a0   : > { %v10919_v35 = vpop.eup %7730  ;;  %v5130_v54 = vadd.f32 %v10620_v58, %v5066_v50  ;;  %7750 = vrcp.f32 %v4874_v22  ;;  %v4879_v14 = vadd.f32 1.0, %v7729_v48  ;;  %v6676_v24 = vadd.f32 %v11729_v47, %v9938_v57 }
 0x3a1   : > { %v7733_v52 = vpop.eup %7732  ;;  %7752 = vrcp.f32 %v2258_v42  ;;  %v5688_v48 = vmul.f32 -1.442695, %v6669_v0  ;;  %v6678_v47 = vadd.f32 %v10585_v17, %v9938_v57  ;;  %v5950_v17 = vmul.f32 -1.442695, %v10565_v63 }
 0x3a2   : > { %v7735_v23 = vpop.eup %7734  ;;  %7754 = vtanh.f32 %v5130_v54  ;;  %5258 = vst [vmem:[%s10760_s17 + $0xc8] sm:$0xff] %v5130_v54  ;;  %v4877_v12 = vadd.f32 1.0, %v7733_v52 }
 0x3a3   : > { %v7737_v61 = vpop.eup %7736  ;;  %v5193_v33 = vmul.f32 %v7735_v23, %v10725_v38  ;;  %7756 = vrcp.f32 %v4879_v14  ;;  %v11730_v23 = vld [vmem:[#allocation49_spill] sm:$0xff] }
 0x3a4   : > { %v7739_v25 = vpop.eup %7738  ;;  %7758 = vrcp.f32 %v2446_v32  ;;  %v5037_v58 = vmul.f32 %v7737_v61, %v6222_v56  ;;  %v10940_v56 = vld [vmem:[%s8372_s12 + $0x1c0] sm:$0xff]   ;;  %v5949_v32 = vmul.f32 -1.442695, %v10542_v40 }
 0x3a5   : > { %v7741_v8 = vpop.eup %7740  ;;  %5225 = vst [vmem:[%s10760_s17 + $0xb0] sm:$0xff] %v5193_v33  ;;  %7760 = vrcp.f32 %v4877_v12  ;;  %v2447_v18 = vadd.f32 1.0, %v7739_v25  ;;  %v11732_v40 = vld [vmem:[#allocation59_spill] sm:$0xff] }
 0x3a6   : > { %v7743_v4 = vpop.eup %7742  ;;  %v5191_v5 = vmul.f32 %v7741_v8, %v10635_v10  ;;  %v5069_v38 = vadd.f32 %v5037_v58, %v11728_v26  ;;  %7762 = vpow2.f32 %v5946_v29  ;;  %v6225_v29 = vunpack.c.l.bf16 %v10940_v56  ;;  %v11734_v26 = vld [vmem:[#allocation38_spill] sm:$0xff] }
 0x3a7   : > { %v7745_v37 = vpop.eup %7744  ;;  %v2259_v62 = vadd.f32 1.0, %v7743_v4  ;;  %7764 = vpow2.f32 %v5659_v55  ;;  %v11733_v4 = vld [vmem:[#allocation143_spill] sm:$0xff] }
 0x3a8   : > { %v7747_v1 = vpop.eup %7746  ;;  %5223 = vst [vmem:[%s10760_s17 + $0x90] sm:$0xff] %v5191_v5  ;;  %v5133_v10 = vadd.f32 %v10696_v6, %v5069_v38  ;;  %v4880_v50 = vadd.f32 1.0, %v7745_v37  ;;  %7766 = vpow2.f32 %v5951_v28  ;;  %v5660_v6 = vmul.f32 -1.442695, %v6676_v24 }
 0x3a9   : > { %v7749_v22 = vpop.eup %7748  ;;  %7768 = vrcp.f32 %v2259_v62  ;;  %v2448_v30 = vadd.f32 1.0, %v7747_v1  ;;  %v11735_v1 = vld [vmem:[#allocation47_spill] sm:$0xff] }
 0x3aa   : > { %v7751_v31 = vpop.eup %7750  ;;  %v5196_v42 = vmul.f32 %v7749_v22, %v10782_v41  ;;  %7770 = vtanh.f32 %v5133_v10  ;;  %5261 = vst [vmem:[%s10760_s17 + $0xf8] sm:$0xff] %v5133_v10  ;;  %v11731_v41 = vld [vmem:[#allocation69_spill] sm:$0xff] }
 0x3ab   : > { %v7753_v54 = vpop.eup %7752  ;;  %v5035_v14 = vmul.f32 %v7751_v31, %v6218_v51  ;;  %7772 = vrcp.f32 %v4880_v50  ;;  %v5952_v61 = vmul.f32 -1.442695, %v11731_v41  ;;  %v6230_v51 = vunpack.c.h.bf16 %v10933_v7  ;;  %v11736_v31 = vld [vmem:[#allocation53_spill] sm:$0xff]  ;;  %v11738_v41 = vld [vmem:[#allocation40_spill] sm:$0xff] }
 0x3ac   : > { %v7755_v52 = vpop.eup %7754  ;;  %7774 = vrcp.f32 %v2447_v18  ;;  %5228 = vst [vmem:[%s10760_s17 + $0xe0] sm:$0xff] %v5196_v42  ;;  %v10948_v12 = vmul.f32 %v7753_v54, %v11730_v23  ;;  %v11737_v23 = vld [vmem:[#allocation92_spill] sm:$0xff] }
 0x3ad   : > { %v7757_v33 = vpop.eup %7756  ;;  %v5194_v55 = vmul.f32 %v7755_v52, %v10753_v53  ;;  %7776 = vpow2.f32 %v5688_v48  ;;  %v5067_v25 = vadd.f32 %v5035_v14, %v11732_v40  ;;  %v6671_v53 = vadd.f32 %v11734_v26, %v10124_v16 }
 0x3ae   : > { %v10954_v58 = vpop.eup %7758  ;;  %v5040_v28 = vmul.f32 %v7757_v33, %v6229_v2  ;;  %7778 = vpow2.f32 %v5949_v32  ;;  %v5661_v32 = vmul.f32 -1.442695, %v6678_v47  ;;  %v6226_v40 = vunpack.c.h.bf16 %v10940_v56 }
 0x3af   : > { %v7761_v8 = vpop.eup %7760  ;;  %5226 = vst [vmem:[%s10760_s17 + $0xc0] sm:$0xff] %v5194_v55  ;;  %v5131_v43 = vadd.f32 %v10648_v27, %v5067_v25  ;;  %7780 = vpow2.f32 %v5660_v6  ;;  %v5689_v14 = vmul.f32 -1.442695, %v6671_v53 }
 0x3b0   : > { %v7763_v0 = vpop.eup %7762  ;;  %v5072_v5 = vadd.f32 %v5040_v28, %v11733_v4  ;;  %v5038_v38 = vmul.f32 %v7761_v8, %v6225_v29  ;;  %7782 = vpow2.f32 %v5952_v61  ;;  %v10984_v8 = vld [vmem:[%s8372_s12 + $0x1d8] sm:$0xff]  }
 0x3b1   : > { %v7765_v37 = vpop.eup %7764  ;;  %7784 = vtanh.f32 %v5131_v43  ;;  %5259 = vst [vmem:[%s10760_s17 + $0xd8] sm:$0xff] %v5131_v43  ;;  %v4878_v62 = vadd.f32 1.0, %v7763_v0  ;;  %v6680_v0 = vadd.f32 %v10616_v19, %v9938_v57  ;;  %v5953_v19 = vmul.f32 -1.442695, %v10605_v49  ;;  %v11740_v49 = vld [vmem:[#allocation45_spill] sm:$0xff] }
 0x3b2   : > { %v7767_v27 = vpop.eup %7766  ;;  %7786 = vrcp.f32 %v2448_v30  ;;  %v5136_v24 = vadd.f32 %v10788_v60, %v5072_v5  ;;  %v5070_v18 = vadd.f32 %v5038_v38, %v11735_v1  ;;  %v2260_v10 = vadd.f32 1.0, %v7765_v37 }
 0x3b3   : > { %v7769_v50 = vpop.eup %7768  ;;  %7788 = vrcp.f32 %v4878_v62  ;;  %v4883_v22 = vadd.f32 1.0, %v7767_v27  ;;  %v6237_v37 = vunpack.c.l.bf16 %v10984_v8  ;;  %v10998_v62 = vld [vmem:[%s8372_s12 + $0x1d0] sm:$0xff]   ;;  %v5662_v47 = vmul.f32 -1.442695, %v6680_v0 }
 0x3b4   : > { %v7771_v48 = vpop.eup %7770  ;;  %7790 = vtanh.f32 %v5136_v24  ;;  %5264 = vst [vmem:[%s10760_s17 + $0x128] sm:$0xff] %v5136_v24  ;;  %v5134_v7 = vadd.f32 %v10744_v20, %v5070_v18  ;;  %v10970_v42 = vmul.f32 %v7769_v50, %v11736_v31  ;;  %v11739_v24 = vld [vmem:[#allocation48_spill] sm:$0xff]  ;;  %v6673_v50 = vadd.f32 %v11740_v49, %v10124_v16 }
 0x3b5   : > { %v7773_v2 = vpop.eup %7772  ;;  %v5197_v60 = vmul.f32 %v7771_v48, %v10819_v44  ;;  %7792 = vrcp.f32 %v2260_v10  ;;  %v6675_v44 = vadd.f32 %v11738_v41, %v10124_v16 }
 0x3b6   : > { %v10974_v54 = vpop.eup %7774  ;;  %7794 = vtanh.f32 %v5134_v7  ;;  %5262 = vst [vmem:[%s10760_s17 + $0x108] sm:$0xff] %v5134_v7  ;;  %v5041_v6 = vmul.f32 %v7773_v2, %v6230_v51  ;;  %v6233_v7 = vunpack.c.l.bf16 %v10998_v62 }
 0x3b7   : > { %v7777_v52 = vpop.eup %7776  ;;  %5229 = vst [vmem:[%s10760_s17 + $0xf0] sm:$0xff] %v5197_v60  ;;  %7796 = vrcp.f32 %v4883_v22  ;;  %v5691_v26 = vmul.f32 -1.442695, %v6675_v44  ;;  %v11744_v44 = vld [vmem:[#allocation82_spill] sm:$0xff] }
 0x3b8   : > { %v7779_v20 = vpop.eup %7778  ;;  %v5073_v29 = vadd.f32 %v5041_v6, %v11737_v23  ;;  %7798 = vpow2.f32 %v5950_v17  ;;  %v2449_v28 = vadd.f32 1.0, %v7777_v52  ;;  %v11741_v17 = vld [vmem:[#allocation115_spill] sm:$0xff]  ;;  %v6238_v23 = vunpack.c.h.bf16 %v10984_v8 }
 0x3b9   : > { %v7781_v63 = vpop.eup %7780  ;;  %v4881_v61 = vadd.f32 1.0, %v7779_v20  ;;  %7800 = vpow2.f32 %v5661_v32  ;;  %v5956_v2 = vmul.f32 -1.442695, %v11741_v17  ;;  %v5690_v20 = vmul.f32 -1.442695, %v6673_v50  ;;  %v11746_v8 = vld [vmem:[#allocation51_spill] sm:$0xff] }
 0x3ba   : > { %v7783_v33 = vpop.eup %7782  ;;  %7802 = vpow2.f32 %v5689_v14  ;;  %v5137_v55 = vadd.f32 %v10815_v15, %v5073_v29  ;;  %v2261_v25 = vadd.f32 1.0, %v7781_v63  ;;  %v5955_v15 = vmul.f32 -1.442695, %v10589_v34  ;;  %v11743_v14 = vld [vmem:[#allocation71_spill] sm:$0xff] }
 0x3bb   : > { %v7785_v30 = vpop.eup %7784  ;;  %7804 = vrcp.f32 %v4881_v61  ;;  %v4884_v43 = vadd.f32 1.0, %v7783_v33  ;;  %v5954_v61 = vmul.f32 -1.442695, %v11744_v44 }
 0x3bc   : > { %v10988_v4 = vpop.eup %7786  ;;  %v5195_v5 = vmul.f32 %v7785_v30, %v10777_v36  ;;  %7806 = vtanh.f32 %v5137_v55  ;;  %5265 = vst [vmem:[%s10760_s17 + $0x138] sm:$0xff] %v5137_v55  ;;  %v11745_v30 = vld [vmem:[#allocation72_spill] sm:$0xff] }
 0x3bd   : > { %v7789_v56 = vpop.eup %7788  ;;  %7808 = vrcp.f32 %v2261_v25 }
 0x3be   : > { %v7791_v53 = vpop.eup %7790  ;;  %5227 = vst [vmem:[%s10760_s17 + $0xd0] sm:$0xff] %v5195_v5  ;;  %v5039_v38 = vmul.f32 %v7789_v56, %v6226_v40  ;;  %7810 = vrcp.f32 %v4884_v43 }
 0x3bf   : > { %v7793_v51 = vpop.eup %7792  ;;  %7812 = vrcp.f32 %v2449_v28  ;;  %v5200_v36 = vmul.f32 %v7791_v53, %v10899_v21 }
 0x3c0   : > { %v7795_v34 = vpop.eup %7794  ;;  %v5071_v27 = vadd.f32 %v5039_v38, %v10557_v39  ;;  %v11002_v1 = vmul.f32 %v7793_v51, %v11739_v24  ;;  %7814 = vpow2.f32 %v5955_v15  ;;  %v11748_v38 = vld [vmem:[#allocation64_spill] sm:$0xff] }
 0x3c1   : > { %v7797_v18 = vpop.eup %7796  ;;  %5232 = vst [vmem:[%s10760_s17 + $0x120] sm:$0xff] %v5200_v36  ;;  %v5198_v10 = vmul.f32 %v7795_v34, %v10854_v13  ;;  %7816 = vpow2.f32 %v5691_v26  ;;  %v11742_v13 = vld [vmem:[#allocation79_spill] sm:$0xff]  ;;  %v11747_v26 = vld [vmem:[#allocation24_spill] sm:$0xff]  ;;  %v6234_v36 = vunpack.c.h.bf16 %v10998_v62 }
 0x3c2   : > { %v7799_v21 = vpop.eup %7798  ;;  %v5135_v22 = vadd.f32 %v10765_v59, %v5071_v27  ;;  %v5044_v48 = vmul.f32 %v7797_v18, %v6237_v37  ;;  %7818 = vpow2.f32 %v5953_v19  ;;  %v6682_v60 = vadd.f32 %v11742_v13, %v9938_v57  ;;  %v11749_v18 = vld [vmem:[#allocation112_spill] sm:$0xff] }
 0x3c3   : > { %v7801_v39 = vpop.eup %7800  ;;  %5230 = vst [vmem:[%s10760_s17 + $0x100] sm:$0xff] %v5198_v10  ;;  %v4882_v31 = vadd.f32 1.0, %v7799_v21  ;;  %7820 = vpow2.f32 %v5662_v47  ;;  %v6677_v37 = vadd.f32 %v11748_v38, %v10124_v16  ;;  %v5959_v10 = vmul.f32 -1.442695, %v11749_v18  ;;  %v11752_v13 = vld [vmem:[#allocation128_spill] sm:$0xff] }
 0x3c4   : > { %v7803_v32 = vpop.eup %7802  ;;  %7822 = vtanh.f32 %v5135_v22  ;;  %5263 = vst [vmem:[%s10760_s17 + $0x118] sm:$0xff] %v5135_v22  ;;  %v5076_v6 = vadd.f32 %v5044_v48, %v11743_v14  ;;  %v2262_v52 = vadd.f32 1.0, %v7801_v39  ;;  %v5663_v40 = vmul.f32 -1.442695, %v6682_v60  ;;  %v11043_v39 = vld [vmem:[%s8372_s12 + $0x1e8] sm:$0xff]  }
 0x3c5   : > { %v7805_v59 = vpop.eup %7804  ;;  %7824 = vrcp.f32 %v4882_v31  ;;  %v2450_v15 = vadd.f32 1.0, %v7803_v32  ;;  %v5692_v21 = vmul.f32 -1.442695, %v6677_v37  ;;  %v11751_v31 = vld [vmem:[#allocation122_spill] sm:$0xff]  ;;  %v11758_v37 = vld [vmem:[#allocation27_spill] sm:$0xff] }
 0x3c6   : > { %v7807_v29 = vpop.eup %7806  ;;  %v5140_v63 = vadd.f32 %v10895_v45, %v5076_v6  ;;  %v5042_v41 = vmul.f32 %v7805_v59, %v6233_v7  ;;  %7826 = vrcp.f32 %v2262_v52  ;;  %v5957_v17 = vmul.f32 -1.442695, %v11751_v31  ;;  %v11753_v32 = vld [vmem:[#allocation78_spill] sm:$0xff] }
 0x3c7   : > { %v7809_v33 = vpop.eup %7808  ;;  %v5201_v55 = vmul.f32 %v7807_v29, %v10919_v35  ;;  %7828 = vpow2.f32 %v5956_v2  ;;  %v6684_v14 = vadd.f32 %v11753_v32, %v9938_v57  ;;  %v6245_v29 = vunpack.c.l.bf16 %v11043_v39  ;;  %v11762_v32 = vld [vmem:[#allocation131_spill] sm:$0xff] }
 0x3c8   : > { %v7811_v25 = vpop.eup %7810  ;;  %7830 = vtanh.f32 %v5140_v63  ;;  %5268 = vst [vmem:[%s10760_s17 + $0x168] sm:$0xff] %v5140_v63  ;;  %v5074_v28 = vadd.f32 %v5042_v41, %v11745_v30  ;;  %v11023_v43 = vmul.f32 %v7809_v33, %v11746_v8  ;;  %v11053_v63 = vld [vmem:[%s8372_s12 + $0x1e0] sm:$0xff]   ;;  %v11754_v41 = vld [vmem:[#allocation142_spill] sm:$0xff] }
 0x3c9   : > { %v11025_v0 = vpop.eup %7812  ;;  %5233 = vst [vmem:[%s10760_s17 + $0x130] sm:$0xff] %v5201_v55  ;;  %7832 = vpow2.f32 %v5690_v20  ;;  %v5045_v45 = vmul.f32 %v7811_v25, %v6238_v23  ;;  %v6683_v44 = vadd.f32 %v11754_v41, %v10124_v16  ;;  %v5664_v55 = vmul.f32 -1.442695, %v6684_v14  ;;  %v11755_v30 = vld [vmem:[#allocation119_spill] sm:$0xff]  ;;  %v11764_v41 = vld [vmem:[#allocation54_spill] sm:$0xff] }
 0x3ca   : > { %v7815_v5 = vpop.eup %7814  ;;  %v5138_v35 = vadd.f32 %v10839_v9, %v5074_v28  ;;  %7834 = vpow2.f32 %v5954_v61  ;;  %v6241_v25 = vunpack.c.l.bf16 %v11053_v63  ;;  %v5960_v28 = vmul.f32 -1.442695, %v11755_v30 }
 0x3cb   : > { %v7817_v56 = vpop.eup %7816  ;;  %v5077_v53 = vadd.f32 %v5045_v45, %v11747_v26  ;;  %v4887_v19 = vadd.f32 1.0, %v7815_v5  ;;  %7836 = vpow2.f32 %v5663_v40  ;;  %v11756_v5 = vld [vmem:[#allocation109_spill] sm:$0xff]  ;;  %v11757_v26 = vld [vmem:[#allocation88_spill] sm:$0xff] }
 0x3cc   : > { %v7819_v51 = vpop.eup %7818  ;;  %7838 = vtanh.f32 %v5138_v35  ;;  %5266 = vst [vmem:[%s10760_s17 + $0x148] sm:$0xff] %v5138_v35  ;;  %v2452_v59 = vadd.f32 1.0, %v7817_v56  ;;  %v5695_v35 = vmul.f32 -1.442695, %v6683_v44 }
 0x3cd   : > { %v7821_v47 = vpop.eup %7820  ;;  %v5141_v34 = vadd.f32 %v10912_v46, %v5077_v53  ;;  %7840 = vrcp.f32 %v4887_v19  ;;  %v4885_v9 = vadd.f32 1.0, %v7819_v51  ;;  %v11750_v46 = vld [vmem:[#allocation57_spill] sm:$0xff]  ;;  %v5958_v53 = vmul.f32 -1.442695, %v11757_v26 }
 0x3ce   : > { %v7823_v27 = vpop.eup %7822  ;;  %7842 = vrcp.f32 %v2450_v15  ;;  %v2263_v24 = vadd.f32 1.0, %v7821_v47  ;;  %v6679_v15 = vadd.f32 %v11756_v5, %v10124_v16  ;;  %v6246_v47 = vunpack.c.h.bf16 %v11043_v39 }
 0x3cf   : > { %v7825_v49 = vpop.eup %7824  ;;  %v5199_v50 = vmul.f32 %v7823_v27, %v10881_v3  ;;  %7844 = vtanh.f32 %v5141_v34  ;;  %5269 = vst [vmem:[%s10760_s17 + $0x178] sm:$0xff] %v5141_v34 }
 0x3d0   : > { %v7827_v22 = vpop.eup %7826  ;;  %v5043_v62 = vmul.f32 %v7825_v49, %v6234_v36  ;;  %7846 = vrcp.f32 %v4885_v9  ;;  %v5693_v27 = vmul.f32 -1.442695, %v6679_v15 }
 0x3d1   : > { %v7829_v48 = vpop.eup %7828  ;;  %5231 = vst [vmem:[%s10760_s17 + $0x110] sm:$0xff] %v5199_v50  ;;  %v11040_v7 = vmul.f32 %v7827_v22, %v11750_v46  ;;  %7848 = vrcp.f32 %v2263_v24  ;;  %v11759_v24 = vld [vmem:[#allocation61_spill] sm:$0xff]  ;;  %v6242_v22 = vunpack.c.h.bf16 %v11053_v63  ;;  %v6317_v63 = vld [vmem:[%s8372_s12 + $0x1f8] sm:$0xff]  }
 0x3d2   : > { %v7831_v2 = vpop.eup %7830  ;;  %v5075_v3 = vadd.f32 %v5043_v62, %v11752_v13  ;;  %v4888_v60 = vadd.f32 1.0, %v7829_v48  ;;  %7850 = vpow2.f32 %v5959_v10  ;;  %v11761_v62 = vld [vmem:[#allocation126_spill] sm:$0xff] }
 0x3d3   : > { %v7833_v6 = vpop.eup %7832  ;;  %v5204_v52 = vmul.f32 %v7831_v2, %v10988_v4  ;;  %7852 = vpow2.f32 %v5692_v21  ;;  %v6685_v48 = vadd.f32 %v11761_v62, %v10124_v16  ;;  %v11768_v62 = vld [vmem:[#allocation60_spill] sm:$0xff] }
 0x3d4   : > { %v7835_v20 = vpop.eup %7834  ;;  %v5139_v23 = vadd.f32 %v10873_v11, %v5075_v3  ;;  %7854 = vrcp.f32 %v4888_v60  ;;  %v2451_v46 = vadd.f32 1.0, %v7833_v6  ;;  %v11763_v6 = vld [vmem:[#allocation67_spill] sm:$0xff] }
 0x3d5   : > { %v7837_v61 = vpop.eup %7836  ;;  %5236 = vst [vmem:[%s10760_s17 + $0x160] sm:$0xff] %v5204_v52  ;;  %v4886_v57 = vadd.f32 1.0, %v7835_v20  ;;  %7856 = vpow2.f32 %v5957_v17 }
 0x3d6   : > { %v7839_v33 = vpop.eup %7838  ;;  %7858 = vtanh.f32 %v5139_v23  ;;  %5267 = vst [vmem:[%s10760_s17 + $0x158] sm:$0xff] %v5139_v23  ;;  %v2264_v4 = vadd.f32 1.0, %v7837_v61 }
 0x3d7   : > { %v7841_v40 = vpop.eup %7840  ;;  %7860 = vrcp.f32 %v2452_v59  ;;  %v5202_v11 = vmul.f32 %v7839_v33, %v10954_v58  ;;  %v5696_v59 = vmul.f32 -1.442695, %v6685_v48 }
 0x3d8   : > { %v11062_v8 = vpop.eup %7842  ;;  %v5048_v45 = vmul.f32 %v7841_v40, %v6245_v29  ;;  %7862 = vrcp.f32 %v4886_v57  ;;  %v11765_v57 = vld [vmem:[#allocation84_spill] sm:$0xff]  ;;  %v6253_v40 = vunpack.c.l.bf16 %v6317_v63 }
 0x3d9   : > { %v7845_v56 = vpop.eup %7844  ;;  %5234 = vst [vmem:[%s10760_s17 + $0x140] sm:$0xff] %v5202_v11  ;;  %7864 = vrcp.f32 %v2264_v4  ;;  %v6316_v11 = vld [vmem:[%s8372_s12 + $0x1f0] sm:$0xff]  }
 0x3da   : > { %v7847_v38 = vpop.eup %7846  ;;  %v5205_v58 = vmul.f32 %v7845_v56, %v11025_v0  ;;  %v5080_v19 = vadd.f32 %v5048_v45, %v11758_v37  ;;  %7866 = vpow2.f32 %v5664_v55  ;;  %v11760_v0 = vld [vmem:[#allocation74_spill] sm:$0xff] }
 0x3db   : > { %v7849_v51 = vpop.eup %7848  ;;  %v5046_v36 = vmul.f32 %v7847_v38, %v6241_v25  ;;  %7868 = vpow2.f32 %v5960_v28  ;;  %v11766_v37 = vld [vmem:[#allocation94_spill] sm:$0xff] }
 0x3dc   : > { %v7851_v34 = vpop.eup %7850  ;;  %5237 = vst [vmem:[%s10760_s17 + $0x170] sm:$0xff] %v5205_v58  ;;  %v5144_v9 = vadd.f32 %v11002_v1, %v5080_v19  ;;  %v11074_v18 = vmul.f32 %v7849_v51, %v11759_v24  ;;  %7870 = vpow2.f32 %v5695_v35  ;;  %v6249_v35 = vunpack.c.l.bf16 %v6316_v11  ;;  %v11767_v24 = vld [vmem:[#allocation91_spill] sm:$0xff] }
 0x3dd   : > { %v7853_v10 = vpop.eup %7852  ;;  %v5078_v49 = vadd.f32 %v5046_v36, %v11760_v0  ;;  %v4891_v50 = vadd.f32 1.0, %v7851_v34  ;;  %7872 = vpow2.f32 %v5958_v53  ;;  %v6254_v0 = vunpack.c.h.bf16 %v6317_v63 }
 0x3de   : > { %v7855_v21 = vpop.eup %7854  ;;  %7874 = vtanh.f32 %v5144_v9  ;;  %5272 = vst [vmem:[%s10760_s17 + $0x1a8] sm:$0xff] %v5144_v9  ;;  %v2453_v2 = vadd.f32 1.0, %v7853_v10 }
 0x3df   : > { %v7857_v1 = vpop.eup %7856  ;;  %v5142_v39 = vadd.f32 %v10948_v12, %v5078_v49  ;;  %v5049_v31 = vmul.f32 %v7855_v21, %v6246_v47  ;;  %7876 = vrcp.f32 %v4891_v50  ;;  %v6681_v12 = vadd.f32 %v11763_v6, %v10124_v16 }
 0x3e0   : > { %v7859_v17 = vpop.eup %7858  ;;  %7878 = vpow2.f32 %v5693_v27  ;;  %v4889_v13 = vadd.f32 1.0, %v7857_v1  ;;  %v6250_v1 = vunpack.c.h.bf16 %v6316_v11 }
 0x3e1   : > { %v7861_v3 = vpop.eup %7860  ;;  %v5203_v60 = vmul.f32 %v7859_v17, %v10974_v54  ;;  %7880 = vtanh.f32 %v5142_v39  ;;  %5270 = vst [vmem:[%s10760_s17 + $0x188] sm:$0xff] %v5142_v39  ;;  %v5081_v14 = vadd.f32 %v5049_v31, %v11762_v32  ;;  %v5694_v55 = vmul.f32 -1.442695, %v6681_v12 }
 0x3e2   : > { %v7863_v52 = vpop.eup %7862  ;;  %7882 = vrcp.f32 %v4889_v13 }
 0x3e3   : > { %v7865_v20 = vpop.eup %7864  ;;  %7884 = vrcp.f32 %v2451_v46  ;;  %5235 = vst [vmem:[%s10760_s17 + $0x150] sm:$0xff] %v5203_v60  ;;  %v5145_v23 = vadd.f32 %v11023_v43, %v5081_v14  ;;  %v5047_v29 = vmul.f32 %v7863_v52, %v6242_v22  ;;  %v11770_v52 = vld [vmem:[#allocation95_spill] sm:$0xff] }
 0x3e4   : > { %v7867_v54 = vpop.eup %7866  ;;  %7886 = vrcp.f32 %v2453_v2  ;;  %v5116_v44 = vmul.f32 %v7865_v20, %v11764_v41 }
 0x3e5   : > { %v7869_v61 = vpop.eup %7868  ;;  %7888 = vtanh.f32 %v5145_v23  ;;  %5273 = vst [vmem:[%s10760_s17 + $0x1b8] sm:$0xff] %v5145_v23  ;;  %v5079_v33 = vadd.f32 %v5047_v29, %v11765_v57  ;;  %v2265_v16 = vadd.f32 1.0, %v7867_v54 }
 0x3e6   : > { %v7871_v4 = vpop.eup %7870  ;;  %v4892_v25 = vadd.f32 1.0, %v7869_v61  ;;  %7890 = vpow2.f32 %v5696_v59 }
 0x3e7   : > { %v7873_v43 = vpop.eup %7872  ;;  %v5143_v30 = vadd.f32 %v10970_v42, %v5079_v33  ;;  %7892 = vrcp.f32 %v2265_v16  ;;  %v2456_v38 = vadd.f32 1.0, %v7871_v4 }
 0x3e8   : > { %v7875_v28 = vpop.eup %7874  ;;  %7894 = vrcp.f32 %v4892_v25  ;;  %v4890_v45 = vadd.f32 1.0, %v7873_v43 }
 0x3e9   : > { %v7877_v5 = vpop.eup %7876  ;;  %v5208_v15 = vmul.f32 %v7875_v28, %v7861_v3  ;;  %7896 = vtanh.f32 %v5143_v30  ;;  %5271 = vst [vmem:[%s10760_s17 + $0x198] sm:$0xff] %v5143_v30  ;;  %v11769_v3 = vld [vmem:[#allocation138_spill] sm:$0xff] }
 0x3ea   : > { %v7879_v56 = vpop.eup %7878  ;;  %7898 = vpow2.f32 %v5694_v55  ;;  %v5052_v26 = vmul.f32 %v7877_v5, %v6253_v40 }
 0x3eb   : > { %v7881_v53 = vpop.eup %7880  ;;  %5240 = vst [vmem:[%s10760_s17 + $0x1a0] sm:$0xff] %v5208_v15  ;;  %7900 = vrcp.f32 %v4890_v45  ;;  %v2454_v34 = vadd.f32 1.0, %v7879_v56 }
 0x3ec   : > { %v7883_v58 = vpop.eup %7882  ;;  %v5206_v42 = vmul.f32 %v7881_v53, %v11062_v8  ;;  %v5084_v19 = vadd.f32 %v5052_v26, %v11766_v37  ;;  %7902 = vrcp.f32 %v2456_v38 }
 0x3ed   : > { %v7885_v51 = vpop.eup %7884  ;;  %v5050_v36 = vmul.f32 %v7883_v58, %v6249_v35 }
 0x3ee   : > { %v7887_v47 = vpop.eup %7886  ;;  %5238 = vst [vmem:[%s10760_s17 + $0x180] sm:$0xff] %v5206_v42  ;;  %v5148_v9 = vadd.f32 %v5116_v44, %v5084_v19 }
 0x3ef   : > { %v7889_v27 = vpop.eup %7888  ;;  %v5082_v10 = vadd.f32 %v5050_v36, %v11767_v24 }
 0x3f0   : > { %v7891_v49 = vpop.eup %7890  ;;  %v5209_v50 = vmul.f32 %v7889_v27, %v7887_v47  ;;  %7904 = vtanh.f32 %v5148_v9  ;;  %5276 = vst [vmem:[%s10760_s17 + $0x1e8] sm:$0xff] %v5148_v9 }
 0x3f1   : > { %v7893_v8 = vpop.eup %7892  ;;  %v5146_v21 = vadd.f32 %v11040_v7, %v5082_v10  ;;  %7906 = vrcp.f32 %v2454_v34  ;;  %v2457_v2 = vadd.f32 1.0, %v7891_v49 }
 0x3f2   : > { %v7895_v22 = vpop.eup %7894  ;;  %5241 = vst [vmem:[%s10760_s17 + $0x1b0] sm:$0xff] %v5209_v50  ;;  %v5117_v48 = vmul.f32 %v7893_v8, %v11768_v62 }
 0x3f3   : > { %v7897_v46 = vpop.eup %7896  ;;  %7908 = vtanh.f32 %v5146_v21  ;;  %5274 = vst [vmem:[%s10760_s17 + $0x1c8] sm:$0xff] %v5146_v21  ;;  %v5053_v39 = vmul.f32 %v7895_v22, %v6254_v0 }
 0x3f4   : > { %v7899_v31 = vpop.eup %7898  ;;  %v5207_v17 = vmul.f32 %v7897_v46, %v7885_v51  ;;  %7910 = vrcp.f32 %v2457_v2 }
 0x3f5   : > { %v7901_v13 = vpop.eup %7900  ;;  %v5085_v60 = vadd.f32 %v5053_v39, %v11769_v3  ;;  %v2455_v32 = vadd.f32 1.0, %v7899_v31 }
 0x3f6   : > { %5239 = vst [vmem:[%s10760_s17 + $0x190] sm:$0xff] %v5207_v17  ;;  %v5051_v7 = vmul.f32 %v7901_v13, %v6250_v1  ;;  %v7903_v12 = vpop.eup %7902 }
 0x3f7   : > { %v5149_v14 = vadd.f32 %v5117_v48, %v5085_v60 }
 0x3f8   : > { %v5083_v6 = vadd.f32 %v5051_v7, %v11770_v52 }
 0x3f9   : > { %7912 = vtanh.f32 %v5149_v14  ;;  %5277 = vst [vmem:[%s10760_s17 + $0x1f8] sm:$0xff] %v5149_v14 }
 0x3fa   : > { %v7905_v59 = vpop.eup %7904  ;;  %v5147_v20 = vadd.f32 %v11074_v18, %v5083_v6  ;;  %7914 = vrcp.f32 %v2455_v32 }
 0x3fb   : > { %v5212_v23 = vmul.f32 %v7905_v59, %v7903_v12  ;;  %v7907_v29 = vpop.eup %7906 }
 0x3fc   : > { %7916 = vtanh.f32 %v5147_v20  ;;  %5275 = vst [vmem:[%s10760_s17 + $0x1d8] sm:$0xff] %v5147_v20 }
 0x3fd   : > { %v7909_v63 = vpop.eup %7908  ;;  %5244 = vst [vmem:[%s10760_s17 + $0x1e0] sm:$0xff] %v5212_v23 }
 0x3fe   : > { %v5210_v54 = vmul.f32 %v7909_v63, %v7907_v29  ;;  %v7911_v41 = vpop.eup %7910 }
 0x400   : > { %5242 = vst [vmem:[%s10760_s17 + $0x1c0] sm:$0xff] %v5210_v54 }
 0x403   : > { %v7913_v44 = vpop.eup %7912 }
 0x404   : > { %v5213_v61 = vmul.f32 %v7913_v44, %v7911_v41  ;;  %v7915_v57 = vpop.eup %7914 }
 0x406   : > { %v7917_v33 = vpop.eup %7916  ;;  %5245 = vst [vmem:[%s10760_s17 + $0x1f0] sm:$0xff] %v5213_v61 }
 0x407   : > { %v5211_v16 = vmul.f32 %v7917_v33, %v7915_v57 }
 0x409   : > { %5243 = vst [vmem:[%s10760_s17 + $0x1d0] sm:$0xff] %v5211_v16 }
 0x40a PF: > { %s11771_s20 = sld [smem:[#allocation22_spill]]  ;;  %p22_p6 = scmp.ge.s32.totalorder %s8170_s29, 4  }
 0x40b   : > { %s11772_s24 = smov %s8073_s25  ;;  %s11773_s25 = smov %s8077_s26 }
 0x40c   : > { %s11775_s27 = smov %s8170_s29  ;;  %24 = sbr.rel (!%p22_p6) target bundleno = 9 (0x9), region = 140 }
 0x410   : > { %s11774_s26 = smov %s11771_s20 }
 0x413   :  { %5302 = vsyncpa [#allocation3], 1 }
 0x414   :  { %5304 = vsyncpa [#allocation3 + $0x1], 1 }
 0x415   :  { %5305 = vsyncpa [#allocation5], 1 }
 0x416   :  { %5307 = vsyncpa [#allocation5 + $0x1], 1 }
 0x417   :  { %5308 = vsyncpa [#allocation8], 1 }
 0x418   :  { %5309 = vsyncpa [#allocation11], 1 }

</bundles_post_ra>
